<compile_context>
chip_gen: v6e
topology: v6e:2x2x1
jax: 0.10.0
libtpu: 0.0.40
codegen_flags: <defaults>
</compile_context>

<pallas_src>
import functools
import numpy as np

import jax
import jax.numpy as jnp
from jax.experimental import pallas as pl
from jax.experimental.pallas import tpu as pltpu


# ------------------------- weight pre-processing ---------------------------
# (runs once, outside the jitted forward)

def _temporal_delta(T):
    # e[kt, t_in, t_out] = 1 iff t_in == t_out + kt - 1   (zero-padded in t)
    e = np.zeros((3, T, T), np.float32)
    for kt in range(3):
        for t_out in range(T):
            t_in = t_out + kt - 1
            if 0 <= t_in < T:
                e[kt, t_in, t_out] = 1.0
    return e


def conv3d_to_tap_matrices(w, T):
    """PyTorch Conv3d weight (c_out, c_in, 3, 3, 3) -> (3, 3*C_in, C_out).

    Row group kh stacks the kw=0,1,2 taps along the K axis (matching the
    lane-concatenated conv slabs); each tap maps input channel ci*T+t_in to
    output channel co*T+t_out with the temporal taps / temporal zero padding
    folded in, so the 3x3x3 conv in token layout is 3 matmuls of
    (H*W, 3*C_in) @ (3*C_in, C_out).
    """
    c_out, c_in = w.shape[0], w.shape[1]
    e = jnp.asarray(_temporal_delta(T))
    m = jnp.einsum("oiabc,asu->bcisou", w, e)      # (3,3, c_in,T, c_out,T)
    return m.reshape(3, 3 * c_in * T, c_out * T)


def depthwise3d_to_tap_matrices(w, T):
    """Depthwise Conv3d weight (c, 1, 3, 3, 3) -> (3, 3*C, C) tap matrices."""
    c = w.shape[0]
    w_eq = jnp.einsum("iabc,io->oiabc", w[:, 0], jnp.eye(c, dtype=w.dtype))
    return conv3d_to_tap_matrices(w_eq, T)


def expand_bias(b, T):
    # per-ci bias -> per token channel (ci*T + t)
    return jnp.repeat(b, T)


def compute_relative_position_index(ws):
    coords = np.stack(np.meshgrid(np.arange(ws), np.arange(ws), indexing="ij"))
    coords_flat = coords.reshape(2, -1)
    rel = coords_flat[:, :, None] - coords_flat[:, None, :]
    rel = rel.transpose(1, 2, 0).astype(np.int64)
    rel[:, :, 0] += ws - 1
    rel[:, :, 1] += ws - 1
    rel[:, :, 0] *= 2 * ws - 1
    return rel.sum(-1)                                                # (N, N)


def calculate_mask(x_size, ws, shift_size):
    # exact replica of SwinAttention.calculate_mask for shift_size > 0
    T, H, W = x_size
    img_mask = np.zeros((1, H, W, 1), np.float32)
    sl = (slice(0, -ws), slice(-ws, -shift_size), slice(-shift_size, None))
    cnt = 0
    for h in sl:
        for w in sl:
            img_mask[:, h, w, :] = cnt
            cnt += 1
    mw = img_mask.reshape(1, H // ws, ws, W // ws, ws, 1).transpose(0, 1, 3, 2, 4, 5)
    mw = mw.reshape(-1, ws * ws)
    attn_mask = mw[:, None, :] - mw[:, :, None]
    return np.where(attn_mask != 0, np.float32(-100.0), np.float32(0.0))


def prepare_params(params, x_size, window_size, num_heads):
    """One-time (hoisted) preprocessing of PyTorch-convention weights into the
    kernel-ready layout: bf16 matmul operands, folded conv tap matrices,
    gathered relative-position bias, precomputed shift masks."""
    T, H, W = x_size
    C = params["blocks"][0]["wqkv"].shape[0]
    ws = window_size
    N = ws * ws
    rpi = compute_relative_position_index(ws).reshape(-1)
    blocks = []
    for i, p in enumerate(params["blocks"]):
        shift = 0 if i % 2 == 0 else ws // 2
        rel = p["rel_bias_table"][rpi].reshape(N, N, num_heads)
        rel = jnp.transpose(rel, (2, 0, 1)).astype(jnp.float32)      # (h,N,N)
        blocks.append({
            "norm1_g": p["norm1_g"].reshape(1, C),
            "norm1_b": p["norm1_b"].reshape(1, C),
            "wqkv": p["wqkv"].astype(jnp.bfloat16),
            "bqkv": p["bqkv"].reshape(1, 3 * C),
            "wproj": p["wproj"].astype(jnp.bfloat16),
            "bproj": p["bproj"].reshape(1, C),
            "rel_bias": rel,
            "norm2_g": p["norm2_g"].reshape(1, C),
            "norm2_b": p["norm2_b"].reshape(1, C),
            "dw_w3": depthwise3d_to_tap_matrices(p["dw_w"], T).astype(jnp.bfloat16),
            "dw_b": expand_bias(p["dw_b"], T).reshape(1, C),
            "mask": (jnp.asarray(calculate_mask(x_size, ws, shift))
                     if shift > 0 else None),
        })
    return {
        "blocks": blocks,
        "conv_w3": conv3d_to_tap_matrices(params["conv_w"], T).astype(jnp.bfloat16),
        "conv_b": expand_bias(params["conv_b"], T).reshape(1, C),
    }


# ------------------------------ kernel helpers ------------------------------

def _layernorm(x, g, b):
    mu = jnp.mean(x, axis=-1, keepdims=True)
    xc = x - mu
    var = jnp.mean(xc * xc, axis=-1, keepdims=True)
    return xc * jax.lax.rsqrt(var + 1e-5) * g + b


def _roll_hw(a, sh, sw):
    """Cyclic roll of an (H, W, C) frame by (sh, sw) on axes (0, 1).
    Static shifts -> in-VMEM slice+concat, no HBM round trip."""
    if sh:
        a = jnp.concatenate([a[-sh:], a[:-sh]], axis=0)
    if sw:
        a = jnp.concatenate([a[:, -sw:], a[:, :-sw]], axis=1)
    return a


def _window_partition(xs, ws, H, W, C):
    """(H, W, C) -> (nW*N, C), window-major, row-major inside each window."""
    wins = []
    for wi in range(H // ws):
        for wj in range(W // ws):
            wins.append(xs[wi * ws:(wi + 1) * ws,
                           wj * ws:(wj + 1) * ws, :].reshape(ws * ws, C))
    return jnp.concatenate(wins, axis=0)


def _window_reverse(y, ws, H, W, C):
    """(nW*N, C) -> (H, W, C); inverse of _window_partition."""
    N = ws * ws
    nww = W // ws
    rows = []
    for wi in range(H // ws):
        cols = []
        for wj in range(nww):
            widx = wi * nww + wj
            cols.append(y[widx * N:(widx + 1) * N, :].reshape(ws, ws, C))
        rows.append(jnp.concatenate(cols, axis=1))
    return jnp.concatenate(rows, axis=0)


def _fill_padded(xpad_ref, x_hwc, H, W, C):
    """Write the frame into the (H+2, W+2, C) halo scratch with a zero border.
    Only the stored rows carry zeros (no full-scratch clear every step)."""
    zc = jnp.zeros((H, 1, C), jnp.float32)
    xpad_ref[1:H + 1, :, :] = jnp.concatenate([zc, x_hwc, zc], axis=1)
    xpad_ref[0, :, :] = jnp.zeros((W + 2, C), jnp.float32)
    xpad_ref[H + 1, :, :] = jnp.zeros((W + 2, C), jnp.float32)


def _conv3x3(xpad_ref, w3_ref, H, W, C):
    """3x3(x3) conv as 3 fat MXU matmuls: per kh the three kw-shifted slabs are
    lane-concatenated into one (H*W, 3C) operand (K=3C, bf16 operands)."""
    acc = None
    for kh in range(3):
        slab = jnp.concatenate(
            [xpad_ref[kh:kh + H, 0:W, :],
             xpad_ref[kh:kh + H, 1:W + 1, :],
             xpad_ref[kh:kh + H, 2:W + 2, :]], axis=-1).reshape(H * W, 3 * C)
        part = jnp.dot(slab.astype(jnp.bfloat16), w3_ref[kh],
                       preferred_element_type=jnp.float32)
        acc = part if acc is None else acc + part
    return acc


# ----------------------------- Pallas kernels ------------------------------

def _swin_block_kernel(x_ref, n1g_ref, n1b_ref, wqkv_ref, bqkv_ref, wproj_ref,
                       bproj_ref, bias_ref, n2g_ref, n2b_ref, w3_ref, dwb_ref,
                       *rest, H, W, C, ws, shift, num_heads):
    if shift > 0:
        mask_ref, o_ref, xpad_ref = rest
    else:
        o_ref, xpad_ref = rest

    L = H * W
    nW = (H // ws) * (W // ws)
    N = ws * ws
    hd = C // num_heads
    scale = hd ** (-0.5)

    x = x_ref[0].astype(jnp.float32)                                # (H, W, C)

    # --- norm1 + cyclic shift + window partition (all in VMEM) ---
    xn = _layernorm(x.reshape(L, C), n1g_ref[0], n1b_ref[0]).reshape(H, W, C)
    if shift > 0:
        xn = _roll_hw(xn, -shift, -shift)
    xw = _window_partition(xn, ws, H, W, C)                         # (nW*N, C)

    # --- one QKV matmul for all windows of this batch element (bf16 MXU) ---
    qkv = jnp.dot(xw.astype(jnp.bfloat16), wqkv_ref[...],
                  preferred_element_type=jnp.float32) + bqkv_ref[0]

    # --- per-head attention; each head folds straight into the output
    #     projection accumulator (no concat, small live set) ---
    y = None
    for h in range(num_heads):
        q = qkv[:, h * hd:(h + 1) * hd].reshape(nW, N, hd).astype(jnp.bfloat16)
        k = qkv[:, C + h * hd:C + (h + 1) * hd].reshape(nW, N, hd).astype(jnp.bfloat16)
        v = qkv[:, 2 * C + h * hd:2 * C + (h + 1) * hd].reshape(nW, N, hd).astype(jnp.bfloat16)
        s = jnp.einsum("wnd,wmd->wnm", q, k,
                       preferred_element_type=jnp.float32) * scale   # (nW,N,N)
        s = s + bias_ref[h]
        if shift > 0:
            s = s + mask_ref[...]
        s = s - jnp.max(s, axis=-1, keepdims=True)
        p = jnp.exp(s)
        p = p * pl.reciprocal(jnp.sum(p, axis=-1, keepdims=True), approx=True)
        yh = jnp.einsum("wnm,wmd->wnd", p.astype(jnp.bfloat16), v,
                        preferred_element_type=jnp.float32)          # (nW,N,hd)
        ph = jnp.dot(yh.reshape(nW * N, hd).astype(jnp.bfloat16),
                     wproj_ref[h * hd:(h + 1) * hd, :],
                     preferred_element_type=jnp.float32)
        y = ph if y is None else y + ph
    y = y + bproj_ref[0]                                             # (nW*N, C)

    # --- window reverse + un-shift + first residual ---
    yr = _window_reverse(y, ws, H, W, C)
    if shift > 0:
        yr = _roll_hw(yr, shift, shift)
    x1 = x + yr                                                      # (H, W, C)

    # --- norm2 + depthwise 3x3x3 conv (folded taps) + second residual ---
    xn2 = _layernorm(x1.reshape(L, C), n2g_ref[0], n2b_ref[0]).reshape(H, W, C)
    _fill_padded(xpad_ref, xn2, H, W, C)
    conv = _conv3x3(xpad_ref, w3_ref, H, W, C) + dwb_ref[0]
    o_ref[0] = (x1 + conv.reshape(H, W, C)).astype(o_ref.dtype)


def _rstb_tail_kernel(x_ref, w3_ref, b_ref, o_ref, xpad_ref, *, H, W, C):
    # out = conv3d(x) + x  (dense conv, taps folded)
    x = x_ref[0].astype(jnp.float32)                                 # (H, W, C)
    _fill_padded(xpad_ref, x, H, W, C)
    conv = _conv3x3(xpad_ref, w3_ref, H, W, C) + b_ref[0]
    o_ref[0] = (x + conv.reshape(H, W, C)).astype(o_ref.dtype)


# ------------------------------- wrappers -----------------------------------

def swin_block(x, blk, x_size, window_size, shift, num_heads):
    T, H, W = x_size
    B, _, _, C = x.shape
    ws = window_size
    nW = (H // ws) * (W // ws)
    N = ws * ws
    kernel = functools.partial(_swin_block_kernel, H=H, W=W, C=C, ws=ws,
                               shift=shift, num_heads=num_heads)
    in_specs = [
        pl.BlockSpec((1, H, W, C), lambda b: (b, 0, 0, 0)),
        pl.BlockSpec((1, C), lambda b: (0, 0)),
        pl.BlockSpec((1, C), lambda b: (0, 0)),
        pl.BlockSpec((C, 3 * C), lambda b: (0, 0)),
        pl.BlockSpec((1, 3 * C), lambda b: (0, 0)),
        pl.BlockSpec((C, C), lambda b: (0, 0)),
        pl.BlockSpec((1, C), lambda b: (0, 0)),
        pl.BlockSpec((num_heads, N, N), lambda b: (0, 0, 0)),
        pl.BlockSpec((1, C), lambda b: (0, 0)),
        pl.BlockSpec((1, C), lambda b: (0, 0)),
        pl.BlockSpec((3, 3 * C, C), lambda b: (0, 0, 0)),
        pl.BlockSpec((1, C), lambda b: (0, 0)),
    ]
    args = [x, blk["norm1_g"], blk["norm1_b"], blk["wqkv"], blk["bqkv"],
            blk["wproj"], blk["bproj"], blk["rel_bias"],
            blk["norm2_g"], blk["norm2_b"], blk["dw_w3"], blk["dw_b"]]
    if shift > 0:   # the shift==0 mask is identically zero and is skipped
        in_specs.append(pl.BlockSpec((nW, N, N), lambda b: (0, 0, 0)))
        args.append(blk["mask"])
    return pl.pallas_call(
        kernel,
        out_shape=jax.ShapeDtypeStruct((B, H, W, C), x.dtype),
        grid_spec=pltpu.PrefetchScalarGridSpec(
            num_scalar_prefetch=0, grid=(B,),
            in_specs=in_specs,
            out_specs=pl.BlockSpec((1, H, W, C), lambda b: (b, 0, 0, 0)),
            scratch_shapes=[pltpu.VMEM((H + 2, W + 2, C), jnp.float32)]),
        compiler_params=pltpu.CompilerParams(
            dimension_semantics=("parallel",)),
    )(*args)


def rstb_tail(x, w3, bias, x_size):
    T, H, W = x_size
    B, _, _, C = x.shape
    kernel = functools.partial(_rstb_tail_kernel, H=H, W=W, C=C)
    return pl.pallas_call(
        kernel,
        out_shape=jax.ShapeDtypeStruct((B, H, W, C), x.dtype),
        grid_spec=pltpu.PrefetchScalarGridSpec(
            num_scalar_prefetch=0, grid=(B,),
            in_specs=[pl.BlockSpec((1, H, W, C), lambda b: (b, 0, 0, 0)),
                      pl.BlockSpec((3, 3 * C, C), lambda b: (0, 0, 0)),
                      pl.BlockSpec((1, C), lambda b: (0, 0))],
            out_specs=pl.BlockSpec((1, H, W, C), lambda b: (b, 0, 0, 0)),
            scratch_shapes=[pltpu.VMEM((H + 2, W + 2, C), jnp.float32)]),
        compiler_params=pltpu.CompilerParams(
            dimension_semantics=("parallel",)),
    )(x, w3, bias)


@functools.partial(jax.jit, static_argnums=(2, 3, 4, 5))
def rstb_forward(x, prepared, x_size, window_size, num_heads, depth):
    T, H, W = x_size
    B, L, C = x.shape
    x = x.reshape(B, H, W, C)          # free layout change; kernels keep it
    for i in range(depth):
        shift = 0 if i % 2 == 0 else window_size // 2
        x = swin_block(x, prepared["blocks"][i], x_size, window_size, shift,
                       num_heads)
    x = rstb_tail(x, prepared["conv_w3"], prepared["conv_b"], x_size)
    return x.reshape(B, L, C)


# ------------------------------ parameter init -----------------------------

def init_params(key, C, T, num_heads, window_size, depth):
    c = C // T

    def nrm(k, shape, std=0.02):
        return std * jax.random.normal(k, shape, jnp.float32)

    params = {"blocks": []}
    for _ in range(depth):
        key, *ks = jax.random.split(key, 12)
        params["blocks"].append({
            "norm1_g": 1.0 + nrm(ks[0], (C,)),
            "norm1_b": nrm(ks[1], (C,)),
            "rel_bias_table": nrm(ks[2], ((2 * window_size - 1) ** 2, num_heads)),
            "wqkv": nrm(ks[3], (C, 3 * C)),        # Linear weight^T (in, out)
            "bqkv": nrm(ks[4], (3 * C,)),
            "wproj": nrm(ks[5], (C, C)),           # Linear weight^T (in, out)
            "bproj": nrm(ks[6], (C,)),
            "norm2_g": 1.0 + nrm(ks[7], (C,)),
            "norm2_b": nrm(ks[8], (C,)),
            "dw_w": nrm(ks[9], (c, 1, 3, 3, 3)),   # PyTorch depthwise Conv3d
            "dw_b": nrm(ks[10], (c,)),
        })
    key, k1, k2 = jax.random.split(key, 3)
    params["conv_w"] = nrm(k1, (c, c, 3, 3, 3))    # PyTorch Conv3d (co,ci,kt,kh,kw)
    params["conv_b"] = nrm(k2, (c,))
    return params


# ----------------------------------- main -----------------------------------

if __name__ == "__main__":
    B, T, H, W = 2, 2, 8, 8
    C = 16                       # dim = c * T  ->  c = 8
    num_heads = 2
    window_size = 4
    depth = 2                    # block 0: shift 0, block 1: shift ws//2
    L = H * W

    key = jax.random.PRNGKey(0)
    kx, kp = jax.random.split(key)
    x = jax.random.normal(kx, (B, L, C), jnp.float32)
    params = init_params(kp, C, T, num_heads, window_size, depth)
    prepared = prepare_params(params, (T, H, W), window_size, num_heads)

    out = rstb_forward(x, prepared, (T, H, W), window_size, num_heads, depth)
    out = jax.block_until_ready(out)

    assert out.shape == (B, L, C), out.shape
    assert bool(jnp.all(jnp.isfinite(out)))
    print("KERNEL_OK")
</pallas_src>

<mosaic_0001>
module attributes {stable_mosaic.version = 11 : i64} {
  func.func @_swin_block_kernel(%arg0: i32, %arg1: memref<1x8x8x16xf32, #tpu.memory_space<vmem>>, %arg2: memref<1x16xf32, #tpu.memory_space<vmem>>, %arg3: memref<1x16xf32, #tpu.memory_space<vmem>>, %arg4: memref<16x48xbf16, #tpu.memory_space<vmem>>, %arg5: memref<1x48xf32, #tpu.memory_space<vmem>>, %arg6: memref<16x16xbf16, #tpu.memory_space<vmem>>, %arg7: memref<1x16xf32, #tpu.memory_space<vmem>>, %arg8: memref<2x16x16xf32, #tpu.memory_space<vmem>>, %arg9: memref<1x16xf32, #tpu.memory_space<vmem>>, %arg10: memref<1x16xf32, #tpu.memory_space<vmem>>, %arg11: memref<3x48x16xbf16, #tpu.memory_space<vmem>>, %arg12: memref<1x16xf32, #tpu.memory_space<vmem>>, %arg13: memref<4x16x16xf32, #tpu.memory_space<vmem>>, %arg14: memref<1x8x8x16xf32, #tpu.memory_space<vmem>>, %arg15: memref<10x10x16xf32, #tpu.memory_space<vmem>>) attributes {dimension_semantics = [#tpu.dimension_semantics<parallel>], iteration_bounds = array<i64: 2>, scalar_prefetch = 0 : i64, scratch_operands = 1 : i64, tpu.core_type = #tpu.core_type<tc>, window_params = [{transform_indices = @transform_0, window_bounds = array<i64: 1, 8, 8, 16>}, {pipeline_mode = #tpu.pipeline_mode<synchronous>, transform_indices = @transform_1, window_bounds = array<i64: 1, 16>}, {pipeline_mode = #tpu.pipeline_mode<synchronous>, transform_indices = @transform_2, window_bounds = array<i64: 1, 16>}, {pipeline_mode = #tpu.pipeline_mode<synchronous>, transform_indices = @transform_3, window_bounds = array<i64: 16, 48>}, {pipeline_mode = #tpu.pipeline_mode<synchronous>, transform_indices = @transform_4, window_bounds = array<i64: 1, 48>}, {pipeline_mode = #tpu.pipeline_mode<synchronous>, transform_indices = @transform_5, window_bounds = array<i64: 16, 16>}, {pipeline_mode = #tpu.pipeline_mode<synchronous>, transform_indices = @transform_6, window_bounds = array<i64: 1, 16>}, {pipeline_mode = #tpu.pipeline_mode<synchronous>, transform_indices = @transform_7, window_bounds = array<i64: 2, 16, 16>}, {pipeline_mode = #tpu.pipeline_mode<synchronous>, transform_indices = @transform_8, window_bounds = array<i64: 1, 16>}, {pipeline_mode = #tpu.pipeline_mode<synchronous>, transform_indices = @transform_9, window_bounds = array<i64: 1, 16>}, {pipeline_mode = #tpu.pipeline_mode<synchronous>, transform_indices = @transform_10, window_bounds = array<i64: 3, 48, 16>}, {pipeline_mode = #tpu.pipeline_mode<synchronous>, transform_indices = @transform_11, window_bounds = array<i64: 1, 16>}, {pipeline_mode = #tpu.pipeline_mode<synchronous>, transform_indices = @transform_12, window_bounds = array<i64: 4, 16, 16>}, {transform_indices = @transform_13, window_bounds = array<i64: 1, 8, 8, 16>}]} {
    %c0 = arith.constant 0 : index
    %c0_0 = arith.constant 0 : index
    %c0_1 = arith.constant 0 : index
    %c0_2 = arith.constant 0 : index
    %0 = vector.load %arg1[%c0, %c0_0, %c0_1, %c0_2] : memref<1x8x8x16xf32, #tpu.memory_space<vmem>>, vector<1x8x8x16xf32>
    %1 = vector.shape_cast %0 : vector<1x8x8x16xf32> to vector<8x8x16xf32>
    %2 = vector.shape_cast %1 : vector<8x8x16xf32> to vector<64x16xf32>
    %c0_3 = arith.constant 0 : index
    %c0_4 = arith.constant 0 : index
    %3 = vector.load %arg2[%c0_3, %c0_4] : memref<1x16xf32, #tpu.memory_space<vmem>>, vector<1x16xf32>
    %4 = vector.shape_cast %3 : vector<1x16xf32> to vector<16xf32>
    %c0_5 = arith.constant 0 : index
    %c0_6 = arith.constant 0 : index
    %5 = vector.load %arg3[%c0_5, %c0_6] : memref<1x16xf32, #tpu.memory_space<vmem>>, vector<1x16xf32>
    %6 = vector.shape_cast %5 : vector<1x16xf32> to vector<16xf32>
    %cst = arith.constant dense<0.000000e+00> : vector<64xf32>
    %7 = vector.multi_reduction <add>, %2, %cst [1] : vector<64x16xf32> to vector<64xf32>
    %8 = vector.shape_cast %7 : vector<64xf32> to vector<64x1xf32>
    %cst_7 = arith.constant 1.600000e+01 : f32
    %9 = vector.broadcast %cst_7 : f32 to vector<64x1xf32>
    %10 = arith.divf %8, %9 : vector<64x1xf32>
    %11 = vector.broadcast %10 : vector<64x1xf32> to vector<64x16xf32>
    %12 = arith.subf %2, %11 : vector<64x16xf32>
    %13 = arith.mulf %12, %12 : vector<64x16xf32>
    %cst_8 = arith.constant dense<0.000000e+00> : vector<64xf32>
    %14 = vector.multi_reduction <add>, %13, %cst_8 [1] : vector<64x16xf32> to vector<64xf32>
    %15 = vector.shape_cast %14 : vector<64xf32> to vector<64x1xf32>
    %cst_9 = arith.constant 1.600000e+01 : f32
    %16 = vector.broadcast %cst_9 : f32 to vector<64x1xf32>
    %17 = arith.divf %15, %16 : vector<64x1xf32>
    %cst_10 = arith.constant 9.99999974E-6 : f32
    %18 = vector.broadcast %cst_10 : f32 to vector<64x1xf32>
    %19 = arith.addf %17, %18 : vector<64x1xf32>
    %20 = math.rsqrt %19 : vector<64x1xf32>
    %21 = vector.broadcast %20 : vector<64x1xf32> to vector<64x16xf32>
    %22 = arith.mulf %12, %21 : vector<64x16xf32>
    %23 = vector.shape_cast %4 : vector<16xf32> to vector<1x16xf32>
    %24 = vector.broadcast %23 : vector<1x16xf32> to vector<64x16xf32>
    %25 = arith.mulf %22, %24 : vector<64x16xf32>
    %26 = vector.shape_cast %6 : vector<16xf32> to vector<1x16xf32>
    %27 = vector.broadcast %26 : vector<1x16xf32> to vector<64x16xf32>
    %28 = arith.addf %25, %27 : vector<64x16xf32>
    %29 = vector.shape_cast %28 : vector<64x16xf32> to vector<8x8x16xf32>
    %30 = vector.extract_strided_slice %29 {offsets = [2, 0, 0], sizes = [6, 8, 16], strides = [1, 1, 1]} : vector<8x8x16xf32> to vector<6x8x16xf32>
    %31 = vector.extract_strided_slice %29 {offsets = [0, 0, 0], sizes = [2, 8, 16], strides = [1, 1, 1]} : vector<8x8x16xf32> to vector<2x8x16xf32>
    %32 = tpu.concatenate %30, %31 in 0 : vector<6x8x16xf32>, vector<2x8x16xf32> -> vector<8x8x16xf32>
    %33 = vector.extract_strided_slice %32 {offsets = [0, 2, 0], sizes = [8, 6, 16], strides = [1, 1, 1]} : vector<8x8x16xf32> to vector<8x6x16xf32>
    %34 = vector.extract_strided_slice %32 {offsets = [0, 0, 0], sizes = [8, 2, 16], strides = [1, 1, 1]} : vector<8x8x16xf32> to vector<8x2x16xf32>
    %35 = tpu.concatenate %33, %34 in 1 : vector<8x6x16xf32>, vector<8x2x16xf32> -> vector<8x8x16xf32>
    %36 = vector.extract_strided_slice %35 {offsets = [0, 0, 0], sizes = [4, 4, 16], strides = [1, 1, 1]} : vector<8x8x16xf32> to vector<4x4x16xf32>
    %37 = vector.shape_cast %36 : vector<4x4x16xf32> to vector<16x16xf32>
    %38 = vector.extract_strided_slice %35 {offsets = [0, 4, 0], sizes = [4, 4, 16], strides = [1, 1, 1]} : vector<8x8x16xf32> to vector<4x4x16xf32>
    %39 = vector.shape_cast %38 : vector<4x4x16xf32> to vector<16x16xf32>
    %40 = vector.extract_strided_slice %35 {offsets = [4, 0, 0], sizes = [4, 4, 16], strides = [1, 1, 1]} : vector<8x8x16xf32> to vector<4x4x16xf32>
    %41 = vector.shape_cast %40 : vector<4x4x16xf32> to vector<16x16xf32>
    %42 = vector.extract_strided_slice %35 {offsets = [4, 4, 0], sizes = [4, 4, 16], strides = [1, 1, 1]} : vector<8x8x16xf32> to vector<4x4x16xf32>
    %43 = vector.shape_cast %42 : vector<4x4x16xf32> to vector<16x16xf32>
    %44 = tpu.concatenate %37, %39, %41, %43 in 0 : vector<16x16xf32>, vector<16x16xf32>, vector<16x16xf32>, vector<16x16xf32> -> vector<64x16xf32>
    %45 = arith.truncf %44 : vector<64x16xf32> to vector<64x16xbf16>
    %c0_11 = arith.constant 0 : index
    %c0_12 = arith.constant 0 : index
    %46 = vector.load %arg4[%c0_11, %c0_12] : memref<16x48xbf16, #tpu.memory_space<vmem>>, vector<16x48xbf16>
    %cst_13 = arith.constant dense<0.000000e+00> : vector<64x48xf32>
    %47 = tpu.matmul %45, %46, %cst_13 {dimension_numbers = #tpu.dot_dimension_numbers<[1], [0], [0], [1], [0, 0, 1, 1], [], []>} : vector<64x16xbf16>, vector<16x48xbf16>, vector<64x48xf32> -> vector<64x48xf32>
    %c0_14 = arith.constant 0 : index
    %c0_15 = arith.constant 0 : index
    %48 = vector.load %arg5[%c0_14, %c0_15] : memref<1x48xf32, #tpu.memory_space<vmem>>, vector<1x48xf32>
    %49 = vector.shape_cast %48 : vector<1x48xf32> to vector<48xf32>
    %50 = vector.shape_cast %49 : vector<48xf32> to vector<1x48xf32>
    %51 = vector.broadcast %50 : vector<1x48xf32> to vector<64x48xf32>
    %52 = arith.addf %47, %51 : vector<64x48xf32>
    %53 = vector.extract_strided_slice %52 {offsets = [0, 0], sizes = [64, 8], strides = [1, 1]} : vector<64x48xf32> to vector<64x8xf32>
    %54 = vector.shape_cast %53 : vector<64x8xf32> to vector<4x16x8xf32>
    %55 = arith.truncf %54 : vector<4x16x8xf32> to vector<4x16x8xbf16>
    %56 = vector.extract_strided_slice %52 {offsets = [0, 16], sizes = [64, 8], strides = [1, 1]} : vector<64x48xf32> to vector<64x8xf32>
    %57 = vector.shape_cast %56 : vector<64x8xf32> to vector<4x16x8xf32>
    %58 = arith.truncf %57 : vector<4x16x8xf32> to vector<4x16x8xbf16>
    %59 = vector.extract_strided_slice %52 {offsets = [0, 32], sizes = [64, 8], strides = [1, 1]} : vector<64x48xf32> to vector<64x8xf32>
    %60 = vector.shape_cast %59 : vector<64x8xf32> to vector<4x16x8xf32>
    %61 = arith.truncf %60 : vector<4x16x8xf32> to vector<4x16x8xbf16>
    "tpu.trace_start"() <{level = 10 : i32, message = "wnd,wmd->wnm"}> : () -> ()
    %cst_16 = arith.constant dense<0.000000e+00> : vector<4x16x16xf32>
    %62 = tpu.matmul %55, %58, %cst_16 {dimension_numbers = #tpu.dot_dimension_numbers<[2], [2], [1], [1], [0, 0, 0, 1, 1, 1], [0], [0]>} : vector<4x16x8xbf16>, vector<4x16x8xbf16>, vector<4x16x16xf32> -> vector<4x16x16xf32>
    "tpu.trace_stop"() : () -> ()
    %cst_17 = arith.constant 0.353553385 : f32
    %63 = vector.broadcast %cst_17 : f32 to vector<4x16x16xf32>
    %64 = arith.mulf %62, %63 : vector<4x16x16xf32>
    %c0_18 = arith.constant 0 : index
    %c0_19 = arith.constant 0 : index
    %c0_20 = arith.constant 0 : index
    %65 = vector.load %arg8[%c0_18, %c0_19, %c0_20] : memref<2x16x16xf32, #tpu.memory_space<vmem>>, vector<1x16x16xf32>
    %66 = vector.shape_cast %65 : vector<1x16x16xf32> to vector<16x16xf32>
    %67 = vector.shape_cast %66 : vector<16x16xf32> to vector<1x16x16xf32>
    %68 = vector.broadcast %67 : vector<1x16x16xf32> to vector<4x16x16xf32>
    %69 = arith.addf %64, %68 : vector<4x16x16xf32>
    %c0_21 = arith.constant 0 : index
    %c0_22 = arith.constant 0 : index
    %c0_23 = arith.constant 0 : index
    %70 = vector.load %arg13[%c0_21, %c0_22, %c0_23] : memref<4x16x16xf32, #tpu.memory_space<vmem>>, vector<4x16x16xf32>
    %71 = arith.addf %69, %70 : vector<4x16x16xf32>
    %cst_24 = arith.constant dense<0xFF800000> : vector<4x16xf32>
    %72 = vector.multi_reduction <maximumf>, %71, %cst_24 [2] : vector<4x16x16xf32> to vector<4x16xf32>
    %73 = vector.shape_cast %72 : vector<4x16xf32> to vector<4x16x1xf32>
    %74 = vector.broadcast %73 : vector<4x16x1xf32> to vector<4x16x16xf32>
    %75 = arith.subf %71, %74 : vector<4x16x16xf32>
    %76 = math.exp %75 : vector<4x16x16xf32>
    %cst_25 = arith.constant dense<0.000000e+00> : vector<4x16xf32>
    %77 = vector.multi_reduction <add>, %76, %cst_25 [2] : vector<4x16x16xf32> to vector<4x16xf32>
    %78 = vector.shape_cast %77 : vector<4x16xf32> to vector<4x16x1xf32>
    %79 = tpu.reciprocal %78 {approx = true} : vector<4x16x1xf32> -> vector<4x16x1xf32>
    %80 = vector.broadcast %79 : vector<4x16x1xf32> to vector<4x16x16xf32>
    %81 = arith.mulf %76, %80 : vector<4x16x16xf32>
    %82 = arith.truncf %81 : vector<4x16x16xf32> to vector<4x16x16xbf16>
    "tpu.trace_start"() <{level = 10 : i32, message = "wnm,wmd->wnd"}> : () -> ()
    %cst_26 = arith.constant dense<0.000000e+00> : vector<4x16x8xf32>
    %83 = tpu.matmul %82, %61, %cst_26 {dimension_numbers = #tpu.dot_dimension_numbers<[2], [1], [1], [2], [0, 0, 0, 1, 1, 2], [0], [0]>} : vector<4x16x16xbf16>, vector<4x16x8xbf16>, vector<4x16x8xf32> -> vector<4x16x8xf32>
    "tpu.trace_stop"() : () -> ()
    %84 = vector.shape_cast %83 : vector<4x16x8xf32> to vector<64x8xf32>
    %85 = arith.truncf %84 : vector<64x8xf32> to vector<64x8xbf16>
    %c0_27 = arith.constant 0 : index
    %c0_28 = arith.constant 0 : index
    %86 = vector.load %arg6[%c0_27, %c0_28] : memref<16x16xbf16, #tpu.memory_space<vmem>>, vector<8x16xbf16>
    %cst_29 = arith.constant dense<0.000000e+00> : vector<64x16xf32>
    %87 = tpu.matmul %85, %86, %cst_29 {dimension_numbers = #tpu.dot_dimension_numbers<[1], [0], [0], [1], [0, 0, 1, 1], [], []>} : vector<64x8xbf16>, vector<8x16xbf16>, vector<64x16xf32> -> vector<64x16xf32>
    %88 = vector.extract_strided_slice %52 {offsets = [0, 8], sizes = [64, 8], strides = [1, 1]} : vector<64x48xf32> to vector<64x8xf32>
    %89 = vector.shape_cast %88 : vector<64x8xf32> to vector<4x16x8xf32>
    %90 = arith.truncf %89 : vector<4x16x8xf32> to vector<4x16x8xbf16>
    %91 = vector.extract_strided_slice %52 {offsets = [0, 24], sizes = [64, 8], strides = [1, 1]} : vector<64x48xf32> to vector<64x8xf32>
    %92 = vector.shape_cast %91 : vector<64x8xf32> to vector<4x16x8xf32>
    %93 = arith.truncf %92 : vector<4x16x8xf32> to vector<4x16x8xbf16>
    %94 = vector.extract_strided_slice %52 {offsets = [0, 40], sizes = [64, 8], strides = [1, 1]} : vector<64x48xf32> to vector<64x8xf32>
    %95 = vector.shape_cast %94 : vector<64x8xf32> to vector<4x16x8xf32>
    %96 = arith.truncf %95 : vector<4x16x8xf32> to vector<4x16x8xbf16>
    "tpu.trace_start"() <{level = 10 : i32, message = "wnd,wmd->wnm"}> : () -> ()
    %cst_30 = arith.constant dense<0.000000e+00> : vector<4x16x16xf32>
    %97 = tpu.matmul %90, %93, %cst_30 {dimension_numbers = #tpu.dot_dimension_numbers<[2], [2], [1], [1], [0, 0, 0, 1, 1, 1], [0], [0]>} : vector<4x16x8xbf16>, vector<4x16x8xbf16>, vector<4x16x16xf32> -> vector<4x16x16xf32>
    "tpu.trace_stop"() : () -> ()
    %cst_31 = arith.constant 0.353553385 : f32
    %98 = vector.broadcast %cst_31 : f32 to vector<4x16x16xf32>
    %99 = arith.mulf %97, %98 : vector<4x16x16xf32>
    %c1 = arith.constant 1 : index
    %c0_32 = arith.constant 0 : index
    %c0_33 = arith.constant 0 : index
    %100 = vector.load %arg8[%c1, %c0_32, %c0_33] : memref<2x16x16xf32, #tpu.memory_space<vmem>>, vector<1x16x16xf32>
    %101 = vector.shape_cast %100 : vector<1x16x16xf32> to vector<16x16xf32>
    %102 = vector.shape_cast %101 : vector<16x16xf32> to vector<1x16x16xf32>
    %103 = vector.broadcast %102 : vector<1x16x16xf32> to vector<4x16x16xf32>
    %104 = arith.addf %99, %103 : vector<4x16x16xf32>
    %c0_34 = arith.constant 0 : index
    %c0_35 = arith.constant 0 : index
    %c0_36 = arith.constant 0 : index
    %105 = vector.load %arg13[%c0_34, %c0_35, %c0_36] : memref<4x16x16xf32, #tpu.memory_space<vmem>>, vector<4x16x16xf32>
    %106 = arith.addf %104, %105 : vector<4x16x16xf32>
    %cst_37 = arith.constant dense<0xFF800000> : vector<4x16xf32>
    %107 = vector.multi_reduction <maximumf>, %106, %cst_37 [2] : vector<4x16x16xf32> to vector<4x16xf32>
    %108 = vector.shape_cast %107 : vector<4x16xf32> to vector<4x16x1xf32>
    %109 = vector.broadcast %108 : vector<4x16x1xf32> to vector<4x16x16xf32>
    %110 = arith.subf %106, %109 : vector<4x16x16xf32>
    %111 = math.exp %110 : vector<4x16x16xf32>
    %cst_38 = arith.constant dense<0.000000e+00> : vector<4x16xf32>
    %112 = vector.multi_reduction <add>, %111, %cst_38 [2] : vector<4x16x16xf32> to vector<4x16xf32>
    %113 = vector.shape_cast %112 : vector<4x16xf32> to vector<4x16x1xf32>
    %114 = tpu.reciprocal %113 {approx = true} : vector<4x16x1xf32> -> vector<4x16x1xf32>
    %115 = vector.broadcast %114 : vector<4x16x1xf32> to vector<4x16x16xf32>
    %116 = arith.mulf %111, %115 : vector<4x16x16xf32>
    %117 = arith.truncf %116 : vector<4x16x16xf32> to vector<4x16x16xbf16>
    "tpu.trace_start"() <{level = 10 : i32, message = "wnm,wmd->wnd"}> : () -> ()
    %cst_39 = arith.constant dense<0.000000e+00> : vector<4x16x8xf32>
    %118 = tpu.matmul %117, %96, %cst_39 {dimension_numbers = #tpu.dot_dimension_numbers<[2], [1], [1], [2], [0, 0, 0, 1, 1, 2], [0], [0]>} : vector<4x16x16xbf16>, vector<4x16x8xbf16>, vector<4x16x8xf32> -> vector<4x16x8xf32>
    "tpu.trace_stop"() : () -> ()
    %119 = vector.shape_cast %118 : vector<4x16x8xf32> to vector<64x8xf32>
    %120 = arith.truncf %119 : vector<64x8xf32> to vector<64x8xbf16>
    %c8 = arith.constant 8 : index
    %c0_40 = arith.constant 0 : index
    %121 = vector.load %arg6[%c8, %c0_40] : memref<16x16xbf16, #tpu.memory_space<vmem>>, vector<8x16xbf16>
    %cst_41 = arith.constant dense<0.000000e+00> : vector<64x16xf32>
    %122 = tpu.matmul %120, %121, %cst_41 {dimension_numbers = #tpu.dot_dimension_numbers<[1], [0], [0], [1], [0, 0, 1, 1], [], []>} : vector<64x8xbf16>, vector<8x16xbf16>, vector<64x16xf32> -> vector<64x16xf32>
    %123 = arith.addf %87, %122 : vector<64x16xf32>
    %c0_42 = arith.constant 0 : index
    %c0_43 = arith.constant 0 : index
    %124 = vector.load %arg7[%c0_42, %c0_43] : memref<1x16xf32, #tpu.memory_space<vmem>>, vector<1x16xf32>
    %125 = vector.shape_cast %124 : vector<1x16xf32> to vector<16xf32>
    %126 = vector.shape_cast %125 : vector<16xf32> to vector<1x16xf32>
    %127 = vector.broadcast %126 : vector<1x16xf32> to vector<64x16xf32>
    %128 = arith.addf %123, %127 : vector<64x16xf32>
    %129 = vector.extract_strided_slice %128 {offsets = [0, 0], sizes = [16, 16], strides = [1, 1]} : vector<64x16xf32> to vector<16x16xf32>
    %130 = vector.shape_cast %129 : vector<16x16xf32> to vector<4x4x16xf32>
    %131 = vector.extract_strided_slice %128 {offsets = [16, 0], sizes = [16, 16], strides = [1, 1]} : vector<64x16xf32> to vector<16x16xf32>
    %132 = vector.shape_cast %131 : vector<16x16xf32> to vector<4x4x16xf32>
    %133 = tpu.concatenate %130, %132 in 1 : vector<4x4x16xf32>, vector<4x4x16xf32> -> vector<4x8x16xf32>
    %134 = vector.extract_strided_slice %128 {offsets = [32, 0], sizes = [16, 16], strides = [1, 1]} : vector<64x16xf32> to vector<16x16xf32>
    %135 = vector.shape_cast %134 : vector<16x16xf32> to vector<4x4x16xf32>
    %136 = vector.extract_strided_slice %128 {offsets = [48, 0], sizes = [16, 16], strides = [1, 1]} : vector<64x16xf32> to vector<16x16xf32>
    %137 = vector.shape_cast %136 : vector<16x16xf32> to vector<4x4x16xf32>
    %138 = tpu.concatenate %135, %137 in 1 : vector<4x4x16xf32>, vector<4x4x16xf32> -> vector<4x8x16xf32>
    %139 = tpu.concatenate %133, %138 in 0 : vector<4x8x16xf32>, vector<4x8x16xf32> -> vector<8x8x16xf32>
    %140 = vector.extract_strided_slice %139 {offsets = [6, 0, 0], sizes = [2, 8, 16], strides = [1, 1, 1]} : vector<8x8x16xf32> to vector<2x8x16xf32>
    %141 = vector.extract_strided_slice %139 {offsets = [0, 0, 0], sizes = [6, 8, 16], strides = [1, 1, 1]} : vector<8x8x16xf32> to vector<6x8x16xf32>
    %142 = tpu.concatenate %140, %141 in 0 : vector<2x8x16xf32>, vector<6x8x16xf32> -> vector<8x8x16xf32>
    %143 = vector.extract_strided_slice %142 {offsets = [0, 6, 0], sizes = [8, 2, 16], strides = [1, 1, 1]} : vector<8x8x16xf32> to vector<8x2x16xf32>
    %144 = vector.extract_strided_slice %142 {offsets = [0, 0, 0], sizes = [8, 6, 16], strides = [1, 1, 1]} : vector<8x8x16xf32> to vector<8x6x16xf32>
    %145 = tpu.concatenate %143, %144 in 1 : vector<8x2x16xf32>, vector<8x6x16xf32> -> vector<8x8x16xf32>
    %146 = arith.addf %1, %145 : vector<8x8x16xf32>
    %147 = vector.shape_cast %146 : vector<8x8x16xf32> to vector<64x16xf32>
    %c0_44 = arith.constant 0 : index
    %c0_45 = arith.constant 0 : index
    %148 = vector.load %arg9[%c0_44, %c0_45] : memref<1x16xf32, #tpu.memory_space<vmem>>, vector<1x16xf32>
    %149 = vector.shape_cast %148 : vector<1x16xf32> to vector<16xf32>
    %c0_46 = arith.constant 0 : index
    %c0_47 = arith.constant 0 : index
    %150 = vector.load %arg10[%c0_46, %c0_47] : memref<1x16xf32, #tpu.memory_space<vmem>>, vector<1x16xf32>
    %151 = vector.shape_cast %150 : vector<1x16xf32> to vector<16xf32>
    %cst_48 = arith.constant dense<0.000000e+00> : vector<64xf32>
    %152 = vector.multi_reduction <add>, %147, %cst_48 [1] : vector<64x16xf32> to vector<64xf32>
    %153 = vector.shape_cast %152 : vector<64xf32> to vector<64x1xf32>
    %cst_49 = arith.constant 1.600000e+01 : f32
    %154 = vector.broadcast %cst_49 : f32 to vector<64x1xf32>
    %155 = arith.divf %153, %154 : vector<64x1xf32>
    %156 = vector.broadcast %155 : vector<64x1xf32> to vector<64x16xf32>
    %157 = arith.subf %147, %156 : vector<64x16xf32>
    %158 = arith.mulf %157, %157 : vector<64x16xf32>
    %cst_50 = arith.constant dense<0.000000e+00> : vector<64xf32>
    %159 = vector.multi_reduction <add>, %158, %cst_50 [1] : vector<64x16xf32> to vector<64xf32>
    %160 = vector.shape_cast %159 : vector<64xf32> to vector<64x1xf32>
    %cst_51 = arith.constant 1.600000e+01 : f32
    %161 = vector.broadcast %cst_51 : f32 to vector<64x1xf32>
    %162 = arith.divf %160, %161 : vector<64x1xf32>
    %cst_52 = arith.constant 9.99999974E-6 : f32
    %163 = vector.broadcast %cst_52 : f32 to vector<64x1xf32>
    %164 = arith.addf %162, %163 : vector<64x1xf32>
    %165 = math.rsqrt %164 : vector<64x1xf32>
    %166 = vector.broadcast %165 : vector<64x1xf32> to vector<64x16xf32>
    %167 = arith.mulf %157, %166 : vector<64x16xf32>
    %168 = vector.shape_cast %149 : vector<16xf32> to vector<1x16xf32>
    %169 = vector.broadcast %168 : vector<1x16xf32> to vector<64x16xf32>
    %170 = arith.mulf %167, %169 : vector<64x16xf32>
    %171 = vector.shape_cast %151 : vector<16xf32> to vector<1x16xf32>
    %172 = vector.broadcast %171 : vector<1x16xf32> to vector<64x16xf32>
    %173 = arith.addf %170, %172 : vector<64x16xf32>
    %174 = vector.shape_cast %173 : vector<64x16xf32> to vector<8x8x16xf32>
    %cst_53 = arith.constant 0.000000e+00 : f32
    %175 = vector.broadcast %cst_53 : f32 to vector<8x1x16xf32>
    %176 = tpu.concatenate %175, %174, %175 in 1 : vector<8x1x16xf32>, vector<8x8x16xf32>, vector<8x1x16xf32> -> vector<8x10x16xf32>
    %c1_54 = arith.constant 1 : index
    %c0_55 = arith.constant 0 : index
    %c0_56 = arith.constant 0 : index
    %177 = vector.load %arg15[%c1_54, %c0_55, %c0_56] : memref<10x10x16xf32, #tpu.memory_space<vmem>>, vector<8x10x16xf32>
    tpu.vector_store %arg15[%c1_54, %c0_55, %c0_56], %176 {strides = array<i32>} : memref<10x10x16xf32, #tpu.memory_space<vmem>>, vector<8x10x16xf32>,
    %cst_57 = arith.constant 0.000000e+00 : f32
    %178 = vector.broadcast %cst_57 : f32 to vector<10x16xf32>
    %c0_58 = arith.constant 0 : index
    %c0_59 = arith.constant 0 : index
    %c0_60 = arith.constant 0 : index
    %179 = vector.load %arg15[%c0_58, %c0_59, %c0_60] : memref<10x10x16xf32, #tpu.memory_space<vmem>>, vector<1x10x16xf32>
    %180 = vector.shape_cast %179 : vector<1x10x16xf32> to vector<10x16xf32>
    %181 = vector.shape_cast %178 : vector<10x16xf32> to vector<1x10x16xf32>
    tpu.vector_store %arg15[%c0_58, %c0_59, %c0_60], %181 {strides = array<i32>} : memref<10x10x16xf32, #tpu.memory_space<vmem>>, vector<1x10x16xf32>,
    %cst_61 = arith.constant 0.000000e+00 : f32
    %182 = vector.broadcast %cst_61 : f32 to vector<10x16xf32>
    %c9 = arith.constant 9 : index
    %c0_62 = arith.constant 0 : index
    %c0_63 = arith.constant 0 : index
    %183 = vector.load %arg15[%c9, %c0_62, %c0_63] : memref<10x10x16xf32, #tpu.memory_space<vmem>>, vector<1x10x16xf32>
    %184 = vector.shape_cast %183 : vector<1x10x16xf32> to vector<10x16xf32>
    %185 = vector.shape_cast %182 : vector<10x16xf32> to vector<1x10x16xf32>
    tpu.vector_store %arg15[%c9, %c0_62, %c0_63], %185 {strides = array<i32>} : memref<10x10x16xf32, #tpu.memory_space<vmem>>, vector<1x10x16xf32>,
    %c0_64 = arith.constant 0 : index
    %c0_65 = arith.constant 0 : index
    %c0_66 = arith.constant 0 : index
    %186 = vector.load %arg15[%c0_64, %c0_65, %c0_66] : memref<10x10x16xf32, #tpu.memory_space<vmem>>, vector<8x8x16xf32>
    %c0_67 = arith.constant 0 : index
    %c1_68 = arith.constant 1 : index
    %c0_69 = arith.constant 0 : index
    %187 = vector.load %arg15[%c0_67, %c1_68, %c0_69] : memref<10x10x16xf32, #tpu.memory_space<vmem>>, vector<8x8x16xf32>
    %c0_70 = arith.constant 0 : index
    %c2 = arith.constant 2 : index
    %c0_71 = arith.constant 0 : index
    %188 = vector.load %arg15[%c0_70, %c2, %c0_71] : memref<10x10x16xf32, #tpu.memory_space<vmem>>, vector<8x8x16xf32>
    %189 = tpu.concatenate %186, %187, %188 in 2 : vector<8x8x16xf32>, vector<8x8x16xf32>, vector<8x8x16xf32> -> vector<8x8x48xf32>
    %190 = vector.shape_cast %189 : vector<8x8x48xf32> to vector<64x48xf32>
    %191 = arith.truncf %190 : vector<64x48xf32> to vector<64x48xbf16>
    %c0_72 = arith.constant 0 : index
    %c0_73 = arith.constant 0 : index
    %c0_74 = arith.constant 0 : index
    %192 = vector.load %arg11[%c0_72, %c0_73, %c0_74] : memref<3x48x16xbf16, #tpu.memory_space<vmem>>, vector<1x48x16xbf16>
    %193 = vector.shape_cast %192 : vector<1x48x16xbf16> to vector<48x16xbf16>
    %cst_75 = arith.constant dense<0.000000e+00> : vector<64x16xf32>
    %194 = tpu.matmul %191, %193, %cst_75 {dimension_numbers = #tpu.dot_dimension_numbers<[1], [0], [0], [1], [0, 0, 1, 1], [], []>} : vector<64x48xbf16>, vector<48x16xbf16>, vector<64x16xf32> -> vector<64x16xf32>
    %c1_76 = arith.constant 1 : index
    %c0_77 = arith.constant 0 : index
    %c0_78 = arith.constant 0 : index
    %195 = vector.load %arg15[%c1_76, %c0_77, %c0_78] : memref<10x10x16xf32, #tpu.memory_space<vmem>>, vector<8x8x16xf32>
    %c1_79 = arith.constant 1 : index
    %c1_80 = arith.constant 1 : index
    %c0_81 = arith.constant 0 : index
    %196 = vector.load %arg15[%c1_79, %c1_80, %c0_81] : memref<10x10x16xf32, #tpu.memory_space<vmem>>, vector<8x8x16xf32>
    %c1_82 = arith.constant 1 : index
    %c2_83 = arith.constant 2 : index
    %c0_84 = arith.constant 0 : index
    %197 = vector.load %arg15[%c1_82, %c2_83, %c0_84] : memref<10x10x16xf32, #tpu.memory_space<vmem>>, vector<8x8x16xf32>
    %198 = tpu.concatenate %195, %196, %197 in 2 : vector<8x8x16xf32>, vector<8x8x16xf32>, vector<8x8x16xf32> -> vector<8x8x48xf32>
    %199 = vector.shape_cast %198 : vector<8x8x48xf32> to vector<64x48xf32>
    %200 = arith.truncf %199 : vector<64x48xf32> to vector<64x48xbf16>
    %c1_85 = arith.constant 1 : index
    %c0_86 = arith.constant 0 : index
    %c0_87 = arith.constant 0 : index
    %201 = vector.load %arg11[%c1_85, %c0_86, %c0_87] : memref<3x48x16xbf16, #tpu.memory_space<vmem>>, vector<1x48x16xbf16>
    %202 = vector.shape_cast %201 : vector<1x48x16xbf16> to vector<48x16xbf16>
    %cst_88 = arith.constant dense<0.000000e+00> : vector<64x16xf32>
    %203 = tpu.matmul %200, %202, %cst_88 {dimension_numbers = #tpu.dot_dimension_numbers<[1], [0], [0], [1], [0, 0, 1, 1], [], []>} : vector<64x48xbf16>, vector<48x16xbf16>, vector<64x16xf32> -> vector<64x16xf32>
    %204 = arith.addf %194, %203 : vector<64x16xf32>
    %c2_89 = arith.constant 2 : index
    %c0_90 = arith.constant 0 : index
    %c0_91 = arith.constant 0 : index
    %205 = vector.load %arg15[%c2_89, %c0_90, %c0_91] : memref<10x10x16xf32, #tpu.memory_space<vmem>>, vector<8x8x16xf32>
    %c2_92 = arith.constant 2 : index
    %c1_93 = arith.constant 1 : index
    %c0_94 = arith.constant 0 : index
    %206 = vector.load %arg15[%c2_92, %c1_93, %c0_94] : memref<10x10x16xf32, #tpu.memory_space<vmem>>, vector<8x8x16xf32>
    %c2_95 = arith.constant 2 : index
    %c2_96 = arith.constant 2 : index
    %c0_97 = arith.constant 0 : index
    %207 = vector.load %arg15[%c2_95, %c2_96, %c0_97] : memref<10x10x16xf32, #tpu.memory_space<vmem>>, vector<8x8x16xf32>
    %208 = tpu.concatenate %205, %206, %207 in 2 : vector<8x8x16xf32>, vector<8x8x16xf32>, vector<8x8x16xf32> -> vector<8x8x48xf32>
    %209 = vector.shape_cast %208 : vector<8x8x48xf32> to vector<64x48xf32>
    %210 = arith.truncf %209 : vector<64x48xf32> to vector<64x48xbf16>
    %c2_98 = arith.constant 2 : index
    %c0_99 = arith.constant 0 : index
    %c0_100 = arith.constant 0 : index
    %211 = vector.load %arg11[%c2_98, %c0_99, %c0_100] : memref<3x48x16xbf16, #tpu.memory_space<vmem>>, vector<1x48x16xbf16>
    %212 = vector.shape_cast %211 : vector<1x48x16xbf16> to vector<48x16xbf16>
    %cst_101 = arith.constant dense<0.000000e+00> : vector<64x16xf32>
    %213 = tpu.matmul %210, %212, %cst_101 {dimension_numbers = #tpu.dot_dimension_numbers<[1], [0], [0], [1], [0, 0, 1, 1], [], []>} : vector<64x48xbf16>, vector<48x16xbf16>, vector<64x16xf32> -> vector<64x16xf32>
    %214 = arith.addf %204, %213 : vector<64x16xf32>
    %c0_102 = arith.constant 0 : index
    %c0_103 = arith.constant 0 : index
    %215 = vector.load %arg12[%c0_102, %c0_103] : memref<1x16xf32, #tpu.memory_space<vmem>>, vector<1x16xf32>
    %216 = vector.shape_cast %215 : vector<1x16xf32> to vector<16xf32>
    %217 = vector.shape_cast %216 : vector<16xf32> to vector<1x16xf32>
    %218 = vector.broadcast %217 : vector<1x16xf32> to vector<64x16xf32>
    %219 = arith.addf %214, %218 : vector<64x16xf32>
    %220 = vector.shape_cast %219 : vector<64x16xf32> to vector<8x8x16xf32>
    %221 = arith.addf %146, %220 : vector<8x8x16xf32>
    %c0_104 = arith.constant 0 : index
    %c0_105 = arith.constant 0 : index
    %c0_106 = arith.constant 0 : index
    %c0_107 = arith.constant 0 : index
    %222 = vector.load %arg14[%c0_104, %c0_105, %c0_106, %c0_107] : memref<1x8x8x16xf32, #tpu.memory_space<vmem>>, vector<1x8x8x16xf32>
    %223 = vector.shape_cast %222 : vector<1x8x8x16xf32> to vector<8x8x16xf32>
    %224 = vector.shape_cast %221 : vector<8x8x16xf32> to vector<1x8x8x16xf32>
    tpu.vector_store %arg14[%c0_104, %c0_105, %c0_106, %c0_107], %224 {strides = array<i32>} : memref<1x8x8x16xf32, #tpu.memory_space<vmem>>, vector<1x8x8x16xf32>,
    return
  }
  func.func @transform_0(%arg0: i32) -> (i32, i32, i32, i32) {
    %c0_i32 = arith.constant 0 : i32
    %c0_i32_0 = arith.constant 0 : i32
    %c0_i32_1 = arith.constant 0 : i32
    %c0_i32_2 = arith.constant 0 : i32
    return %arg0, %c0_i32, %c0_i32_0, %c0_i32_1 : i32, i32, i32, i32
  }
  func.func @transform_1(%arg0: i32) -> (i32, i32) {
    %c0_i32 = arith.constant 0 : i32
    %c0_i32_0 = arith.constant 0 : i32
    %c0_i32_1 = arith.constant 0 : i32
    return %c0_i32, %c0_i32_0 : i32, i32
  }
  func.func @transform_2(%arg0: i32) -> (i32, i32) {
    %c0_i32 = arith.constant 0 : i32
    %c0_i32_0 = arith.constant 0 : i32
    %c0_i32_1 = arith.constant 0 : i32
    return %c0_i32, %c0_i32_0 : i32, i32
  }
  func.func @transform_3(%arg0: i32) -> (i32, i32) {
    %c0_i32 = arith.constant 0 : i32
    %c0_i32_0 = arith.constant 0 : i32
    %c0_i32_1 = arith.constant 0 : i32
    return %c0_i32, %c0_i32_0 : i32, i32
  }
  func.func @transform_4(%arg0: i32) -> (i32, i32) {
    %c0_i32 = arith.constant 0 : i32
    %c0_i32_0 = arith.constant 0 : i32
    %c0_i32_1 = arith.constant 0 : i32
    return %c0_i32, %c0_i32_0 : i32, i32
  }
  func.func @transform_5(%arg0: i32) -> (i32, i32) {
    %c0_i32 = arith.constant 0 : i32
    %c0_i32_0 = arith.constant 0 : i32
    %c0_i32_1 = arith.constant 0 : i32
    return %c0_i32, %c0_i32_0 : i32, i32
  }
  func.func @transform_6(%arg0: i32) -> (i32, i32) {
    %c0_i32 = arith.constant 0 : i32
    %c0_i32_0 = arith.constant 0 : i32
    %c0_i32_1 = arith.constant 0 : i32
    return %c0_i32, %c0_i32_0 : i32, i32
  }
  func.func @transform_7(%arg0: i32) -> (i32, i32, i32) {
    %c0_i32 = arith.constant 0 : i32
    %c0_i32_0 = arith.constant 0 : i32
    %c0_i32_1 = arith.constant 0 : i32
    %c0_i32_2 = arith.constant 0 : i32
    return %c0_i32, %c0_i32_0, %c0_i32_1 : i32, i32, i32
  }
  func.func @transform_8(%arg0: i32) -> (i32, i32) {
    %c0_i32 = arith.constant 0 : i32
    %c0_i32_0 = arith.constant 0 : i32
    %c0_i32_1 = arith.constant 0 : i32
    return %c0_i32, %c0_i32_0 : i32, i32
  }
  func.func @transform_9(%arg0: i32) -> (i32, i32) {
    %c0_i32 = arith.constant 0 : i32
    %c0_i32_0 = arith.constant 0 : i32
    %c0_i32_1 = arith.constant 0 : i32
    return %c0_i32, %c0_i32_0 : i32, i32
  }
  func.func @transform_10(%arg0: i32) -> (i32, i32, i32) {
    %c0_i32 = arith.constant 0 : i32
    %c0_i32_0 = arith.constant 0 : i32
    %c0_i32_1 = arith.constant 0 : i32
    %c0_i32_2 = arith.constant 0 : i32
    return %c0_i32, %c0_i32_0, %c0_i32_1 : i32, i32, i32
  }
  func.func @transform_11(%arg0: i32) -> (i32, i32) {
    %c0_i32 = arith.constant 0 : i32
    %c0_i32_0 = arith.constant 0 : i32
    %c0_i32_1 = arith.constant 0 : i32
    return %c0_i32, %c0_i32_0 : i32, i32
  }
  func.func @transform_12(%arg0: i32) -> (i32, i32, i32) {
    %c0_i32 = arith.constant 0 : i32
    %c0_i32_0 = arith.constant 0 : i32
    %c0_i32_1 = arith.constant 0 : i32
    %c0_i32_2 = arith.constant 0 : i32
    return %c0_i32, %c0_i32_0, %c0_i32_1 : i32, i32, i32
  }
  func.func @transform_13(%arg0: i32) -> (i32, i32, i32, i32) {
    %c0_i32 = arith.constant 0 : i32
    %c0_i32_0 = arith.constant 0 : i32
    %c0_i32_1 = arith.constant 0 : i32
    %c0_i32_2 = arith.constant 0 : i32
    return %arg0, %c0_i32, %c0_i32_0, %c0_i32_1 : i32, i32, i32, i32
  }
}

module attributes {stable_mosaic.version = 11 : i64} {
  func.func @_swin_block_kernel(%arg0: i32, %arg1: memref<1x8x8x16xf32, #tpu.memory_space<vmem>>, %arg2: memref<1x16xf32, #tpu.memory_space<vmem>>, %arg3: memref<1x16xf32, #tpu.memory_space<vmem>>, %arg4: memref<16x48xbf16, #tpu.memory_space<vmem>>, %arg5: memref<1x48xf32, #tpu.memory_space<vmem>>, %arg6: memref<16x16xbf16, #tpu.memory_space<vmem>>, %arg7: memref<1x16xf32, #tpu.memory_space<vmem>>, %arg8: memref<2x16x16xf32, #tpu.memory_space<vmem>>, %arg9: memref<1x16xf32, #tpu.memory_space<vmem>>, %arg10: memref<1x16xf32, #tpu.memory_space<vmem>>, %arg11: memref<3x48x16xbf16, #tpu.memory_space<vmem>>, %arg12: memref<1x16xf32, #tpu.memory_space<vmem>>, %arg13: memref<1x8x8x16xf32, #tpu.memory_space<vmem>>, %arg14: memref<10x10x16xf32, #tpu.memory_space<vmem>>) attributes {dimension_semantics = [#tpu.dimension_semantics<parallel>], iteration_bounds = array<i64: 2>, scalar_prefetch = 0 : i64, scratch_operands = 1 : i64, tpu.core_type = #tpu.core_type<tc>, window_params = [{transform_indices = @transform_0, window_bounds = array<i64: 1, 8, 8, 16>}, {pipeline_mode = #tpu.pipeline_mode<synchronous>, transform_indices = @transform_1, window_bounds = array<i64: 1, 16>}, {pipeline_mode = #tpu.pipeline_mode<synchronous>, transform_indices = @transform_2, window_bounds = array<i64: 1, 16>}, {pipeline_mode = #tpu.pipeline_mode<synchronous>, transform_indices = @transform_3, window_bounds = array<i64: 16, 48>}, {pipeline_mode = #tpu.pipeline_mode<synchronous>, transform_indices = @transform_4, window_bounds = array<i64: 1, 48>}, {pipeline_mode = #tpu.pipeline_mode<synchronous>, transform_indices = @transform_5, window_bounds = array<i64: 16, 16>}, {pipeline_mode = #tpu.pipeline_mode<synchronous>, transform_indices = @transform_6, window_bounds = array<i64: 1, 16>}, {pipeline_mode = #tpu.pipeline_mode<synchronous>, transform_indices = @transform_7, window_bounds = array<i64: 2, 16, 16>}, {pipeline_mode = #tpu.pipeline_mode<synchronous>, transform_indices = @transform_8, window_bounds = array<i64: 1, 16>}, {pipeline_mode = #tpu.pipeline_mode<synchronous>, transform_indices = @transform_9, window_bounds = array<i64: 1, 16>}, {pipeline_mode = #tpu.pipeline_mode<synchronous>, transform_indices = @transform_10, window_bounds = array<i64: 3, 48, 16>}, {pipeline_mode = #tpu.pipeline_mode<synchronous>, transform_indices = @transform_11, window_bounds = array<i64: 1, 16>}, {transform_indices = @transform_12, window_bounds = array<i64: 1, 8, 8, 16>}]} {
    %c0 = arith.constant 0 : index
    %c0_0 = arith.constant 0 : index
    %c0_1 = arith.constant 0 : index
    %c0_2 = arith.constant 0 : index
    %0 = vector.load %arg1[%c0, %c0_0, %c0_1, %c0_2] : memref<1x8x8x16xf32, #tpu.memory_space<vmem>>, vector<1x8x8x16xf32>
    %1 = vector.shape_cast %0 : vector<1x8x8x16xf32> to vector<8x8x16xf32>
    %2 = vector.shape_cast %1 : vector<8x8x16xf32> to vector<64x16xf32>
    %c0_3 = arith.constant 0 : index
    %c0_4 = arith.constant 0 : index
    %3 = vector.load %arg2[%c0_3, %c0_4] : memref<1x16xf32, #tpu.memory_space<vmem>>, vector<1x16xf32>
    %4 = vector.shape_cast %3 : vector<1x16xf32> to vector<16xf32>
    %c0_5 = arith.constant 0 : index
    %c0_6 = arith.constant 0 : index
    %5 = vector.load %arg3[%c0_5, %c0_6] : memref<1x16xf32, #tpu.memory_space<vmem>>, vector<1x16xf32>
    %6 = vector.shape_cast %5 : vector<1x16xf32> to vector<16xf32>
    %cst = arith.constant dense<0.000000e+00> : vector<64xf32>
    %7 = vector.multi_reduction <add>, %2, %cst [1] : vector<64x16xf32> to vector<64xf32>
    %8 = vector.shape_cast %7 : vector<64xf32> to vector<64x1xf32>
    %cst_7 = arith.constant 1.600000e+01 : f32
    %9 = vector.broadcast %cst_7 : f32 to vector<64x1xf32>
    %10 = arith.divf %8, %9 : vector<64x1xf32>
    %11 = vector.broadcast %10 : vector<64x1xf32> to vector<64x16xf32>
    %12 = arith.subf %2, %11 : vector<64x16xf32>
    %13 = arith.mulf %12, %12 : vector<64x16xf32>
    %cst_8 = arith.constant dense<0.000000e+00> : vector<64xf32>
    %14 = vector.multi_reduction <add>, %13, %cst_8 [1] : vector<64x16xf32> to vector<64xf32>
    %15 = vector.shape_cast %14 : vector<64xf32> to vector<64x1xf32>
    %cst_9 = arith.constant 1.600000e+01 : f32
    %16 = vector.broadcast %cst_9 : f32 to vector<64x1xf32>
    %17 = arith.divf %15, %16 : vector<64x1xf32>
    %cst_10 = arith.constant 9.99999974E-6 : f32
    %18 = vector.broadcast %cst_10 : f32 to vector<64x1xf32>
    %19 = arith.addf %17, %18 : vector<64x1xf32>
    %20 = math.rsqrt %19 : vector<64x1xf32>
    %21 = vector.broadcast %20 : vector<64x1xf32> to vector<64x16xf32>
    %22 = arith.mulf %12, %21 : vector<64x16xf32>
    %23 = vector.shape_cast %4 : vector<16xf32> to vector<1x16xf32>
    %24 = vector.broadcast %23 : vector<1x16xf32> to vector<64x16xf32>
    %25 = arith.mulf %22, %24 : vector<64x16xf32>
    %26 = vector.shape_cast %6 : vector<16xf32> to vector<1x16xf32>
    %27 = vector.broadcast %26 : vector<1x16xf32> to vector<64x16xf32>
    %28 = arith.addf %25, %27 : vector<64x16xf32>
    %29 = vector.shape_cast %28 : vector<64x16xf32> to vector<8x8x16xf32>
    %30 = vector.extract_strided_slice %29 {offsets = [0, 0, 0], sizes = [4, 4, 16], strides = [1, 1, 1]} : vector<8x8x16xf32> to vector<4x4x16xf32>
    %31 = vector.shape_cast %30 : vector<4x4x16xf32> to vector<16x16xf32>
    %32 = vector.extract_strided_slice %29 {offsets = [0, 4, 0], sizes = [4, 4, 16], strides = [1, 1, 1]} : vector<8x8x16xf32> to vector<4x4x16xf32>
    %33 = vector.shape_cast %32 : vector<4x4x16xf32> to vector<16x16xf32>
    %34 = vector.extract_strided_slice %29 {offsets = [4, 0, 0], sizes = [4, 4, 16], strides = [1, 1, 1]} : vector<8x8x16xf32> to vector<4x4x16xf32>
    %35 = vector.shape_cast %34 : vector<4x4x16xf32> to vector<16x16xf32>
    %36 = vector.extract_strided_slice %29 {offsets = [4, 4, 0], sizes = [4, 4, 16], strides = [1, 1, 1]} : vector<8x8x16xf32> to vector<4x4x16xf32>
    %37 = vector.shape_cast %36 : vector<4x4x16xf32> to vector<16x16xf32>
    %38 = tpu.concatenate %31, %33, %35, %37 in 0 : vector<16x16xf32>, vector<16x16xf32>, vector<16x16xf32>, vector<16x16xf32> -> vector<64x16xf32>
    %39 = arith.truncf %38 : vector<64x16xf32> to vector<64x16xbf16>
    %c0_11 = arith.constant 0 : index
    %c0_12 = arith.constant 0 : index
    %40 = vector.load %arg4[%c0_11, %c0_12] : memref<16x48xbf16, #tpu.memory_space<vmem>>, vector<16x48xbf16>
    %cst_13 = arith.constant dense<0.000000e+00> : vector<64x48xf32>
    %41 = tpu.matmul %39, %40, %cst_13 {dimension_numbers = #tpu.dot_dimension_numbers<[1], [0], [0], [1], [0, 0, 1, 1], [], []>} : vector<64x16xbf16>, vector<16x48xbf16>, vector<64x48xf32> -> vector<64x48xf32>
    %c0_14 = arith.constant 0 : index
    %c0_15 = arith.constant 0 : index
    %42 = vector.load %arg5[%c0_14, %c0_15] : memref<1x48xf32, #tpu.memory_space<vmem>>, vector<1x48xf32>
    %43 = vector.shape_cast %42 : vector<1x48xf32> to vector<48xf32>
    %44 = vector.shape_cast %43 : vector<48xf32> to vector<1x48xf32>
    %45 = vector.broadcast %44 : vector<1x48xf32> to vector<64x48xf32>
    %46 = arith.addf %41, %45 : vector<64x48xf32>
    %47 = vector.extract_strided_slice %46 {offsets = [0, 0], sizes = [64, 8], strides = [1, 1]} : vector<64x48xf32> to vector<64x8xf32>
    %48 = vector.shape_cast %47 : vector<64x8xf32> to vector<4x16x8xf32>
    %49 = arith.truncf %48 : vector<4x16x8xf32> to vector<4x16x8xbf16>
    %50 = vector.extract_strided_slice %46 {offsets = [0, 16], sizes = [64, 8], strides = [1, 1]} : vector<64x48xf32> to vector<64x8xf32>
    %51 = vector.shape_cast %50 : vector<64x8xf32> to vector<4x16x8xf32>
    %52 = arith.truncf %51 : vector<4x16x8xf32> to vector<4x16x8xbf16>
    %53 = vector.extract_strided_slice %46 {offsets = [0, 32], sizes = [64, 8], strides = [1, 1]} : vector<64x48xf32> to vector<64x8xf32>
    %54 = vector.shape_cast %53 : vector<64x8xf32> to vector<4x16x8xf32>
    %55 = arith.truncf %54 : vector<4x16x8xf32> to vector<4x16x8xbf16>
    "tpu.trace_start"() <{level = 10 : i32, message = "wnd,wmd->wnm"}> : () -> ()
    %cst_16 = arith.constant dense<0.000000e+00> : vector<4x16x16xf32>
    %56 = tpu.matmul %49, %52, %cst_16 {dimension_numbers = #tpu.dot_dimension_numbers<[2], [2], [1], [1], [0, 0, 0, 1, 1, 1], [0], [0]>} : vector<4x16x8xbf16>, vector<4x16x8xbf16>, vector<4x16x16xf32> -> vector<4x16x16xf32>
    "tpu.trace_stop"() : () -> ()
    %cst_17 = arith.constant 0.353553385 : f32
    %57 = vector.broadcast %cst_17 : f32 to vector<4x16x16xf32>
    %58 = arith.mulf %56, %57 : vector<4x16x16xf32>
    %c0_18 = arith.constant 0 : index
    %c0_19 = arith.constant 0 : index
    %c0_20 = arith.constant 0 : index
    %59 = vector.load %arg8[%c0_18, %c0_19, %c0_20] : memref<2x16x16xf32, #tpu.memory_space<vmem>>, vector<1x16x16xf32>
    %60 = vector.shape_cast %59 : vector<1x16x16xf32> to vector<16x16xf32>
    %61 = vector.shape_cast %60 : vector<16x16xf32> to vector<1x16x16xf32>
    %62 = vector.broadcast %61 : vector<1x16x16xf32> to vector<4x16x16xf32>
    %63 = arith.addf %58, %62 : vector<4x16x16xf32>
    %cst_21 = arith.constant dense<0xFF800000> : vector<4x16xf32>
    %64 = vector.multi_reduction <maximumf>, %63, %cst_21 [2] : vector<4x16x16xf32> to vector<4x16xf32>
    %65 = vector.shape_cast %64 : vector<4x16xf32> to vector<4x16x1xf32>
    %66 = vector.broadcast %65 : vector<4x16x1xf32> to vector<4x16x16xf32>
    %67 = arith.subf %63, %66 : vector<4x16x16xf32>
    %68 = math.exp %67 : vector<4x16x16xf32>
    %cst_22 = arith.constant dense<0.000000e+00> : vector<4x16xf32>
    %69 = vector.multi_reduction <add>, %68, %cst_22 [2] : vector<4x16x16xf32> to vector<4x16xf32>
    %70 = vector.shape_cast %69 : vector<4x16xf32> to vector<4x16x1xf32>
    %71 = tpu.reciprocal %70 {approx = true} : vector<4x16x1xf32> -> vector<4x16x1xf32>
    %72 = vector.broadcast %71 : vector<4x16x1xf32> to vector<4x16x16xf32>
    %73 = arith.mulf %68, %72 : vector<4x16x16xf32>
    %74 = arith.truncf %73 : vector<4x16x16xf32> to vector<4x16x16xbf16>
    "tpu.trace_start"() <{level = 10 : i32, message = "wnm,wmd->wnd"}> : () -> ()
    %cst_23 = arith.constant dense<0.000000e+00> : vector<4x16x8xf32>
    %75 = tpu.matmul %74, %55, %cst_23 {dimension_numbers = #tpu.dot_dimension_numbers<[2], [1], [1], [2], [0, 0, 0, 1, 1, 2], [0], [0]>} : vector<4x16x16xbf16>, vector<4x16x8xbf16>, vector<4x16x8xf32> -> vector<4x16x8xf32>
    "tpu.trace_stop"() : () -> ()
    %76 = vector.shape_cast %75 : vector<4x16x8xf32> to vector<64x8xf32>
    %77 = arith.truncf %76 : vector<64x8xf32> to vector<64x8xbf16>
    %c0_24 = arith.constant 0 : index
    %c0_25 = arith.constant 0 : index
    %78 = vector.load %arg6[%c0_24, %c0_25] : memref<16x16xbf16, #tpu.memory_space<vmem>>, vector<8x16xbf16>
    %cst_26 = arith.constant dense<0.000000e+00> : vector<64x16xf32>
    %79 = tpu.matmul %77, %78, %cst_26 {dimension_numbers = #tpu.dot_dimension_numbers<[1], [0], [0], [1], [0, 0, 1, 1], [], []>} : vector<64x8xbf16>, vector<8x16xbf16>, vector<64x16xf32> -> vector<64x16xf32>
    %80 = vector.extract_strided_slice %46 {offsets = [0, 8], sizes = [64, 8], strides = [1, 1]} : vector<64x48xf32> to vector<64x8xf32>
    %81 = vector.shape_cast %80 : vector<64x8xf32> to vector<4x16x8xf32>
    %82 = arith.truncf %81 : vector<4x16x8xf32> to vector<4x16x8xbf16>
    %83 = vector.extract_strided_slice %46 {offsets = [0, 24], sizes = [64, 8], strides = [1, 1]} : vector<64x48xf32> to vector<64x8xf32>
    %84 = vector.shape_cast %83 : vector<64x8xf32> to vector<4x16x8xf32>
    %85 = arith.truncf %84 : vector<4x16x8xf32> to vector<4x16x8xbf16>
    %86 = vector.extract_strided_slice %46 {offsets = [0, 40], sizes = [64, 8], strides = [1, 1]} : vector<64x48xf32> to vector<64x8xf32>
    %87 = vector.shape_cast %86 : vector<64x8xf32> to vector<4x16x8xf32>
    %88 = arith.truncf %87 : vector<4x16x8xf32> to vector<4x16x8xbf16>
    "tpu.trace_start"() <{level = 10 : i32, message = "wnd,wmd->wnm"}> : () -> ()
    %cst_27 = arith.constant dense<0.000000e+00> : vector<4x16x16xf32>
    %89 = tpu.matmul %82, %85, %cst_27 {dimension_numbers = #tpu.dot_dimension_numbers<[2], [2], [1], [1], [0, 0, 0, 1, 1, 1], [0], [0]>} : vector<4x16x8xbf16>, vector<4x16x8xbf16>, vector<4x16x16xf32> -> vector<4x16x16xf32>
    "tpu.trace_stop"() : () -> ()
    %cst_28 = arith.constant 0.353553385 : f32
    %90 = vector.broadcast %cst_28 : f32 to vector<4x16x16xf32>
    %91 = arith.mulf %89, %90 : vector<4x16x16xf32>
    %c1 = arith.constant 1 : index
    %c0_29 = arith.constant 0 : index
    %c0_30 = arith.constant 0 : index
    %92 = vector.load %arg8[%c1, %c0_29, %c0_30] : memref<2x16x16xf32, #tpu.memory_space<vmem>>, vector<1x16x16xf32>
    %93 = vector.shape_cast %92 : vector<1x16x16xf32> to vector<16x16xf32>
    %94 = vector.shape_cast %93 : vector<16x16xf32> to vector<1x16x16xf32>
    %95 = vector.broadcast %94 : vector<1x16x16xf32> to vector<4x16x16xf32>
    %96 = arith.addf %91, %95 : vector<4x16x16xf32>
    %cst_31 = arith.constant dense<0xFF800000> : vector<4x16xf32>
    %97 = vector.multi_reduction <maximumf>, %96, %cst_31 [2] : vector<4x16x16xf32> to vector<4x16xf32>
    %98 = vector.shape_cast %97 : vector<4x16xf32> to vector<4x16x1xf32>
    %99 = vector.broadcast %98 : vector<4x16x1xf32> to vector<4x16x16xf32>
    %100 = arith.subf %96, %99 : vector<4x16x16xf32>
    %101 = math.exp %100 : vector<4x16x16xf32>
    %cst_32 = arith.constant dense<0.000000e+00> : vector<4x16xf32>
    %102 = vector.multi_reduction <add>, %101, %cst_32 [2] : vector<4x16x16xf32> to vector<4x16xf32>
    %103 = vector.shape_cast %102 : vector<4x16xf32> to vector<4x16x1xf32>
    %104 = tpu.reciprocal %103 {approx = true} : vector<4x16x1xf32> -> vector<4x16x1xf32>
    %105 = vector.broadcast %104 : vector<4x16x1xf32> to vector<4x16x16xf32>
    %106 = arith.mulf %101, %105 : vector<4x16x16xf32>
    %107 = arith.truncf %106 : vector<4x16x16xf32> to vector<4x16x16xbf16>
    "tpu.trace_start"() <{level = 10 : i32, message = "wnm,wmd->wnd"}> : () -> ()
    %cst_33 = arith.constant dense<0.000000e+00> : vector<4x16x8xf32>
    %108 = tpu.matmul %107, %88, %cst_33 {dimension_numbers = #tpu.dot_dimension_numbers<[2], [1], [1], [2], [0, 0, 0, 1, 1, 2], [0], [0]>} : vector<4x16x16xbf16>, vector<4x16x8xbf16>, vector<4x16x8xf32> -> vector<4x16x8xf32>
    "tpu.trace_stop"() : () -> ()
    %109 = vector.shape_cast %108 : vector<4x16x8xf32> to vector<64x8xf32>
    %110 = arith.truncf %109 : vector<64x8xf32> to vector<64x8xbf16>
    %c8 = arith.constant 8 : index
    %c0_34 = arith.constant 0 : index
    %111 = vector.load %arg6[%c8, %c0_34] : memref<16x16xbf16, #tpu.memory_space<vmem>>, vector<8x16xbf16>
    %cst_35 = arith.constant dense<0.000000e+00> : vector<64x16xf32>
    %112 = tpu.matmul %110, %111, %cst_35 {dimension_numbers = #tpu.dot_dimension_numbers<[1], [0], [0], [1], [0, 0, 1, 1], [], []>} : vector<64x8xbf16>, vector<8x16xbf16>, vector<64x16xf32> -> vector<64x16xf32>
    %113 = arith.addf %79, %112 : vector<64x16xf32>
    %c0_36 = arith.constant 0 : index
    %c0_37 = arith.constant 0 : index
    %114 = vector.load %arg7[%c0_36, %c0_37] : memref<1x16xf32, #tpu.memory_space<vmem>>, vector<1x16xf32>
    %115 = vector.shape_cast %114 : vector<1x16xf32> to vector<16xf32>
    %116 = vector.shape_cast %115 : vector<16xf32> to vector<1x16xf32>
    %117 = vector.broadcast %116 : vector<1x16xf32> to vector<64x16xf32>
    %118 = arith.addf %113, %117 : vector<64x16xf32>
    %119 = vector.extract_strided_slice %118 {offsets = [0, 0], sizes = [16, 16], strides = [1, 1]} : vector<64x16xf32> to vector<16x16xf32>
    %120 = vector.shape_cast %119 : vector<16x16xf32> to vector<4x4x16xf32>
    %121 = vector.extract_strided_slice %118 {offsets = [16, 0], sizes = [16, 16], strides = [1, 1]} : vector<64x16xf32> to vector<16x16xf32>
    %122 = vector.shape_cast %121 : vector<16x16xf32> to vector<4x4x16xf32>
    %123 = tpu.concatenate %120, %122 in 1 : vector<4x4x16xf32>, vector<4x4x16xf32> -> vector<4x8x16xf32>
    %124 = vector.extract_strided_slice %118 {offsets = [32, 0], sizes = [16, 16], strides = [1, 1]} : vector<64x16xf32> to vector<16x16xf32>
    %125 = vector.shape_cast %124 : vector<16x16xf32> to vector<4x4x16xf32>
    %126 = vector.extract_strided_slice %118 {offsets = [48, 0], sizes = [16, 16], strides = [1, 1]} : vector<64x16xf32> to vector<16x16xf32>
    %127 = vector.shape_cast %126 : vector<16x16xf32> to vector<4x4x16xf32>
    %128 = tpu.concatenate %125, %127 in 1 : vector<4x4x16xf32>, vector<4x4x16xf32> -> vector<4x8x16xf32>
    %129 = tpu.concatenate %123, %128 in 0 : vector<4x8x16xf32>, vector<4x8x16xf32> -> vector<8x8x16xf32>
    %130 = arith.addf %1, %129 : vector<8x8x16xf32>
    %131 = vector.shape_cast %130 : vector<8x8x16xf32> to vector<64x16xf32>
    %c0_38 = arith.constant 0 : index
    %c0_39 = arith.constant 0 : index
    %132 = vector.load %arg9[%c0_38, %c0_39] : memref<1x16xf32, #tpu.memory_space<vmem>>, vector<1x16xf32>
    %133 = vector.shape_cast %132 : vector<1x16xf32> to vector<16xf32>
    %c0_40 = arith.constant 0 : index
    %c0_41 = arith.constant 0 : index
    %134 = vector.load %arg10[%c0_40, %c0_41] : memref<1x16xf32, #tpu.memory_space<vmem>>, vector<1x16xf32>
    %135 = vector.shape_cast %134 : vector<1x16xf32> to vector<16xf32>
    %cst_42 = arith.constant dense<0.000000e+00> : vector<64xf32>
    %136 = vector.multi_reduction <add>, %131, %cst_42 [1] : vector<64x16xf32> to vector<64xf32>
    %137 = vector.shape_cast %136 : vector<64xf32> to vector<64x1xf32>
    %cst_43 = arith.constant 1.600000e+01 : f32
    %138 = vector.broadcast %cst_43 : f32 to vector<64x1xf32>
    %139 = arith.divf %137, %138 : vector<64x1xf32>
    %140 = vector.broadcast %139 : vector<64x1xf32> to vector<64x16xf32>
    %141 = arith.subf %131, %140 : vector<64x16xf32>
    %142 = arith.mulf %141, %141 : vector<64x16xf32>
    %cst_44 = arith.constant dense<0.000000e+00> : vector<64xf32>
    %143 = vector.multi_reduction <add>, %142, %cst_44 [1] : vector<64x16xf32> to vector<64xf32>
    %144 = vector.shape_cast %143 : vector<64xf32> to vector<64x1xf32>
    %cst_45 = arith.constant 1.600000e+01 : f32
    %145 = vector.broadcast %cst_45 : f32 to vector<64x1xf32>
    %146 = arith.divf %144, %145 : vector<64x1xf32>
    %cst_46 = arith.constant 9.99999974E-6 : f32
    %147 = vector.broadcast %cst_46 : f32 to vector<64x1xf32>
    %148 = arith.addf %146, %147 : vector<64x1xf32>
    %149 = math.rsqrt %148 : vector<64x1xf32>
    %150 = vector.broadcast %149 : vector<64x1xf32> to vector<64x16xf32>
    %151 = arith.mulf %141, %150 : vector<64x16xf32>
    %152 = vector.shape_cast %133 : vector<16xf32> to vector<1x16xf32>
    %153 = vector.broadcast %152 : vector<1x16xf32> to vector<64x16xf32>
    %154 = arith.mulf %151, %153 : vector<64x16xf32>
    %155 = vector.shape_cast %135 : vector<16xf32> to vector<1x16xf32>
    %156 = vector.broadcast %155 : vector<1x16xf32> to vector<64x16xf32>
    %157 = arith.addf %154, %156 : vector<64x16xf32>
    %158 = vector.shape_cast %157 : vector<64x16xf32> to vector<8x8x16xf32>
    %cst_47 = arith.constant 0.000000e+00 : f32
    %159 = vector.broadcast %cst_47 : f32 to vector<8x1x16xf32>
    %160 = tpu.concatenate %159, %158, %159 in 1 : vector<8x1x16xf32>, vector<8x8x16xf32>, vector<8x1x16xf32> -> vector<8x10x16xf32>
    %c1_48 = arith.constant 1 : index
    %c0_49 = arith.constant 0 : index
    %c0_50 = arith.constant 0 : index
    %161 = vector.load %arg14[%c1_48, %c0_49, %c0_50] : memref<10x10x16xf32, #tpu.memory_space<vmem>>, vector<8x10x16xf32>
    tpu.vector_store %arg14[%c1_48, %c0_49, %c0_50], %160 {strides = array<i32>} : memref<10x10x16xf32, #tpu.memory_space<vmem>>, vector<8x10x16xf32>,
    %cst_51 = arith.constant 0.000000e+00 : f32
    %162 = vector.broadcast %cst_51 : f32 to vector<10x16xf32>
    %c0_52 = arith.constant 0 : index
    %c0_53 = arith.constant 0 : index
    %c0_54 = arith.constant 0 : index
    %163 = vector.load %arg14[%c0_52, %c0_53, %c0_54] : memref<10x10x16xf32, #tpu.memory_space<vmem>>, vector<1x10x16xf32>
    %164 = vector.shape_cast %163 : vector<1x10x16xf32> to vector<10x16xf32>
    %165 = vector.shape_cast %162 : vector<10x16xf32> to vector<1x10x16xf32>
    tpu.vector_store %arg14[%c0_52, %c0_53, %c0_54], %165 {strides = array<i32>} : memref<10x10x16xf32, #tpu.memory_space<vmem>>, vector<1x10x16xf32>,
    %cst_55 = arith.constant 0.000000e+00 : f32
    %166 = vector.broadcast %cst_55 : f32 to vector<10x16xf32>
    %c9 = arith.constant 9 : index
    %c0_56 = arith.constant 0 : index
    %c0_57 = arith.constant 0 : index
    %167 = vector.load %arg14[%c9, %c0_56, %c0_57] : memref<10x10x16xf32, #tpu.memory_space<vmem>>, vector<1x10x16xf32>
    %168 = vector.shape_cast %167 : vector<1x10x16xf32> to vector<10x16xf32>
    %169 = vector.shape_cast %166 : vector<10x16xf32> to vector<1x10x16xf32>
    tpu.vector_store %arg14[%c9, %c0_56, %c0_57], %169 {strides = array<i32>} : memref<10x10x16xf32, #tpu.memory_space<vmem>>, vector<1x10x16xf32>,
    %c0_58 = arith.constant 0 : index
    %c0_59 = arith.constant 0 : index
    %c0_60 = arith.constant 0 : index
    %170 = vector.load %arg14[%c0_58, %c0_59, %c0_60] : memref<10x10x16xf32, #tpu.memory_space<vmem>>, vector<8x8x16xf32>
    %c0_61 = arith.constant 0 : index
    %c1_62 = arith.constant 1 : index
    %c0_63 = arith.constant 0 : index
    %171 = vector.load %arg14[%c0_61, %c1_62, %c0_63] : memref<10x10x16xf32, #tpu.memory_space<vmem>>, vector<8x8x16xf32>
    %c0_64 = arith.constant 0 : index
    %c2 = arith.constant 2 : index
    %c0_65 = arith.constant 0 : index
    %172 = vector.load %arg14[%c0_64, %c2, %c0_65] : memref<10x10x16xf32, #tpu.memory_space<vmem>>, vector<8x8x16xf32>
    %173 = tpu.concatenate %170, %171, %172 in 2 : vector<8x8x16xf32>, vector<8x8x16xf32>, vector<8x8x16xf32> -> vector<8x8x48xf32>
    %174 = vector.shape_cast %173 : vector<8x8x48xf32> to vector<64x48xf32>
    %175 = arith.truncf %174 : vector<64x48xf32> to vector<64x48xbf16>
    %c0_66 = arith.constant 0 : index
    %c0_67 = arith.constant 0 : index
    %c0_68 = arith.constant 0 : index
    %176 = vector.load %arg11[%c0_66, %c0_67, %c0_68] : memref<3x48x16xbf16, #tpu.memory_space<vmem>>, vector<1x48x16xbf16>
    %177 = vector.shape_cast %176 : vector<1x48x16xbf16> to vector<48x16xbf16>
    %cst_69 = arith.constant dense<0.000000e+00> : vector<64x16xf32>
    %178 = tpu.matmul %175, %177, %cst_69 {dimension_numbers = #tpu.dot_dimension_numbers<[1], [0], [0], [1], [0, 0, 1, 1], [], []>} : vector<64x48xbf16>, vector<48x16xbf16>, vector<64x16xf32> -> vector<64x16xf32>
    %c1_70 = arith.constant 1 : index
    %c0_71 = arith.constant 0 : index
    %c0_72 = arith.constant 0 : index
    %179 = vector.load %arg14[%c1_70, %c0_71, %c0_72] : memref<10x10x16xf32, #tpu.memory_space<vmem>>, vector<8x8x16xf32>
    %c1_73 = arith.constant 1 : index
    %c1_74 = arith.constant 1 : index
    %c0_75 = arith.constant 0 : index
    %180 = vector.load %arg14[%c1_73, %c1_74, %c0_75] : memref<10x10x16xf32, #tpu.memory_space<vmem>>, vector<8x8x16xf32>
    %c1_76 = arith.constant 1 : index
    %c2_77 = arith.constant 2 : index
    %c0_78 = arith.constant 0 : index
    %181 = vector.load %arg14[%c1_76, %c2_77, %c0_78] : memref<10x10x16xf32, #tpu.memory_space<vmem>>, vector<8x8x16xf32>
    %182 = tpu.concatenate %179, %180, %181 in 2 : vector<8x8x16xf32>, vector<8x8x16xf32>, vector<8x8x16xf32> -> vector<8x8x48xf32>
    %183 = vector.shape_cast %182 : vector<8x8x48xf32> to vector<64x48xf32>
    %184 = arith.truncf %183 : vector<64x48xf32> to vector<64x48xbf16>
    %c1_79 = arith.constant 1 : index
    %c0_80 = arith.constant 0 : index
    %c0_81 = arith.constant 0 : index
    %185 = vector.load %arg11[%c1_79, %c0_80, %c0_81] : memref<3x48x16xbf16, #tpu.memory_space<vmem>>, vector<1x48x16xbf16>
    %186 = vector.shape_cast %185 : vector<1x48x16xbf16> to vector<48x16xbf16>
    %cst_82 = arith.constant dense<0.000000e+00> : vector<64x16xf32>
    %187 = tpu.matmul %184, %186, %cst_82 {dimension_numbers = #tpu.dot_dimension_numbers<[1], [0], [0], [1], [0, 0, 1, 1], [], []>} : vector<64x48xbf16>, vector<48x16xbf16>, vector<64x16xf32> -> vector<64x16xf32>
    %188 = arith.addf %178, %187 : vector<64x16xf32>
    %c2_83 = arith.constant 2 : index
    %c0_84 = arith.constant 0 : index
    %c0_85 = arith.constant 0 : index
    %189 = vector.load %arg14[%c2_83, %c0_84, %c0_85] : memref<10x10x16xf32, #tpu.memory_space<vmem>>, vector<8x8x16xf32>
    %c2_86 = arith.constant 2 : index
    %c1_87 = arith.constant 1 : index
    %c0_88 = arith.constant 0 : index
    %190 = vector.load %arg14[%c2_86, %c1_87, %c0_88] : memref<10x10x16xf32, #tpu.memory_space<vmem>>, vector<8x8x16xf32>
    %c2_89 = arith.constant 2 : index
    %c2_90 = arith.constant 2 : index
    %c0_91 = arith.constant 0 : index
    %191 = vector.load %arg14[%c2_89, %c2_90, %c0_91] : memref<10x10x16xf32, #tpu.memory_space<vmem>>, vector<8x8x16xf32>
    %192 = tpu.concatenate %189, %190, %191 in 2 : vector<8x8x16xf32>, vector<8x8x16xf32>, vector<8x8x16xf32> -> vector<8x8x48xf32>
    %193 = vector.shape_cast %192 : vector<8x8x48xf32> to vector<64x48xf32>
    %194 = arith.truncf %193 : vector<64x48xf32> to vector<64x48xbf16>
    %c2_92 = arith.constant 2 : index
    %c0_93 = arith.constant 0 : index
    %c0_94 = arith.constant 0 : index
    %195 = vector.load %arg11[%c2_92, %c0_93, %c0_94] : memref<3x48x16xbf16, #tpu.memory_space<vmem>>, vector<1x48x16xbf16>
    %196 = vector.shape_cast %195 : vector<1x48x16xbf16> to vector<48x16xbf16>
    %cst_95 = arith.constant dense<0.000000e+00> : vector<64x16xf32>
    %197 = tpu.matmul %194, %196, %cst_95 {dimension_numbers = #tpu.dot_dimension_numbers<[1], [0], [0], [1], [0, 0, 1, 1], [], []>} : vector<64x48xbf16>, vector<48x16xbf16>, vector<64x16xf32> -> vector<64x16xf32>
    %198 = arith.addf %188, %197 : vector<64x16xf32>
    %c0_96 = arith.constant 0 : index
    %c0_97 = arith.constant 0 : index
    %199 = vector.load %arg12[%c0_96, %c0_97] : memref<1x16xf32, #tpu.memory_space<vmem>>, vector<1x16xf32>
    %200 = vector.shape_cast %199 : vector<1x16xf32> to vector<16xf32>
    %201 = vector.shape_cast %200 : vector<16xf32> to vector<1x16xf32>
    %202 = vector.broadcast %201 : vector<1x16xf32> to vector<64x16xf32>
    %203 = arith.addf %198, %202 : vector<64x16xf32>
    %204 = vector.shape_cast %203 : vector<64x16xf32> to vector<8x8x16xf32>
    %205 = arith.addf %130, %204 : vector<8x8x16xf32>
    %c0_98 = arith.constant 0 : index
    %c0_99 = arith.constant 0 : index
    %c0_100 = arith.constant 0 : index
    %c0_101 = arith.constant 0 : index
    %206 = vector.load %arg13[%c0_98, %c0_99, %c0_100, %c0_101] : memref<1x8x8x16xf32, #tpu.memory_space<vmem>>, vector<1x8x8x16xf32>
    %207 = vector.shape_cast %206 : vector<1x8x8x16xf32> to vector<8x8x16xf32>
    %208 = vector.shape_cast %205 : vector<8x8x16xf32> to vector<1x8x8x16xf32>
    tpu.vector_store %arg13[%c0_98, %c0_99, %c0_100, %c0_101], %208 {strides = array<i32>} : memref<1x8x8x16xf32, #tpu.memory_space<vmem>>, vector<1x8x8x16xf32>,
    return
  }
  func.func @transform_0(%arg0: i32) -> (i32, i32, i32, i32) {
    %c0_i32 = arith.constant 0 : i32
    %c0_i32_0 = arith.constant 0 : i32
    %c0_i32_1 = arith.constant 0 : i32
    %c0_i32_2 = arith.constant 0 : i32
    return %arg0, %c0_i32, %c0_i32_0, %c0_i32_1 : i32, i32, i32, i32
  }
  func.func @transform_1(%arg0: i32) -> (i32, i32) {
    %c0_i32 = arith.constant 0 : i32
    %c0_i32_0 = arith.constant 0 : i32
    %c0_i32_1 = arith.constant 0 : i32
    return %c0_i32, %c0_i32_0 : i32, i32
  }
  func.func @transform_2(%arg0: i32) -> (i32, i32) {
    %c0_i32 = arith.constant 0 : i32
    %c0_i32_0 = arith.constant 0 : i32
    %c0_i32_1 = arith.constant 0 : i32
    return %c0_i32, %c0_i32_0 : i32, i32
  }
  func.func @transform_3(%arg0: i32) -> (i32, i32) {
    %c0_i32 = arith.constant 0 : i32
    %c0_i32_0 = arith.constant 0 : i32
    %c0_i32_1 = arith.constant 0 : i32
    return %c0_i32, %c0_i32_0 : i32, i32
  }
  func.func @transform_4(%arg0: i32) -> (i32, i32) {
    %c0_i32 = arith.constant 0 : i32
    %c0_i32_0 = arith.constant 0 : i32
    %c0_i32_1 = arith.constant 0 : i32
    return %c0_i32, %c0_i32_0 : i32, i32
  }
  func.func @transform_5(%arg0: i32) -> (i32, i32) {
    %c0_i32 = arith.constant 0 : i32
    %c0_i32_0 = arith.constant 0 : i32
    %c0_i32_1 = arith.constant 0 : i32
    return %c0_i32, %c0_i32_0 : i32, i32
  }
  func.func @transform_6(%arg0: i32) -> (i32, i32) {
    %c0_i32 = arith.constant 0 : i32
    %c0_i32_0 = arith.constant 0 : i32
    %c0_i32_1 = arith.constant 0 : i32
    return %c0_i32, %c0_i32_0 : i32, i32
  }
  func.func @transform_7(%arg0: i32) -> (i32, i32, i32) {
    %c0_i32 = arith.constant 0 : i32
    %c0_i32_0 = arith.constant 0 : i32
    %c0_i32_1 = arith.constant 0 : i32
    %c0_i32_2 = arith.constant 0 : i32
    return %c0_i32, %c0_i32_0, %c0_i32_1 : i32, i32, i32
  }
  func.func @transform_8(%arg0: i32) -> (i32, i32) {
    %c0_i32 = arith.constant 0 : i32
    %c0_i32_0 = arith.constant 0 : i32
    %c0_i32_1 = arith.constant 0 : i32
    return %c0_i32, %c0_i32_0 : i32, i32
  }
  func.func @transform_9(%arg0: i32) -> (i32, i32) {
    %c0_i32 = arith.constant 0 : i32
    %c0_i32_0 = arith.constant 0 : i32
    %c0_i32_1 = arith.constant 0 : i32
    return %c0_i32, %c0_i32_0 : i32, i32
  }
  func.func @transform_10(%arg0: i32) -> (i32, i32, i32) {
    %c0_i32 = arith.constant 0 : i32
    %c0_i32_0 = arith.constant 0 : i32
    %c0_i32_1 = arith.constant 0 : i32
    %c0_i32_2 = arith.constant 0 : i32
    return %c0_i32, %c0_i32_0, %c0_i32_1 : i32, i32, i32
  }
  func.func @transform_11(%arg0: i32) -> (i32, i32) {
    %c0_i32 = arith.constant 0 : i32
    %c0_i32_0 = arith.constant 0 : i32
    %c0_i32_1 = arith.constant 0 : i32
    return %c0_i32, %c0_i32_0 : i32, i32
  }
  func.func @transform_12(%arg0: i32) -> (i32, i32, i32, i32) {
    %c0_i32 = arith.constant 0 : i32
    %c0_i32_0 = arith.constant 0 : i32
    %c0_i32_1 = arith.constant 0 : i32
    %c0_i32_2 = arith.constant 0 : i32
    return %arg0, %c0_i32, %c0_i32_0, %c0_i32_1 : i32, i32, i32, i32
  }
}

module attributes {stable_mosaic.version = 11 : i64} {
  func.func @_rstb_tail_kernel(%arg0: i32, %arg1: memref<1x8x8x16xf32, #tpu.memory_space<vmem>>, %arg2: memref<3x48x16xbf16, #tpu.memory_space<vmem>>, %arg3: memref<1x16xf32, #tpu.memory_space<vmem>>, %arg4: memref<1x8x8x16xf32, #tpu.memory_space<vmem>>, %arg5: memref<10x10x16xf32, #tpu.memory_space<vmem>>) attributes {dimension_semantics = [#tpu.dimension_semantics<parallel>], iteration_bounds = array<i64: 2>, scalar_prefetch = 0 : i64, scratch_operands = 1 : i64, tpu.core_type = #tpu.core_type<tc>, window_params = [{transform_indices = @transform_0, window_bounds = array<i64: 1, 8, 8, 16>}, {pipeline_mode = #tpu.pipeline_mode<synchronous>, transform_indices = @transform_1, window_bounds = array<i64: 3, 48, 16>}, {pipeline_mode = #tpu.pipeline_mode<synchronous>, transform_indices = @transform_2, window_bounds = array<i64: 1, 16>}, {transform_indices = @transform_3, window_bounds = array<i64: 1, 8, 8, 16>}]} {
    %c0 = arith.constant 0 : index
    %c0_0 = arith.constant 0 : index
    %c0_1 = arith.constant 0 : index
    %c0_2 = arith.constant 0 : index
    %0 = vector.load %arg1[%c0, %c0_0, %c0_1, %c0_2] : memref<1x8x8x16xf32, #tpu.memory_space<vmem>>, vector<1x8x8x16xf32>
    %1 = vector.shape_cast %0 : vector<1x8x8x16xf32> to vector<8x8x16xf32>
    %cst = arith.constant 0.000000e+00 : f32
    %2 = vector.broadcast %cst : f32 to vector<8x1x16xf32>
    %3 = tpu.concatenate %2, %1, %2 in 1 : vector<8x1x16xf32>, vector<8x8x16xf32>, vector<8x1x16xf32> -> vector<8x10x16xf32>
    %c1 = arith.constant 1 : index
    %c0_3 = arith.constant 0 : index
    %c0_4 = arith.constant 0 : index
    %4 = vector.load %arg5[%c1, %c0_3, %c0_4] : memref<10x10x16xf32, #tpu.memory_space<vmem>>, vector<8x10x16xf32>
    tpu.vector_store %arg5[%c1, %c0_3, %c0_4], %3 {strides = array<i32>} : memref<10x10x16xf32, #tpu.memory_space<vmem>>, vector<8x10x16xf32>,
    %cst_5 = arith.constant 0.000000e+00 : f32
    %5 = vector.broadcast %cst_5 : f32 to vector<10x16xf32>
    %c0_6 = arith.constant 0 : index
    %c0_7 = arith.constant 0 : index
    %c0_8 = arith.constant 0 : index
    %6 = vector.load %arg5[%c0_6, %c0_7, %c0_8] : memref<10x10x16xf32, #tpu.memory_space<vmem>>, vector<1x10x16xf32>
    %7 = vector.shape_cast %6 : vector<1x10x16xf32> to vector<10x16xf32>
    %8 = vector.shape_cast %5 : vector<10x16xf32> to vector<1x10x16xf32>
    tpu.vector_store %arg5[%c0_6, %c0_7, %c0_8], %8 {strides = array<i32>} : memref<10x10x16xf32, #tpu.memory_space<vmem>>, vector<1x10x16xf32>,
    %cst_9 = arith.constant 0.000000e+00 : f32
    %9 = vector.broadcast %cst_9 : f32 to vector<10x16xf32>
    %c9 = arith.constant 9 : index
    %c0_10 = arith.constant 0 : index
    %c0_11 = arith.constant 0 : index
    %10 = vector.load %arg5[%c9, %c0_10, %c0_11] : memref<10x10x16xf32, #tpu.memory_space<vmem>>, vector<1x10x16xf32>
    %11 = vector.shape_cast %10 : vector<1x10x16xf32> to vector<10x16xf32>
    %12 = vector.shape_cast %9 : vector<10x16xf32> to vector<1x10x16xf32>
    tpu.vector_store %arg5[%c9, %c0_10, %c0_11], %12 {strides = array<i32>} : memref<10x10x16xf32, #tpu.memory_space<vmem>>, vector<1x10x16xf32>,
    %c0_12 = arith.constant 0 : index
    %c0_13 = arith.constant 0 : index
    %c0_14 = arith.constant 0 : index
    %13 = vector.load %arg5[%c0_12, %c0_13, %c0_14] : memref<10x10x16xf32, #tpu.memory_space<vmem>>, vector<8x8x16xf32>
    %c0_15 = arith.constant 0 : index
    %c1_16 = arith.constant 1 : index
    %c0_17 = arith.constant 0 : index
    %14 = vector.load %arg5[%c0_15, %c1_16, %c0_17] : memref<10x10x16xf32, #tpu.memory_space<vmem>>, vector<8x8x16xf32>
    %c0_18 = arith.constant 0 : index
    %c2 = arith.constant 2 : index
    %c0_19 = arith.constant 0 : index
    %15 = vector.load %arg5[%c0_18, %c2, %c0_19] : memref<10x10x16xf32, #tpu.memory_space<vmem>>, vector<8x8x16xf32>
    %16 = tpu.concatenate %13, %14, %15 in 2 : vector<8x8x16xf32>, vector<8x8x16xf32>, vector<8x8x16xf32> -> vector<8x8x48xf32>
    %17 = vector.shape_cast %16 : vector<8x8x48xf32> to vector<64x48xf32>
    %18 = arith.truncf %17 : vector<64x48xf32> to vector<64x48xbf16>
    %c0_20 = arith.constant 0 : index
    %c0_21 = arith.constant 0 : index
    %c0_22 = arith.constant 0 : index
    %19 = vector.load %arg2[%c0_20, %c0_21, %c0_22] : memref<3x48x16xbf16, #tpu.memory_space<vmem>>, vector<1x48x16xbf16>
    %20 = vector.shape_cast %19 : vector<1x48x16xbf16> to vector<48x16xbf16>
    %cst_23 = arith.constant dense<0.000000e+00> : vector<64x16xf32>
    %21 = tpu.matmul %18, %20, %cst_23 {dimension_numbers = #tpu.dot_dimension_numbers<[1], [0], [0], [1], [0, 0, 1, 1], [], []>} : vector<64x48xbf16>, vector<48x16xbf16>, vector<64x16xf32> -> vector<64x16xf32>
    %c1_24 = arith.constant 1 : index
    %c0_25 = arith.constant 0 : index
    %c0_26 = arith.constant 0 : index
    %22 = vector.load %arg5[%c1_24, %c0_25, %c0_26] : memref<10x10x16xf32, #tpu.memory_space<vmem>>, vector<8x8x16xf32>
    %c1_27 = arith.constant 1 : index
    %c1_28 = arith.constant 1 : index
    %c0_29 = arith.constant 0 : index
    %23 = vector.load %arg5[%c1_27, %c1_28, %c0_29] : memref<10x10x16xf32, #tpu.memory_space<vmem>>, vector<8x8x16xf32>
    %c1_30 = arith.constant 1 : index
    %c2_31 = arith.constant 2 : index
    %c0_32 = arith.constant 0 : index
    %24 = vector.load %arg5[%c1_30, %c2_31, %c0_32] : memref<10x10x16xf32, #tpu.memory_space<vmem>>, vector<8x8x16xf32>
    %25 = tpu.concatenate %22, %23, %24 in 2 : vector<8x8x16xf32>, vector<8x8x16xf32>, vector<8x8x16xf32> -> vector<8x8x48xf32>
    %26 = vector.shape_cast %25 : vector<8x8x48xf32> to vector<64x48xf32>
    %27 = arith.truncf %26 : vector<64x48xf32> to vector<64x48xbf16>
    %c1_33 = arith.constant 1 : index
    %c0_34 = arith.constant 0 : index
    %c0_35 = arith.constant 0 : index
    %28 = vector.load %arg2[%c1_33, %c0_34, %c0_35] : memref<3x48x16xbf16, #tpu.memory_space<vmem>>, vector<1x48x16xbf16>
    %29 = vector.shape_cast %28 : vector<1x48x16xbf16> to vector<48x16xbf16>
    %cst_36 = arith.constant dense<0.000000e+00> : vector<64x16xf32>
    %30 = tpu.matmul %27, %29, %cst_36 {dimension_numbers = #tpu.dot_dimension_numbers<[1], [0], [0], [1], [0, 0, 1, 1], [], []>} : vector<64x48xbf16>, vector<48x16xbf16>, vector<64x16xf32> -> vector<64x16xf32>
    %31 = arith.addf %21, %30 : vector<64x16xf32>
    %c2_37 = arith.constant 2 : index
    %c0_38 = arith.constant 0 : index
    %c0_39 = arith.constant 0 : index
    %32 = vector.load %arg5[%c2_37, %c0_38, %c0_39] : memref<10x10x16xf32, #tpu.memory_space<vmem>>, vector<8x8x16xf32>
    %c2_40 = arith.constant 2 : index
    %c1_41 = arith.constant 1 : index
    %c0_42 = arith.constant 0 : index
    %33 = vector.load %arg5[%c2_40, %c1_41, %c0_42] : memref<10x10x16xf32, #tpu.memory_space<vmem>>, vector<8x8x16xf32>
    %c2_43 = arith.constant 2 : index
    %c2_44 = arith.constant 2 : index
    %c0_45 = arith.constant 0 : index
    %34 = vector.load %arg5[%c2_43, %c2_44, %c0_45] : memref<10x10x16xf32, #tpu.memory_space<vmem>>, vector<8x8x16xf32>
    %35 = tpu.concatenate %32, %33, %34 in 2 : vector<8x8x16xf32>, vector<8x8x16xf32>, vector<8x8x16xf32> -> vector<8x8x48xf32>
    %36 = vector.shape_cast %35 : vector<8x8x48xf32> to vector<64x48xf32>
    %37 = arith.truncf %36 : vector<64x48xf32> to vector<64x48xbf16>
    %c2_46 = arith.constant 2 : index
    %c0_47 = arith.constant 0 : index
    %c0_48 = arith.constant 0 : index
    %38 = vector.load %arg2[%c2_46, %c0_47, %c0_48] : memref<3x48x16xbf16, #tpu.memory_space<vmem>>, vector<1x48x16xbf16>
    %39 = vector.shape_cast %38 : vector<1x48x16xbf16> to vector<48x16xbf16>
    %cst_49 = arith.constant dense<0.000000e+00> : vector<64x16xf32>
    %40 = tpu.matmul %37, %39, %cst_49 {dimension_numbers = #tpu.dot_dimension_numbers<[1], [0], [0], [1], [0, 0, 1, 1], [], []>} : vector<64x48xbf16>, vector<48x16xbf16>, vector<64x16xf32> -> vector<64x16xf32>
    %41 = arith.addf %31, %40 : vector<64x16xf32>
    %c0_50 = arith.constant 0 : index
    %c0_51 = arith.constant 0 : index
    %42 = vector.load %arg3[%c0_50, %c0_51] : memref<1x16xf32, #tpu.memory_space<vmem>>, vector<1x16xf32>
    %43 = vector.shape_cast %42 : vector<1x16xf32> to vector<16xf32>
    %44 = vector.shape_cast %43 : vector<16xf32> to vector<1x16xf32>
    %45 = vector.broadcast %44 : vector<1x16xf32> to vector<64x16xf32>
    %46 = arith.addf %41, %45 : vector<64x16xf32>
    %47 = vector.shape_cast %46 : vector<64x16xf32> to vector<8x8x16xf32>
    %48 = arith.addf %1, %47 : vector<8x8x16xf32>
    %c0_52 = arith.constant 0 : index
    %c0_53 = arith.constant 0 : index
    %c0_54 = arith.constant 0 : index
    %c0_55 = arith.constant 0 : index
    %49 = vector.load %arg4[%c0_52, %c0_53, %c0_54, %c0_55] : memref<1x8x8x16xf32, #tpu.memory_space<vmem>>, vector<1x8x8x16xf32>
    %50 = vector.shape_cast %49 : vector<1x8x8x16xf32> to vector<8x8x16xf32>
    %51 = vector.shape_cast %48 : vector<8x8x16xf32> to vector<1x8x8x16xf32>
    tpu.vector_store %arg4[%c0_52, %c0_53, %c0_54, %c0_55], %51 {strides = array<i32>} : memref<1x8x8x16xf32, #tpu.memory_space<vmem>>, vector<1x8x8x16xf32>,
    return
  }
  func.func @transform_0(%arg0: i32) -> (i32, i32, i32, i32) {
    %c0_i32 = arith.constant 0 : i32
    %c0_i32_0 = arith.constant 0 : i32
    %c0_i32_1 = arith.constant 0 : i32
    %c0_i32_2 = arith.constant 0 : i32
    return %arg0, %c0_i32, %c0_i32_0, %c0_i32_1 : i32, i32, i32, i32
  }
  func.func @transform_1(%arg0: i32) -> (i32, i32, i32) {
    %c0_i32 = arith.constant 0 : i32
    %c0_i32_0 = arith.constant 0 : i32
    %c0_i32_1 = arith.constant 0 : i32
    %c0_i32_2 = arith.constant 0 : i32
    return %c0_i32, %c0_i32_0, %c0_i32_1 : i32, i32, i32
  }
  func.func @transform_2(%arg0: i32) -> (i32, i32) {
    %c0_i32 = arith.constant 0 : i32
    %c0_i32_0 = arith.constant 0 : i32
    %c0_i32_1 = arith.constant 0 : i32
    return %c0_i32, %c0_i32_0 : i32, i32
  }
  func.func @transform_3(%arg0: i32) -> (i32, i32, i32, i32) {
    %c0_i32 = arith.constant 0 : i32
    %c0_i32_0 = arith.constant 0 : i32
    %c0_i32_1 = arith.constant 0 : i32
    %c0_i32_2 = arith.constant 0 : i32
    return %arg0, %c0_i32, %c0_i32_0, %c0_i32_1 : i32, i32, i32, i32
  }
}

</mosaic_0001>

<bundles_post_ra>
// kernel: rstb_forward.5
= control target key start
LH: loop header
LB: loop body
LE: loop exit
PB: predicated region body
PF: predicated region fallthrough
CT: control target
= control target key end

     0   :  { %s1258_s12 = smov 0   ;;  %s1508_s0 = inlined_call_operand.vmem [shape: f32[2,8,8,16], index: 0, kind: input, shape index: {}]   ;;  %s1509_s1 = inlined_call_operand.vmem [shape: bf16[3,48,16], index: 1, kind: input, shape index: {}]   ;;  %s1510_s2 = inlined_call_operand.vmem [shape: f32[1,16], index: 2, kind: input, shape index: {}]   ;;  %s1511_s3 = inlined_call_operand.vmem [shape: f32[2,8,8,16], index: 3, kind: output, shape index: {}]  }
   0x1 LB: > { %s971_s13 = sadd.s32 4294967295, %s1233_s12   ;;  %p975_p0 = scmp.ge.s32.totalorder %s1233_s12, 1  ;;  %s1233_s12 = sphi %s1258_s12, %s13_s12  }
   0x2   : > { %p137_p1 = scmp.lt.s32.totalorder %s1233_s12, 3 }
   0x4   : > { %p138_p2 = pnand %p975_p0, %p137_p1 }
   0x5   : > { %p161_p3 = scmp.lt.s32.totalorder (!%p138_p2), %s971_s13, 1  ;;  %s1236_s26 = smov (!%p138_p2), 16  }
   0x6   : > { %141 = sbr.rel (%p138_p2) target bundleno = 401 (0x191), region = 32  ;;  %s1237_s29 = smov (!%p138_p2), 32  }
   0xb   : > { %vm222_vm0 = vcmask 130048   ;;  %vm224_vm1 = vcmask 123904   ;;  %v1235_v0 = vmov 0.0   ;;  %s1513_s13 = smov (!%p161_p3, %s971_s13), 1  ;;  %vm204_vm2 = vcmask 1040384   ;;  %v1218_v27 = vld [vmem:[%s1509_s1 + $0x28] sm:$0xff]  }
   0xc   : > { %240 = vst.msk [vmem:[#allocation2] sm:$0xff] %vm222_vm0, %v1235_v0  ;;  %243 = vst.msk [vmem:[#allocation2 + $0x90] sm:$0xff] %vm222_vm0, %v1235_v0  ;;  %s1016_s14 = sshll.u32 %s1513_s13, 6  ;;  %v1219_v28 = vld [vmem:[%s1509_s1 + $0x10] sm:$0xff]   ;;  %1039 = vmatprep.subr.bf16.mxu0 %v1218_v27  ;;  %v1220_v35 = vld [vmem:[%s1509_s1 + $0x20] sm:$0xff]   ;;  %vm341_vm3 = vcmask 261120  }
   0xd   : > { %241 = vst.msk [vmem:[#allocation2 + $0x8] sm:$0x3] %vm224_vm1, %v1235_v0  ;;  %244 = vst.msk [vmem:[#allocation2 + $0x98] sm:$0x3] %vm224_vm1, %v1235_v0  ;;  %s165_s17 = scalar_lea.vmem %s1508_s0, %s1016_s14  ;;  %1053 = vmatprep.subr.bf16.mxu1 %v1219_v28  ;;  %1040 = vmatpush3.bf16.msra.mxu0 %v1218_v27  ;;  %v1221_v36 = vld [vmem:[%s1509_s1 + $0x8] sm:$0xff]   ;;  %v1222_v49 = vld [vmem:[%s1509_s1 + $0x18] sm:$0xff]   ;;  %s1479_s18 = scalar_lea.vmem %s1511_s3, %s1016_s14 }
   0xe   : > { %v1278_v1 = vld [vmem:[%s165_s17 + $0x8] sm:$0xff]  ;;  %v1280_v2 = vld [vmem:[%s165_s17 + $0x10] sm:$0xff]  ;;  %v1282_v3 = vld [vmem:[%s165_s17] sm:$0xff]  ;;  %1054 = vmatpush3.bf16.msra.mxu1 %v1219_v28  ;;  %1041 = vmatprep.subr.bf16.mxu0 %v1220_v35  ;;  %vm493_vm4 = vcmask 392192  }
   0xf   : > { %v189_v4 = vrot.slane %v1278_v1, 7  ;;  %v190_v5 = vrot.slane %v1280_v2, 7  ;;  %v188_v6 = vrot.slane %v1282_v3, 7  ;;  %v1287_v7 = vld [vmem:[%s165_s17 + $0x18] sm:$0xff]  ;;  %v1289_v8 = vld [vmem:[%s165_s17 + $0x20] sm:$0xff]  ;;  %v1291_v9 = vld [vmem:[%s165_s17 + $0x28] sm:$0xff]  ;;  %1055 = vmatprep.subr.bf16.mxu1 %v1221_v36 }
  0x10   : > { %v191_v10 = vrot.slane %v1287_v7, 7  ;;  %v192_v11 = vrot.slane %v1289_v8, 7  ;;  %v193_v12 = vrot.slane %v1291_v9, 7  ;;  %v1300_v17 = vld [vmem:[%s165_s17 + $0x30] sm:$0xff]  ;;  %v1302_v18 = vld [vmem:[%s165_s17 + $0x38] sm:$0xff]  ;;  %v1223_v51 = vld [vmem:[%s1509_s1] sm:$0xff]  }
  0x11   : > { %v206_v13 = vsel %vm204_vm2, 0.0, %v189_v4  ;;  %v207_v14 = vsel %vm204_vm2, 0.0, %v190_v5  ;;  %v214_v15 = vsel %vm204_vm2, %v189_v4, 0.0  ;;  %v215_v16 = vsel %vm204_vm2, %v190_v5, 0.0  ;;  %1042 = vmatpush3.bf16.msra.mxu0 %v1220_v35 }
  0x12   : > { %226 = vst.msk [vmem:[#allocation2 + $0x20] sm:$0xff] %vm222_vm0, %v206_v13  ;;  %228 = vst.msk [vmem:[#allocation2 + $0x30] sm:$0xff] %vm222_vm0, %v207_v14  ;;  %v205_v19 = vsel %vm204_vm2, 0.0, %v188_v6  ;;  %v213_v20 = vsel %vm204_vm2, %v188_v6, 0.0  ;;  %v208_v21 = vsel %vm204_vm2, 0.0, %v191_v10  ;;  %v216_v22 = vsel %vm204_vm2, %v191_v10, 0.0  ;;  %1056 = vmatpush3.bf16.msra.mxu1 %v1221_v36  ;;  %1043 = vmatprep.subr.bf16.mxu0 %v1222_v49 }
  0x13   : > { %227 = vst.msk [vmem:[#allocation2 + $0x28] sm:$0x3] %vm224_vm1, %v214_v15  ;;  %229 = vst.msk [vmem:[#allocation2 + $0x38] sm:$0x3] %vm224_vm1, %v215_v16  ;;  %v209_v23 = vsel %vm204_vm2, 0.0, %v192_v11  ;;  %v210_v24 = vsel %vm204_vm2, 0.0, %v193_v12  ;;  %1057 = vmatprep.subr.bf16.mxu1 %v1223_v51 }
  0x14   : > { %223 = vst.msk [vmem:[#allocation2 + $0x10] sm:$0xff] %vm222_vm0, %v205_v19  ;;  %230 = vst.msk [vmem:[#allocation2 + $0x40] sm:$0xff] %vm222_vm0, %v208_v21  ;;  %v217_v25 = vsel %vm204_vm2, %v192_v11, 0.0  ;;  %v218_v26 = vsel %vm204_vm2, %v193_v12, 0.0  ;;  %v194_v29 = vrot.slane %v1300_v17, 7  ;;  %v195_v30 = vrot.slane %v1302_v18, 7 }
  0x15   : > { %225 = vst.msk [vmem:[#allocation2 + $0x18] sm:$0x3] %vm224_vm1, %v213_v20  ;;  %231 = vst.msk [vmem:[#allocation2 + $0x48] sm:$0x3] %vm224_vm1, %v216_v22  ;;  %v253_v37 = vld [vmem:[#allocation2 + $0x1] sm:$0xff]  ;;  %1044 = vmatpush3.bf16.msra.mxu0 %v1222_v49  ;;  %v682_v16 = vld [vmem:[#allocation2 + $0x91] sm:$0xff] }
  0x16   : > { %232 = vst.msk [vmem:[#allocation2 + $0x50] sm:$0xff] %vm222_vm0, %v209_v23  ;;  %234 = vst.msk [vmem:[#allocation2 + $0x60] sm:$0xff] %vm222_vm0, %v210_v24  ;;  %v211_v31 = vsel %vm204_vm2, 0.0, %v194_v29  ;;  %v219_v32 = vsel %vm204_vm2, %v194_v29, 0.0  ;;  %v212_v33 = vsel %vm204_vm2, 0.0, %v195_v30  ;;  %v220_v34 = vsel %vm204_vm2, %v195_v30, 0.0  ;;  %1058 = vmatpush3.bf16.msra.mxu1 %v1223_v51 }
  0x17   : > { %233 = vst.msk [vmem:[#allocation2 + $0x58] sm:$0x3] %vm224_vm1, %v217_v25  ;;  %235 = vst.msk [vmem:[#allocation2 + $0x68] sm:$0x3] %vm224_vm1, %v218_v26  ;;  %v261_v40 = vld [vmem:[#allocation2 + $0x2] sm:$0xff]  ;;  %v690_v20 = vld [vmem:[#allocation2 + $0x92] sm:$0xff] }
  0x18   : > { %236 = vst.msk [vmem:[#allocation2 + $0x70] sm:$0xff] %vm222_vm0, %v211_v31  ;;  %238 = vst.msk [vmem:[#allocation2 + $0x80] sm:$0xff] %vm222_vm0, %v212_v33  ;;  %v1367_v13 = vld [vmem:[%s1509_s1 + $0x40] sm:$0xff]  }
  0x19   : > { %237 = vst.msk [vmem:[#allocation2 + $0x78] sm:$0x3] %vm224_vm1, %v219_v32  ;;  %239 = vst.msk [vmem:[#allocation2 + $0x88] sm:$0x3] %vm224_vm1, %v220_v34  ;;  %1067 = vmatprep.subr.bf16.mxu0 %v1367_v13  ;;  %1081 = vmatprep.subr.bf16.mxu1 %v1367_v13  ;;  %v245_v26 = vld [vmem:[#allocation2] sm:$0xff] }
  0x1a   : > { %v255_v38 = vld [vmem:[#allocation2 + $0x21] sm:$0xff]  ;;  %v256_v39 = vld [vmem:[#allocation2 + $0x31] sm:$0xff] }
  0x1b   : > { %v1108_v41 = vpack.i.bf16 %v256_v39, %v255_v38  ;;  %v377_v47 = vld [vmem:[#allocation2 + $0x22] sm:$0xff]  ;;  %v378_v53 = vld [vmem:[#allocation2 + $0x32] sm:$0xff] }
  0x1c   : > { %v254_v42 = vld [vmem:[#allocation2 + $0x11] sm:$0xff]  ;;  %v371_v48 = vld [vmem:[#allocation2 + $0x41] sm:$0xff]  ;;  %v1128_v56 = vpack.i.bf16 %v378_v53, %v377_v47 }
  0x1d   : > { %v262_v43 = vld [vmem:[#allocation2 + $0x12] sm:$0xff]  ;;  %v1098_v44 = vpack.i.bf16 %v254_v42, %v253_v37  ;;  %1109 = vrot.lane.b32.xlu1 %v1108_v41, %s1236_s26  ;;  %v1103_v46 = vpack.i.bf16 %v255_v38, %v254_v42  ;;  %v1118_v52 = vpack.i.bf16 %v371_v48, %v256_v39  ;;  %v379_v54 = vld [vmem:[#allocation2 + $0x42] sm:$0xff] }
  0x1e   : > { %v1113_v45 = vpack.i.bf16 %v262_v43, %v261_v40  ;;  %v1123_v50 = vpack.i.bf16 %v377_v47, %v262_v43  ;;  %v1133_v55 = vpack.i.bf16 %v379_v54, %v378_v53  ;;  %v372_v57 = vld [vmem:[#allocation2 + $0x51] sm:$0xff]  ;;  %v373_v58 = vld [vmem:[#allocation2 + $0x61] sm:$0xff] }
  0x1f   : > { %1099 = vrot.lane.b32.xlu0 %v1098_v44, %s1236_s26  ;;  %v1143_v59 = vpack.i.bf16 %v373_v58, %v372_v57  ;;  %v1138_v60 = vpack.i.bf16 %v372_v57, %v371_v48  ;;  %v266_v61 = vld [vmem:[#allocation2 + $0x52] sm:$0xff]  ;;  %v381_v4 = vld [vmem:[#allocation2 + $0x62] sm:$0xff] }
  0x20   : > { %v260_v62 = vld [vmem:[#allocation2 + $0x71] sm:$0xff]  ;;  %v1153_v63 = vpack.i.bf16 %v266_v61, %v379_v54  ;;  %v375_v5 = vld [vmem:[#allocation2 + $0x81] sm:$0xff]  ;;  %v1163_v6 = vpack.i.bf16 %v381_v4, %v266_v61 }
  0x21   : > { %1114 = vrot.lane.b32.xlu1 %v1113_v45, %s1237_s29  ;;  %v1148_v0 = vpack.i.bf16 %v260_v62, %v373_v58  ;;  %v1158_v10 = vpack.i.bf16 %v375_v5, %v260_v62  ;;  %v382_v11 = vld [vmem:[#allocation2 + $0x72] sm:$0xff]  ;;  %v383_v12 = vld [vmem:[#allocation2 + $0x82] sm:$0xff]  ;;  %v1193_v19 = vpack.i.bf16 %v682_v16, %v375_v5 }
  0x22   : > { %v1173_v14 = vpack.i.bf16 %v383_v12, %v382_v11  ;;  %v1168_v15 = vpack.i.bf16 %v382_v11, %v381_v4  ;;  %v1213_v21 = vpack.i.bf16 %v690_v20, %v383_v12  ;;  %v246_v27 = vld [vmem:[#allocation2 + $0x10] sm:$0xff]  ;;  %v1387_v40 = vld [vmem:[#allocation2 + $0x20] sm:$0xff] }
  0x23   : > { %1104 = vrot.lane.b32.xlu0 %v1103_v46, %s1236_s26  ;;  %v1397_v53 = vld [vmem:[#allocation2 + $0x30] sm:$0xff] }
  0x25   : > { %1124 = vrot.lane.b32.xlu1 %v1123_v50, %s1237_s29  ;;  %v1393_v50 = vld [vmem:[#allocation2 + $0x40] sm:$0xff] }
  0x27   : > { %1119 = vrot.lane.b32.xlu0 %v1118_v52, %s1236_s26 }
  0x29   : > { %1134 = vrot.lane.b32.xlu1 %v1133_v55, %s1237_s29 }
  0x2b   : > { %1129 = vrot.lane.b32.xlu0 %v1128_v56, %s1237_s29 }
  0x2d   : > { %1144 = vrot.lane.b32.xlu1 %v1143_v59, %s1236_s26 }
  0x2f   : > { %1139 = vrot.lane.b32.xlu0 %v1138_v60, %s1236_s26 }
  0x31   : > { %1154 = vrot.lane.b32.xlu1 %v1153_v63, %s1237_s29 }
  0x33   : > { %1149 = vrot.lane.b32.xlu0 %v1148_v0, %s1236_s26 }
  0x35   : > { %1164 = vrot.lane.b32.xlu1 %v1163_v6, %s1237_s29 }
  0x37   : > { %1159 = vrot.lane.b32.xlu0 %v1158_v10, %s1236_s26 }
  0x39   : > { %1174 = vrot.lane.b32.xlu1 %v1173_v14, %s1237_s29  ;;  %v1225_v14 = vld [vmem:[%s1509_s1 + $0x38] sm:$0xff]  }
  0x3b   : > { %1169 = vrot.lane.b32.xlu0 %v1168_v15, %s1237_s29 }
  0x3d   : > { %1184 = vrot.lane.b32.xlu1 %v1148_v0, %s1236_s26 }
  0x3f   : > { %1179 = vrot.lane.b32.xlu0 %v1108_v41, %s1236_s26 }
  0x41   : > { %1194 = vrot.lane.b32.xlu1 %v1193_v19, %s1236_s26 }
  0x43   : > { %1189 = vrot.lane.b32.xlu0 %v1138_v60, %s1236_s26 }
  0x45   : > { %1204 = vrot.lane.b32.xlu1 %v1168_v15, %s1237_s29 }
  0x47   : > { %1199 = vrot.lane.b32.xlu0 %v1128_v56, %s1237_s29 }
  0x49   : > { %1214 = vrot.lane.b32.xlu1 %v1213_v21, %s1237_s29  ;;  %v1416_v21 = vld [vmem:[#allocation2 + $0x50] sm:$0xff] }
  0x4b   : > { %1209 = vrot.lane.b32.xlu0 %v1153_v63, %s1237_s29 }
  0x8f   : > { %v1110_v22 = vpop.permute.xlu1 %1109 }
  0x90   : > { %v1112_v48 = vunpack.i.h.bf16 %v1110_v22  ;;  %v1111_v49 = vunpack.i.l.bf16 %v1110_v22 }
  0x91   : > { %v1100_v23 = vpop.permute.xlu0 %1099 }
  0x92   : > { %v1102_v24 = vunpack.i.h.bf16 %v1100_v23  ;;  %v1101_v25 = vunpack.i.l.bf16 %v1100_v23  ;;  %v336_v63 = vsel %vm222_vm0, %v1397_v53, %v1112_v48  ;;  %v335_v0 = vsel %vm222_vm0, %v1387_v40, %v1111_v49  ;;  %v1226_v23 = vld [vmem:[%s1509_s1 + $0x30] sm:$0xff]  }
  0x93   : > { %v1115_v28 = vpop.permute.xlu1 %1114  ;;  %v252_v48 = vld [vmem:[#allocation2 + $0x70] sm:$0xff] }
  0x94   : > { %v1117_v29 = vunpack.i.h.bf16 %v1115_v28  ;;  %v1116_v30 = vunpack.i.l.bf16 %v1115_v28  ;;  %v333_v34 = vsel %vm222_vm0, %v245_v26, %v1101_v25  ;;  %v334_v35 = vsel %vm222_vm0, %v246_v27, %v1102_v24 }
  0x95   : > { %v1105_v31 = vpop.permute.xlu0 %1104 }
  0x96   : > { %v1107_v32 = vunpack.i.h.bf16 %v1105_v31  ;;  %v1106_v33 = vunpack.i.l.bf16 %v1105_v31  ;;  %v342_v36 = vsel %vm341_vm3, %v333_v34, %v1116_v30  ;;  %v343_v37 = vsel %vm341_vm3, %v334_v35, %v1117_v29  ;;  %v365_v31 = vld [vmem:[#allocation2 + $0x60] sm:$0xff] }
  0x97   : > { %v1125_v38 = vpop.permute.xlu1 %1124  ;;  %v350_v39 = vpack.c.bf16 %v343_v37, %v342_v36 }
  0x98   : > { %v1127_v41 = vunpack.i.h.bf16 %v1125_v38  ;;  %v1126_v42 = vunpack.i.l.bf16 %v1125_v38  ;;  %v448_v46 = vsel %vm222_vm0, %v246_v27, %v1106_v33  ;;  %v449_v47 = vsel %vm222_vm0, %v1387_v40, %v1107_v32 }
  0x99   : > { %v1120_v43 = vpop.permute.xlu0 %1119  ;;  %1059 = vmatprep.mubr.msk.bf16.mxu1 %vm493_vm4, %v350_v39 }
  0x9a   : > { %v1122_v44 = vunpack.i.h.bf16 %v1120_v43  ;;  %v1121_v45 = vunpack.i.l.bf16 %v1120_v43  ;;  %v456_v51 = vsel %vm341_vm3, %v448_v46, %v1126_v42  ;;  %v457_v52 = vsel %vm341_vm3, %v449_v47, %v1127_v41  ;;  %v367_v47 = vld [vmem:[#allocation2 + $0x80] sm:$0xff] }
  0x9b   : > { %v1135_v54 = vpop.permute.xlu1 %1134  ;;  %v464_v55 = vpack.c.bf16 %v457_v52, %v456_v51 }
  0x9c   : > { %v1137_v56 = vunpack.i.h.bf16 %v1135_v54  ;;  %v1136_v57 = vunpack.i.l.bf16 %v1135_v54  ;;  %v451_v59 = vsel %vm222_vm0, %v1393_v50, %v1122_v44  ;;  %v450_v60 = vsel %vm222_vm0, %v1397_v53, %v1121_v45 }
  0x9d   : > { %v1130_v58 = vpop.permute.xlu0 %1129  ;;  %1045 = vmatprep.mubr.msk.bf16.mxu0 %vm493_vm4, %v464_v55 }
  0x9e   : > { %v1132_v61 = vunpack.i.h.bf16 %v1130_v58  ;;  %v1131_v62 = vunpack.i.l.bf16 %v1130_v58  ;;  %v458_v4 = vsel %vm341_vm3, %v450_v60, %v1136_v57  ;;  %v459_v5 = vsel %vm341_vm3, %v451_v59, %v1137_v56 }
  0x9f   : > { %v465_v6 = vpack.c.bf16 %v459_v5, %v458_v4  ;;  %v1145_v12 = vpop.permute.xlu1 %1144 }
  0xa0   : > { %v345_v10 = vsel %vm341_vm3, %v336_v63, %v1132_v61  ;;  %v344_v11 = vsel %vm341_vm3, %v335_v0, %v1131_v62  ;;  %v1147_v27 = vunpack.i.h.bf16 %v1145_v12  ;;  %v1146_v28 = vunpack.i.l.bf16 %v1145_v12 }
  0xa1   : > { %v351_v15 = vpack.c.bf16 %v345_v10, %v344_v11  ;;  %v1140_v16 = vpop.permute.xlu0 %1139  ;;  %1046 = vmatmul.mubr.msk.bf16.vlgmr.msra.gmra.mxu0 %vm493_vm4, %v465_v6 }
  0xa2   : > { %v1142_v19 = vunpack.i.h.bf16 %v1140_v16  ;;  %v1141_v20 = vunpack.i.l.bf16 %v1140_v16  ;;  %1068 = vmatpush3.bf16.msra.mxu0 %v1367_v13  ;;  %v453_v38 = vsel %vm222_vm0, %v365_v31, %v1147_v27  ;;  %v452_v39 = vsel %vm222_vm0, %v1416_v21, %v1146_v28 }
  0xa3   : > { %1060 = vmatmul.mubr.msk.bf16.vlgmr.msra.gmra.mxu1 %vm493_vm4, %v351_v15  ;;  %v1155_v22 = vpop.permute.xlu1 %1154  ;;  %1069 = vmatprep.subr.bf16.mxu0 %v1225_v14 }
  0xa4   : > { %1084 = vmatpush3.bf16.msra.mxu1 %v1367_v13  ;;  %v1157_v24 = vunpack.i.h.bf16 %v1155_v22  ;;  %v1156_v25 = vunpack.i.l.bf16 %v1155_v22  ;;  %v338_v29 = vsel %vm222_vm0, %v1416_v21, %v1142_v19  ;;  %v337_v30 = vsel %vm222_vm0, %v1393_v50, %v1141_v20 }
  0xa5   : > { %v1150_v26 = vpop.permute.xlu0 %1149  ;;  %1082 = vmatprep.subr.bf16.mxu1 %v1225_v14 }
  0xa6   : > { %v346_v13 = vsel %vm341_vm3, %v337_v30, %v1156_v25  ;;  %v347_v32 = vsel %vm341_vm3, %v338_v29, %v1157_v24  ;;  %1070 = vmatpush3.bf16.msra.mxu0 %v1225_v14  ;;  %v1152_v43 = vunpack.i.h.bf16 %v1150_v26  ;;  %v1151_v44 = vunpack.i.l.bf16 %v1150_v26 }
  0xa7   : > { %v352_v33 = vpack.c.bf16 %v347_v32, %v346_v13  ;;  %v1165_v34 = vpop.permute.xlu1 %1164  ;;  %1071 = vmatprep.subr.bf16.mxu0 %v1226_v23 }
  0xa8   : > { %1085 = vmatpush3.bf16.msra.mxu1 %v1225_v14  ;;  %v1167_v35 = vunpack.i.h.bf16 %v1165_v34  ;;  %v1166_v36 = vunpack.i.l.bf16 %v1165_v34  ;;  %v340_v60 = vsel %vm222_vm0, %v252_v48, %v1152_v43  ;;  %v339_v61 = vsel %vm222_vm0, %v365_v31, %v1151_v44  ;;  %v674_v34 = vld [vmem:[#allocation2 + $0x90] sm:$0xff] }
  0xa9   : > { %v1160_v37 = vpop.permute.xlu0 %1159  ;;  %1083 = vmatprep.subr.bf16.mxu1 %v1226_v23  ;;  %1063 = vmatprep.mubr.msk.bf16.mxu1 %vm493_vm4, %v352_v33 }
  0xaa   : > { %v1162_v41 = vunpack.i.h.bf16 %v1160_v37  ;;  %v1161_v42 = vunpack.i.l.bf16 %v1160_v37  ;;  %v460_v45 = vsel %vm341_vm3, %v452_v39, %v1166_v36  ;;  %v461_v46 = vsel %vm341_vm3, %v453_v38, %v1167_v35  ;;  %1072 = vmatpush3.bf16.msra.mxu0 %v1226_v23 }
  0xab   : > { %v466_v49 = vpack.c.bf16 %v461_v46, %v460_v45  ;;  %v1175_v51 = vpop.permute.xlu1 %1174 }
  0xac   : > { %1086 = vmatpush3.bf16.msra.mxu1 %v1226_v23  ;;  %v1177_v52 = vunpack.i.h.bf16 %v1175_v51  ;;  %v1176_v54 = vunpack.i.l.bf16 %v1175_v51  ;;  %v455_v56 = vsel %vm222_vm0, %v367_v47, %v1162_v41  ;;  %v454_v57 = vsel %vm222_vm0, %v252_v48, %v1161_v42 }
  0xad   : > { %v1170_v55 = vpop.permute.xlu0 %1169  ;;  %1049 = vmatprep.mubr.msk.bf16.mxu0 %vm493_vm4, %v466_v49 }
  0xae   : > { %v1172_v58 = vunpack.i.h.bf16 %v1170_v55  ;;  %v1171_v59 = vunpack.i.l.bf16 %v1170_v55  ;;  %v462_v62 = vsel %vm341_vm3, %v454_v57, %v1176_v54  ;;  %v463_v63 = vsel %vm341_vm3, %v455_v56, %v1177_v52 }
  0xaf   : > { %v467_v0 = vpack.c.bf16 %v463_v63, %v462_v62  ;;  %v1185_v6 = vpop.permute.xlu1 %1184 }
  0xb0   : > { %v348_v4 = vsel %vm341_vm3, %v339_v61, %v1171_v59  ;;  %v349_v5 = vsel %vm341_vm3, %v340_v60, %v1172_v58  ;;  %v1187_v12 = vunpack.i.h.bf16 %v1185_v6  ;;  %v1186_v14 = vunpack.i.l.bf16 %v1185_v6 }
  0xb1   : > { %v353_v10 = vpack.c.bf16 %v349_v5, %v348_v4  ;;  %v1180_v11 = vpop.permute.xlu0 %1179  ;;  %1050 = vmatmul.mubr.msk.bf16.gmra.mxu0 %vm493_vm4, %v467_v0 }
  0xb2   : > { %v1182_v16 = vunpack.i.h.bf16 %v1180_v11  ;;  %v1181_v19 = vunpack.i.l.bf16 %v1180_v11  ;;  %v760_v22 = vsel %vm222_vm0, %v252_v48, %v1187_v12  ;;  %v759_v23 = vsel %vm222_vm0, %v365_v31, %v1186_v14 }
  0xb3   : > { %1064 = vmatmul.mubr.msk.bf16.gmra.mxu1 %vm493_vm4, %v353_v10  ;;  %v1195_v15 = vpop.permute.xlu1 %1194 }
  0xb4   : > { %v756_v25 = vsel %vm222_vm0, %v1397_v53, %v1182_v16  ;;  %v755_v26 = vsel %vm222_vm0, %v1387_v40, %v1181_v19  ;;  %v1197_v30 = vunpack.i.h.bf16 %v1195_v15  ;;  %v1196_v13 = vunpack.i.l.bf16 %v1195_v15 }
  0xb5   : > { %v1190_v20 = vpop.permute.xlu0 %1189 }
  0xb6   : > { %v1192_v35 = vunpack.i.h.bf16 %v1190_v20  ;;  %v1191_v36 = vunpack.i.l.bf16 %v1190_v20  ;;  %v762_v45 = vsel %vm222_vm0, %v674_v34, %v1197_v30  ;;  %v761_v46 = vsel %vm222_vm0, %v367_v47, %v1196_v13  ;;  %v1013_v20 = vld [vmem:[%s1510_s2] ss:$0 sm:$0xff] }
  0xb7   : > { %v1205_v24 = vpop.permute.xlu1 %1204 }
  0xb8   : > { %v1207_v27 = vunpack.i.h.bf16 %v1205_v24  ;;  %v1206_v28 = vunpack.i.l.bf16 %v1205_v24  ;;  %v758_v51 = vsel %vm222_vm0, %v1416_v21, %v1192_v35  ;;  %v757_v52 = vsel %vm222_vm0, %v1393_v50, %v1191_v36 }
  0xb9   : > { %v1200_v29 = vpop.permute.xlu0 %1199 }
  0xba   : > { %v1202_v32 = vunpack.i.h.bf16 %v1200_v29  ;;  %v1201_v33 = vunpack.i.l.bf16 %v1200_v29  ;;  %v767_v37 = vsel %vm341_vm3, %v759_v23, %v1206_v28  ;;  %v768_v31 = vsel %vm341_vm3, %v760_v22, %v1207_v27 }
  0xbb   : > { %v773_v38 = vpack.c.bf16 %v768_v31, %v767_v37  ;;  %v1215_v40 = vpop.permute.xlu1 %1214 }
  0xbc   : > { %v763_v53 = vsel %vm341_vm3, %v755_v26, %v1201_v33  ;;  %v764_v39 = vsel %vm341_vm3, %v756_v25, %v1202_v32  ;;  %v1217_v42 = vunpack.i.h.bf16 %v1215_v40  ;;  %v1216_v43 = vunpack.i.l.bf16 %v1215_v40 }
  0xbd   : > { %v771_v41 = vpack.c.bf16 %v764_v39, %v763_v53  ;;  %v1210_v44 = vpop.permute.xlu0 %1209  ;;  %1077 = vmatprep.mubr.msk.bf16.mxu1 %vm493_vm4, %v773_v38 }
  0xbe   : > { %v1212_v48 = vunpack.i.h.bf16 %v1210_v44  ;;  %v1211_v49 = vunpack.i.l.bf16 %v1210_v44  ;;  %v769_v54 = vsel %vm341_vm3, %v761_v46, %v1216_v43  ;;  %v770_v55 = vsel %vm341_vm3, %v762_v45, %v1217_v42 }
  0xbf   : > { %1073 = vmatprep.mubr.msk.bf16.mxu0 %vm493_vm4, %v771_v41  ;;  %v774_v56 = vpack.c.bf16 %v770_v55, %v769_v54 }
  0xc0   : > { %v765_v57 = vsel %vm341_vm3, %v757_v52, %v1211_v49  ;;  %v766_v47 = vsel %vm341_vm3, %v758_v51, %v1212_v48 }
  0xc1   : > { %v772_v58 = vpack.c.bf16 %v766_v47, %v765_v57  ;;  %1078 = vmatmul.mubr.msk.bf16.vlgmr.msra.gmra.mxu1 %vm493_vm4, %v774_v56 }
  0xc3   : > { %1074 = vmatmul.mubr.msk.bf16.vlgmr.msra.gmra.mxu0 %vm493_vm4, %v772_v58 }
 0x161   : > { %v1047_v59 = vpop.f32.mrf.mxu0 }
 0x163   : > { %v1061_v21 = vpop.f32.mrf.mxu1  ;;  %v540_v50 = vpop.f32.mrf.mxu0 }
 0x164   : > { %v644_v19 = vadd.f32 %v1061_v21, %v1047_v59 }
 0x165   : > { %v635_v60 = vpop.f32.mrf.mxu1  ;;  %v1048_v62 = vpop.f32.mrf.mxu0 }
 0x166   : > { %v636_v26 = vadd.f32 %v635_v60, %v540_v50 }
 0x167   : > { %v1062_v61 = vpop.f32.mrf.mxu1  ;;  %v543_v0 = vpop.f32.mrf.mxu0 }
 0x168   : > { %v647_v33 = vadd.f32 %v1062_v61, %v1048_v62 }
 0x169   : > { %v638_v63 = vpop.f32.mrf.mxu1 }
 0x16a   : > { %v639_v40 = vadd.f32 %v638_v63, %v543_v0 }
 0x171   : > { %v1051_v5 = vpop.f32.mrf.mxu0 }
 0x173   : > { %v1065_v4 = vpop.f32.mrf.mxu1  ;;  %v556_v10 = vpop.f32.mrf.mxu0 }
 0x174   : > { %v660_v15 = vadd.f32 %v1065_v4, %v1051_v5 }
 0x175   : > { %v651_v6 = vpop.f32.mrf.mxu1  ;;  %v1052_v12 = vpop.f32.mrf.mxu0 }
 0x176   : > { %v652_v23 = vadd.f32 %v651_v6, %v556_v10 }
 0x177   : > { %v1066_v11 = vpop.f32.mrf.mxu1  ;;  %v559_v16 = vpop.f32.mrf.mxu0 }
 0x178   : > { %v663_v29 = vadd.f32 %v1066_v11, %v1052_v12 }
 0x179   : > { %v654_v14 = vpop.f32.mrf.mxu1 }
 0x17a   : > { %v655_v37 = vadd.f32 %v654_v14, %v559_v16 }
 0x181   : > { %v1079_v22 = vpop.f32.mrf.mxu1 }
 0x182   : > { %v883_v25 = vadd.f32 %v1079_v22, %v660_v15 }
 0x183   : > { %v1075_v24 = vpop.f32.mrf.mxu0  ;;  %v862_v28 = vpop.f32.mrf.mxu1 }
 0x184   : > { %v879_v27 = vadd.f32 %v1075_v24, %v644_v19  ;;  %v898_v30 = vadd.f32 %v1013_v20, %v883_v25  ;;  %v881_v32 = vadd.f32 %v862_v28, %v652_v23 }
 0x185   : > { %v846_v13 = vpop.f32.mrf.mxu0  ;;  %v1080_v36 = vpop.f32.mrf.mxu1 }
 0x186   : > { %v894_v34 = vadd.f32 %v1013_v20, %v879_v27  ;;  %v877_v35 = vadd.f32 %v846_v13, %v636_v26  ;;  %v906_v31 = vadd.f32 %v898_v30, %v1300_v17  ;;  %v896_v38 = vadd.f32 %v1013_v20, %v881_v32 }
 0x187   : > { %v1076_v53 = vpop.f32.mrf.mxu0  ;;  %v884_v39 = vadd.f32 %v1080_v36, %v663_v29  ;;  %v865_v44 = vpop.f32.mrf.mxu1 }
 0x188   : > { %v902_v41 = vadd.f32 %v894_v34, %v1280_v2  ;;  %v892_v42 = vadd.f32 %v1013_v20, %v877_v35  ;;  %v880_v43 = vadd.f32 %v1076_v53, %v647_v33  ;;  %914 = vst.msk [vmem:[%s1479_s18 + $0x30] sm:$0xff] %vm222_vm0, %v906_v31  ;;  %v904_v45 = vadd.f32 %v896_v38, %v1289_v8 }
 0x189   : > { %v899_v46 = vadd.f32 %v1013_v20, %v884_v39  ;;  %v849_v48 = vpop.f32.mrf.mxu0  ;;  %v882_v17 = vadd.f32 %v865_v44, %v655_v37 }
 0x18a   : > { %910 = vst.msk [vmem:[%s1479_s18 + $0x10] sm:$0xff] %vm222_vm0, %v902_v41  ;;  %v900_v49 = vadd.f32 %v892_v42, %v1282_v3  ;;  %v895_v2 = vadd.f32 %v1013_v20, %v880_v43  ;;  %v878_v51 = vadd.f32 %v849_v48, %v639_v40  ;;  %912 = vst.msk [vmem:[%s1479_s18 + $0x20] sm:$0xff] %vm222_vm0, %v904_v45 }
 0x18b   : > { %v907_v52 = vadd.f32 %v899_v46, %v1302_v18  ;;  %v897_v54 = vadd.f32 %v1013_v20, %v882_v17 }
 0x18c   : > { %908 = vst.msk [vmem:[%s1479_s18] sm:$0xff] %vm222_vm0, %v900_v49  ;;  %v903_v8 = vadd.f32 %v895_v2, %v1287_v7  ;;  %v893_v55 = vadd.f32 %v1013_v20, %v878_v51 }
 0x18d   : > { %915 = vst.msk [vmem:[%s1479_s18 + $0x38] sm:$0xff] %vm222_vm0, %v907_v52  ;;  %v905_v56 = vadd.f32 %v897_v54, %v1291_v9 }
 0x18e   : > { %911 = vst.msk [vmem:[%s1479_s18 + $0x18] sm:$0xff] %vm222_vm0, %v903_v8  ;;  %v901_v3 = vadd.f32 %v893_v55, %v1278_v1 }
 0x18f   : > { %913 = vst.msk [vmem:[%s1479_s18 + $0x28] sm:$0xff] %vm222_vm0, %v905_v56 }
 0x190   : > { %909 = vst.msk [vmem:[%s1479_s18 + $0x8] sm:$0xff] %vm222_vm0, %v901_v3 }
 0x191 PF: > { %s13_s12 = sadd.s32 1, %s1233_s12  }
 0x192   : > { %p10_p4 = scmp.ge.s32.totalorder %s13_s12, 4  }
 0x194   :  { %12 = sbr.rel (!%p10_p4) target bundleno = 1 (0x1), region = 67 }

// kernel: rstb_forward.3
= control target key start
LH: loop header
LB: loop body
LE: loop exit
PB: predicated region body
PF: predicated region fallthrough
CT: control target
= control target key end

     0   :  { %s3520_s21 = smov 0   ;;  %s4217_s0 = inlined_call_operand.vmem [shape: f32[2,8,8,16], index: 0, kind: input, shape index: {}]   ;;  %s4218_s1 = inlined_call_operand.vmem [shape: f32[1,16], index: 1, kind: input, shape index: {}]   ;;  %s4219_s2 = inlined_call_operand.vmem [shape: f32[1,16], index: 2, kind: input, shape index: {}]   ;;  %s4220_s3 = inlined_call_operand.vmem [shape: bf16[16,48], index: 3, kind: input, shape index: {}]   ;;  %s4221_s4 = inlined_call_operand.vmem [shape: f32[1,48], index: 4, kind: input, shape index: {}]   ;;  %s4222_s5 = inlined_call_operand.vmem [shape: bf16[16,16], index: 5, kind: input, shape index: {}]   ;;  %s4223_s6 = inlined_call_operand.vmem [shape: f32[1,16], index: 6, kind: input, shape index: {}]   ;;  %s4224_s7 = inlined_call_operand.vmem [shape: f32[2,16,16], index: 7, kind: input, shape index: {}]   ;;  %s4225_s8 = inlined_call_operand.vmem [shape: f32[1,16], index: 8, kind: input, shape index: {}]   ;;  %s4226_s9 = inlined_call_operand.vmem [shape: f32[1,16], index: 9, kind: input, shape index: {}]   ;;  %s4227_s10 = inlined_call_operand.vmem [shape: bf16[3,48,16], index: 10, kind: input, shape index: {}]   ;;  %s4228_s11 = inlined_call_operand.vmem [shape: f32[1,16], index: 11, kind: input, shape index: {}]   ;;  %s4229_s12 = inlined_call_operand.vmem [shape: f32[2,8,8,16], index: 12, kind: output, shape index: {}]  }
   0x1 LB: > { %s2855_s22 = sadd.s32 4294967295, %s3444_s21   ;;  %p2859_p0 = scmp.ge.s32.totalorder %s3444_s21, 1  ;;  %s3444_s21 = sphi %s3520_s21, %s22_s21  }
   0x2   : > { %p362_p1 = scmp.lt.s32.totalorder %s3444_s21, 3 }
   0x4   : > { %p363_p2 = pnand %p2859_p0, %p362_p1 }
   0x5   : > { %p404_p3 = scmp.lt.s32.totalorder (!%p363_p2), %s2855_s22, 1  ;;  %s3448_s17 = smov (!%p363_p2), 112  }
   0x6   : > { %366 = sbr.rel (%p363_p2) target bundleno = 2960 (0xb90), region = 68  ;;  %s3449_s25 = smov (!%p363_p2), 96  }
   0x7   : > { %s3450_s27 = smov (!%p363_p2), 104   ;;  %s3451_s28 = smov (!%p363_p2), 120  }
   0x8   : > { %s3452_s15 = smov (!%p363_p2), 88   ;;  %s3453_s19 = smov (!%p363_p2), 16  }
   0x9   : > { %s3454_s20 = smov (!%p363_p2), 32  }
   0xb   : > { %s4231_s22 = smov (!%p404_p3, %s2855_s22), 1  ;;  %vm425_vm0 = vcmask 130048   ;;  %v3324_v56 = vld [vmem:[%s4220_s3] sm:$0xff]   ;;  %vm3447_vm1 = vmmov 0   ;;  %vm694_vm2 = vcmask 64512   ;;  %vm1715_vm3 = vcmask 1043456  }
   0xc   : > { %s2945_s23 = sshll.u32 %s4231_s22, 6  ;;  %3015 = vmatprep.subr.bf16.mxu0 %v3324_v56  ;;  %3183 = vmatprep.subr.bf16.mxu1 %v3324_v56  ;;  %vm2108_vm4 = vcmask 123904   ;;  %vm2089_vm5 = vcmask 1040384   ;;  %vm2225_vm6 = vcmask 261120   ;;  %vm2377_vm7 = vcmask 392192  }
   0xd   : > { %s3536_s26 = scalar_lea.vmem %s4217_s0, %s2945_s23  ;;  %3016 = vmatpush3.bf16.msra.mxu0 %v3324_v56  ;;  %3184 = vmatpush3.bf16.msra.mxu1 %v3324_v56 }
   0xe   : > { %v415_v0 = vld [vmem:[%s3536_s26] sm:$0xff]  ;;  %v417_v1 = vld [vmem:[%s3536_s26 + $0x10] sm:$0xff]  ;;  %v416_v2 = vld [vmem:[%s3536_s26 + $0x8] sm:$0xff] }
   0xf   : > { %v426_v3 = vsel %vm425_vm0, %v415_v0, 0.0  ;;  %v432_v4 = vsel %vm425_vm0, %v417_v1, 0.0  ;;  %v418_v5 = vld [vmem:[%s3536_s26 + $0x18] sm:$0xff]  ;;  %v429_v6 = vsel %vm425_vm0, %v416_v2, 0.0  ;;  %v419_v7 = vld [vmem:[%s3536_s26 + $0x20] sm:$0xff]  ;;  %v420_v9 = vld [vmem:[%s3536_s26 + $0x28] sm:$0xff] }
  0x10   : > { %427 = vadd.xlane.f32.xlu0 %v426_v3  ;;  %433 = vadd.xlane.f32.xlu1 %v432_v4  ;;  %v435_v8 = vsel %vm425_vm0, %v418_v5, 0.0  ;;  %v438_v10 = vsel %vm425_vm0, %v419_v7, 0.0  ;;  %v441_v11 = vsel %vm425_vm0, %v420_v9, 0.0  ;;  %v421_v12 = vld [vmem:[%s3536_s26 + $0x30] sm:$0xff]  ;;  %v422_v13 = vld [vmem:[%s3536_s26 + $0x38] sm:$0xff] }
  0x11   : > { %v444_v14 = vsel %vm425_vm0, %v421_v12, 0.0  ;;  %v447_v15 = vsel %vm425_vm0, %v422_v13, 0.0 }
  0x14   : > { %430 = vadd.xlane.f32.xlu0 %v429_v6  ;;  %436 = vadd.xlane.f32.xlu1 %v435_v8 }
  0x18   : > { %439 = vadd.xlane.f32.xlu0 %v438_v10  ;;  %442 = vadd.xlane.f32.xlu1 %v441_v11 }
  0x1c   : > { %445 = vadd.xlane.f32.xlu0 %v444_v14  ;;  %448 = vadd.xlane.f32.xlu1 %v447_v15 }
  0x99   : > { %v428_v16 = vpop.xlane.xlu0 %427  ;;  %v434_v17 = vpop.xlane.xlu1 %433 }
  0x9a   : > { %v451_v18 = vmul.f32 0.0625, %v428_v16  ;;  %v453_v19 = vmul.f32 0.0625, %v434_v17 }
  0x9c   : > { %v3554_v20 = vsub.f32 %v415_v0, %v451_v18  ;;  %v3556_v21 = vsub.f32 %v417_v1, %v453_v19 }
  0x9d   : > { %v431_v22 = vpop.xlane.xlu0 %430  ;;  %v437_v23 = vpop.xlane.xlu1 %436 }
  0x9e   : > { %v452_v24 = vmul.f32 0.0625, %v431_v22  ;;  %v454_v25 = vmul.f32 0.0625, %v437_v23  ;;  %v467_v26 = vmul.f32 %v3554_v20, %v3554_v20  ;;  %v469_v27 = vmul.f32 %v3556_v21, %v3556_v21  ;;  %v2864_v23 = vld [vmem:[%s4218_s1] ss:$0 sm:$0xff] }
  0xa0   : > { %v3562_v28 = vsub.f32 %v416_v2, %v452_v24  ;;  %v3564_v29 = vsub.f32 %v418_v5, %v454_v25  ;;  %v475_v30 = vsel %vm425_vm0, %v467_v26, 0.0  ;;  %v481_v33 = vsel %vm425_vm0, %v469_v27, 0.0 }
  0xa1   : > { %476 = vadd.xlane.f32.xlu0 %v475_v30  ;;  %v440_v31 = vpop.xlane.xlu0 %439  ;;  %v443_v32 = vpop.xlane.xlu1 %442 }
  0xa2   : > { %v455_v34 = vmul.f32 0.0625, %v440_v31  ;;  %v456_v35 = vmul.f32 0.0625, %v443_v32  ;;  %v468_v36 = vmul.f32 %v3562_v28, %v3562_v28  ;;  %v470_v37 = vmul.f32 %v3564_v29, %v3564_v29  ;;  %v2865_v32 = vld [vmem:[%s4219_s2] ss:$0 sm:$0xff] }
  0xa4   : > { %v3572_v38 = vsub.f32 %v419_v7, %v455_v34  ;;  %v3574_v39 = vsub.f32 %v420_v9, %v456_v35  ;;  %v478_v40 = vsel %vm425_vm0, %v468_v36, 0.0  ;;  %v484_v43 = vsel %vm425_vm0, %v470_v37, 0.0 }
  0xa5   : > { %482 = vadd.xlane.f32.xlu0 %v481_v33  ;;  %479 = vadd.xlane.f32.xlu1 %v478_v40  ;;  %v446_v41 = vpop.xlane.xlu0 %445  ;;  %v449_v42 = vpop.xlane.xlu1 %448 }
  0xa6   : > { %v457_v44 = vmul.f32 0.0625, %v446_v41  ;;  %v458_v45 = vmul.f32 0.0625, %v449_v42  ;;  %v471_v46 = vmul.f32 %v3572_v38, %v3572_v38  ;;  %v472_v47 = vmul.f32 %v3574_v39, %v3574_v39 }
  0xa8   : > { %v3582_v48 = vsub.f32 %v421_v12, %v457_v44  ;;  %v3584_v49 = vsub.f32 %v422_v13, %v458_v45  ;;  %v487_v50 = vsel %vm425_vm0, %v471_v46, 0.0  ;;  %v490_v51 = vsel %vm425_vm0, %v472_v47, 0.0 }
  0xa9   : > { %485 = vadd.xlane.f32.xlu1 %v484_v43  ;;  %488 = vadd.xlane.f32.xlu0 %v487_v50 }
  0xaa   : > { %v473_v52 = vmul.f32 %v3582_v48, %v3582_v48  ;;  %v474_v53 = vmul.f32 %v3584_v49, %v3584_v49 }
  0xac   : > { %v493_v54 = vsel %vm425_vm0, %v473_v52, 0.0  ;;  %v496_v55 = vsel %vm425_vm0, %v474_v53, 0.0 }
  0xad   : > { %491 = vadd.xlane.f32.xlu1 %v490_v51  ;;  %494 = vadd.xlane.f32.xlu0 %v493_v54 }
  0xb1   : > { %497 = vadd.xlane.f32.xlu1 %v496_v55 }
 0x12a   : > { %v477_v57 = vpop.xlane.xlu0 %476 }
 0x12b   : > { %v499_v58 = vmul.f32 0.0625, %v477_v57 }
 0x12d   : > { %v507_v59 = vadd.f32 1e-05, %v499_v58 }
 0x12e   : > { %v480_v60 = vpop.xlane.xlu1 %479  ;;  %v483_v61 = vpop.xlane.xlu0 %482 }
 0x12f   : > { %v500_v62 = vmul.f32 0.0625, %v480_v60  ;;  %v501_v63 = vmul.f32 0.0625, %v483_v61  ;;  %3334 = vrsqrt.f32 %v507_v59 }
 0x131   : > { %v508_v0 = vadd.f32 1e-05, %v500_v62  ;;  %v509_v1 = vadd.f32 1e-05, %v501_v63 }
 0x132   : > { %v486_v2 = vpop.xlane.xlu1 %485  ;;  %v489_v3 = vpop.xlane.xlu0 %488 }
 0x133   : > { %3336 = vrsqrt.f32 %v508_v0  ;;  %v502_v4 = vmul.f32 0.0625, %v486_v2  ;;  %v503_v5 = vmul.f32 0.0625, %v489_v3 }
 0x134   : > { %3338 = vrsqrt.f32 %v509_v1  ;;  %v2870_v1 = vld [vmem:[%s4221_s4] ss:$0 sm:$0xff] }
 0x135   : > { %v510_v6 = vadd.f32 1e-05, %v502_v4  ;;  %v511_v7 = vadd.f32 1e-05, %v503_v5 }
 0x136   : > { %v492_v8 = vpop.xlane.xlu1 %491  ;;  %v495_v9 = vpop.xlane.xlu0 %494 }
 0x137   : > { %3340 = vrsqrt.f32 %v510_v6  ;;  %v504_v10 = vmul.f32 0.0625, %v492_v8  ;;  %v505_v11 = vmul.f32 0.0625, %v495_v9 }
 0x138   : > { %3342 = vrsqrt.f32 %v511_v7 }
 0x139   : > { %v512_v12 = vadd.f32 1e-05, %v504_v10  ;;  %v513_v13 = vadd.f32 1e-05, %v505_v11 }
 0x13a   : > { %v498_v14 = vpop.xlane.xlu1 %497 }
 0x13b   : > { %3344 = vrsqrt.f32 %v512_v12  ;;  %v506_v15 = vmul.f32 0.0625, %v498_v14 }
 0x13c   : > { %3346 = vrsqrt.f32 %v513_v13  ;;  %v3335_v16 = vpop.eup %3334 }
 0x13d   : > { %v514_v17 = vadd.f32 1e-05, %v506_v15  ;;  %v523_v19 = vmul.f32 %v3335_v16, %v3554_v20 }
 0x13f   : > { %3348 = vrsqrt.f32 %v514_v17  ;;  %v537_v30 = vmul.f32 %v2864_v23, %v523_v19 }
 0x140   : > { %v3337_v18 = vpop.eup %3336 }
 0x141   : > { %v3339_v22 = vpop.eup %3338  ;;  %v524_v24 = vmul.f32 %v3337_v18, %v3562_v28  ;;  %v551_v37 = vadd.f32 %v2865_v32, %v537_v30 }
 0x142   : > { %v525_v25 = vmul.f32 %v3339_v22, %v3556_v21 }
 0x143   : > { %v538_v26 = vmul.f32 %v2864_v23, %v524_v24 }
 0x144   : > { %v3341_v27 = vpop.eup %3340  ;;  %v539_v20 = vmul.f32 %v2864_v23, %v525_v25 }
 0x145   : > { %v3343_v31 = vpop.eup %3342  ;;  %v526_v33 = vmul.f32 %v3341_v27, %v3564_v29  ;;  %v552_v34 = vadd.f32 %v2865_v32, %v538_v26 }
 0x146   : > { %v527_v40 = vmul.f32 %v3343_v31, %v3572_v38  ;;  %v553_v41 = vadd.f32 %v2865_v32, %v539_v20  ;;  %v900_v20 = vld [vmem:[%s4224_s7] sm:$0xff] }
 0x147   : > { %v540_v35 = vmul.f32 %v2864_v23, %v526_v33  ;;  %v575_v43 = vcombine.low %v551_v37, %v552_v34  ;;  %v2866_v46 = vcombine.high %v551_v37, %v552_v34 }
 0x148   : > { %v3345_v36 = vpop.eup %3344  ;;  %v541_v51 = vmul.f32 %v2864_v23, %v527_v40  ;;  %v901_v40 = vld [vmem:[%s4224_s7 + $0x8] sm:$0xff] }
 0x149   : > { %v3347_v28 = vpop.eup %3346  ;;  %v554_v21 = vadd.f32 %v2865_v32, %v540_v35  ;;  %v528_v42 = vmul.f32 %v3345_v36, %v3574_v39 }
 0x14a   : > { %v529_v44 = vmul.f32 %v3347_v28, %v3582_v48  ;;  %v555_v39 = vadd.f32 %v2865_v32, %v541_v51 }
 0x14b   : > { %v576_v45 = vcombine.low %v553_v41, %v554_v21  ;;  %v2867_v47 = vcombine.high %v553_v41, %v554_v21  ;;  %v542_v50 = vmul.f32 %v2864_v23, %v528_v42 }
 0x14c   : > { %v3349_v29 = vpop.eup %3348  ;;  %v543_v55 = vmul.f32 %v2864_v23, %v529_v44 }
 0x14d   : > { %v591_v52 = vpack.c.bf16 %v576_v45, %v575_v43  ;;  %v592_v53 = vpack.c.bf16 %v2867_v47, %v2866_v46  ;;  %v530_v54 = vmul.f32 %v3349_v29, %v3584_v49  ;;  %v556_v56 = vadd.f32 %v2865_v32, %v542_v50 }
 0x14e   : > { %v557_v57 = vadd.f32 %v2865_v32, %v543_v55  ;;  %v3446_v49 = vmov 0.0  }
 0x14f   : > { %3017 = vmatprep.mubr.msk.bf16.mxu0 %vm425_vm0, %v591_v52  ;;  %v544_v38 = vmul.f32 %v2864_v23, %v530_v54  ;;  %v583_v58 = vcombine.low %v555_v39, %v556_v56  ;;  %v2868_v60 = vcombine.high %v555_v39, %v556_v56  ;;  %3025 = vmatprep.subr.bf16.mxu1 %v3446_v49 }
 0x150   : > { %3018 = vmatmul.mubr.msk.bf16.vlgmr.msra.gmra.mxu0 %vm425_vm0, %v592_v53  ;;  %2124 = vst.msk [vmem:[#allocation2] sm:$0xff] %vm425_vm0, %v3446_v49  ;;  %2127 = vst.msk [vmem:[#allocation2 + $0x90] sm:$0xff] %vm425_vm0, %v3446_v49  ;;  %3037 = vmatprep.subr.bf16.mxu0 %v3446_v49 }
 0x151   : > { %v558_v48 = vadd.f32 %v2865_v32, %v544_v38  ;;  %3039 = vmatprep.mubr.msk.bf16.mxu0 %vm3447_vm1, %v3446_v49  ;;  %2125 = vst.msk [vmem:[#allocation2 + $0x8] sm:$0x3] %vm2108_vm4, %v3446_v49  ;;  %2128 = vst.msk [vmem:[#allocation2 + $0x98] sm:$0x3] %vm2108_vm4, %v3446_v49 }
 0x153   : > { %v584_v59 = vcombine.low %v557_v57, %v558_v48  ;;  %v2869_v61 = vcombine.high %v557_v57, %v558_v48 }
 0x155   : > { %v593_v62 = vpack.c.bf16 %v584_v59, %v583_v58  ;;  %v594_v63 = vpack.c.bf16 %v2869_v61, %v2868_v60 }
 0x157   : > { %3021 = vmatprep.mubr.msk.bf16.mxu1 %vm425_vm0, %v593_v62 }
 0x158   : > { %3022 = vmatmul.mubr.msk.bf16.vlgmr.msra.gmra.mxu1 %vm425_vm0, %v594_v63 }
 0x159   : > { %3027 = vmatprep.mubr.msk.bf16.mxu1 %vm3447_vm1, %v3446_v49 }
 0x210   : > { %v3019_v0 = vpop.f32.mrf.mxu0 }
 0x211   : > { %v665_v4 = vadd.f32 %v3019_v0, %v2870_v1 }
 0x212   : > { %v656_v2 = vpop.f32.mrf.mxu0 }
 0x213   : > { %v657_v7 = vadd.f32 %v2870_v1, %v656_v2 }
 0x214   : > { %v3020_v3 = vpop.f32.mrf.mxu0 }
 0x215   : > { %v668_v5 = vadd.f32 %v3020_v3, %v2870_v1 }
 0x216   : > { %v659_v6 = vpop.f32.mrf.mxu0 }
 0x217   : > { %v3628_v8 = vpack.c.bf16 %v668_v5, %v665_v4  ;;  %v660_v9 = vadd.f32 %v2870_v1, %v659_v6 }
 0x218   : > { %v3023_v10 = vpop.f32.mrf.mxu1 }
 0x219   : > { %v3630_v11 = vpack.c.bf16 %v660_v9, %v657_v7  ;;  %743 = vrot.lane.b32.xlu1 %v3628_v8, %s3448_s17  ;;  %v681_v19 = vadd.f32 %v3023_v10, %v2870_v1 }
 0x21a   : > { %v672_v12 = vpop.f32.mrf.mxu1 }
 0x21b   : > { %692 = vrot.lane.b32.xlu0 %v3630_v11, %s3448_s17  ;;  %v673_v15 = vadd.f32 %v2870_v1, %v672_v12 }
 0x21c   : > { %v3024_v13 = vpop.f32.mrf.mxu1 }
 0x21d   : > { %v684_v17 = vadd.f32 %v3024_v13, %v2870_v1 }
 0x21e   : > { %v675_v14 = vpop.f32.mrf.mxu1 }
 0x21f   : > { %v676_v16 = vadd.f32 %v2870_v1, %v675_v14  ;;  %v3637_v22 = vpack.c.bf16 %v684_v17, %v681_v19 }
 0x221   : > { %v3634_v18 = vpack.c.bf16 %v676_v16, %v673_v15 }
 0x223   : > { %793 = vrot.lane.b32.xlu1 %v3634_v18, %s3448_s17 }
 0x227   : > { %843 = vrot.lane.b32.xlu1 %v3637_v22, %s3448_s17 }
 0x28b   : > { %v744_v25 = vpop.permute.xlu1 %743 }
 0x28c   : > { %v749_v27 = vsel %vm694_vm2, %v744_v25, 0 }
 0x28d   : > { %v693_v23 = vpop.permute.xlu0 %692 }
 0x28e   : > { %v699_v24 = vsel %vm694_vm2, %v693_v23, 0 }
 0x28f   : > { %3026 = vmatpush3.bf16.xpose.msra.mxu1 %v699_v24 }
 0x290   : > { %3031 = vmatprep.subr.bf16.mxu1 %v3446_v49 }
 0x295   : > { %v794_v26 = vpop.permute.xlu1 %793 }
 0x296   : > { %v799_v30 = vsel %vm694_vm2, %v794_v26, 0  ;;  %3028 = vmatmul.mubr.msk.bf16.vlgmr.msra.gmra.mxu1 %vm694_vm2, %v3630_v11 }
 0x297   : > { %3032 = vmatpush3.bf16.xpose.msra.mxu1 %v749_v27  ;;  %3038 = vmatpush3.bf16.xpose.msra.mxu0 %v799_v30 }
 0x298   : > { %3033 = vmatprep.mubr.msk.bf16.mxu1 %vm3447_vm1, %v3446_v49  ;;  %3043 = vmatprep.subr.bf16.mxu1 %v3446_v49 }
 0x299   : > { %3049 = vmatprep.subr.bf16.mxu0 %v3446_v49  ;;  %v844_v31 = vpop.permute.xlu1 %843 }
 0x29a   : > { %v849_v32 = vsel %vm694_vm2, %v844_v31, 0 }
 0x29e   : > { %3034 = vmatmul.mubr.msk.bf16.vlgmr.msra.gmra.mxu1 %vm694_vm2, %v3628_v8  ;;  %3040 = vmatmul.mubr.msk.bf16.vlgmr.msra.gmra.mxu0 %vm694_vm2, %v3634_v18 }
 0x29f   : > { %3044 = vmatpush3.bf16.xpose.msra.mxu1 %v849_v32  ;;  %3045 = vmatprep.mubr.msk.bf16.mxu1 %vm3447_vm1, %v3446_v49 }
 0x2a0   : > { %3055 = vmatprep.subr.bf16.mxu1 %v3446_v49  ;;  %3051 = vmatprep.mubr.msk.bf16.mxu0 %vm3447_vm1, %v3446_v49 }
 0x2a6   : > { %3046 = vmatmul.mubr.msk.bf16.vlgmr.msra.gmra.mxu1 %vm694_vm2, %v3637_v22 }
 0x2a7   : > { %3057 = vmatprep.mubr.msk.bf16.mxu1 %vm3447_vm1, %v3446_v49 }
 0x356   : > { %v735_v33 = vpop.f32.mrf.mxu1 }
 0x357   : > { %v892_v34 = vmul.f32 0.35355338, %v735_v33 }
 0x358   : > { %v3029_v35 = vpop.f32.mrf.mxu1 }
 0x359   : > { %v902_v36 = vadd.f32 %v900_v20, %v892_v34 }
 0x35a   : > { %v738_v37 = vpop.f32.mrf.mxu1 }
 0x35b   : > { %v893_v28 = vmul.f32 0.35355338, %v738_v37  ;;  %v910_v41 = vsel %vm425_vm0, %v902_v36, -inf }
 0x35c   : > { %911 = vmax.xlane.f32.xlu0 %v910_v41  ;;  %v3030_v21 = vpop.f32.mrf.mxu1 }
 0x35d   : > { %v903_v42 = vadd.f32 %v901_v40, %v893_v28 }
 0x35e   : > { %v785_v43 = vpop.f32.mrf.mxu1  ;;  %v835_v44 = vpop.f32.mrf.mxu0 }
 0x35f   : > { %v894_v45 = vmul.f32 0.35355338, %v785_v43  ;;  %v913_v46 = vsel %vm425_vm0, %v903_v42, -inf  ;;  %v896_v51 = vmul.f32 0.35355338, %v835_v44 }
 0x360   : > { %v3041_v47 = vpop.f32.mrf.mxu0  ;;  %914 = vmax.xlane.f32.xlu1 %v913_v46  ;;  %v3035_v50 = vpop.f32.mrf.mxu1 }
 0x361   : > { %v904_v29 = vadd.f32 %v900_v20, %v894_v45  ;;  %v906_v62 = vadd.f32 %v900_v20, %v896_v51 }
 0x362   : > { %v788_v52 = vpop.f32.mrf.mxu1  ;;  %v838_v53 = vpop.f32.mrf.mxu0 }
 0x363   : > { %v895_v54 = vmul.f32 0.35355338, %v788_v52  ;;  %v897_v55 = vmul.f32 0.35355338, %v838_v53  ;;  %v916_v38 = vsel %vm425_vm0, %v904_v29, -inf  ;;  %v922_v2 = vsel %vm425_vm0, %v906_v62, -inf }
 0x364   : > { %v3042_v56 = vpop.f32.mrf.mxu0  ;;  %917 = vmax.xlane.f32.xlu0 %v916_v38  ;;  %v3036_v39 = vpop.f32.mrf.mxu1 }
 0x365   : > { %v907_v57 = vadd.f32 %v901_v40, %v897_v55  ;;  %v3673_v48 = vadd.f32 %v901_v40, %v895_v54 }
 0x366   : > { %v885_v58 = vpop.f32.mrf.mxu1 }
 0x367   : > { %v898_v59 = vmul.f32 0.35355338, %v885_v58  ;;  %v925_v60 = vsel %vm425_vm0, %v907_v57, -inf  ;;  %v919_v61 = vsel %vm425_vm0, %v3673_v48, -inf }
 0x368   : > { %926 = vmax.xlane.f32.xlu1 %v925_v60  ;;  %920 = vmax.xlane.f32.xlu0 %v919_v61  ;;  %v3047_v63 = vpop.f32.mrf.mxu1 }
 0x369   : > { %v908_v3 = vadd.f32 %v900_v20, %v898_v59 }
 0x36a   : > { %v888_v0 = vpop.f32.mrf.mxu1 }
 0x36b   : > { %v899_v1 = vmul.f32 0.35355338, %v888_v0  ;;  %v928_v6 = vsel %vm425_vm0, %v908_v3, -inf }
 0x36c   : > { %923 = vmax.xlane.f32.xlu0 %v922_v2  ;;  %v3048_v4 = vpop.f32.mrf.mxu1 }
 0x36d   : > { %v3679_v5 = vadd.f32 %v901_v40, %v899_v1 }
 0x36f   : > { %v931_v7 = vsel %vm425_vm0, %v3679_v5, -inf }
 0x370   : > { %929 = vmax.xlane.f32.xlu0 %v928_v6  ;;  %932 = vmax.xlane.f32.xlu1 %v931_v7 }
 0x3e5   : > { %v912_v9 = vpop.xlane.xlu0 %911 }
 0x3e6   : > { %v934_v10 = vsub.f32 %v902_v36, %v912_v9 }
 0x3e8   : > { %v942_v12 = vmul.f32 1.442695, %v934_v10 }
 0x3e9   : > { %v915_v13 = vpop.xlane.xlu1 %914 }
 0x3ea   : > { %3350 = vpow2.f32 %v942_v12  ;;  %v935_v14 = vsub.f32 %v903_v42, %v915_v13 }
 0x3ec   : > { %v944_v15 = vmul.f32 1.442695, %v935_v14 }
 0x3ed   : > { %v918_v16 = vpop.xlane.xlu0 %917 }
 0x3ee   : > { %3352 = vpow2.f32 %v944_v15  ;;  %v936_v24 = vsub.f32 %v904_v29, %v918_v16 }
 0x3f0   : > { %v946_v31 = vmul.f32 1.442695, %v936_v24 }
 0x3f1   : > { %v927_v17 = vpop.xlane.xlu1 %926  ;;  %v921_v19 = vpop.xlane.xlu0 %920 }
 0x3f2   : > { %v939_v23 = vsub.f32 %v907_v57, %v927_v17  ;;  %v937_v42 = vsub.f32 %v3673_v48, %v921_v19 }
 0x3f4   : > { %v952_v25 = vmul.f32 1.442695, %v939_v23  ;;  %v948_v44 = vmul.f32 1.442695, %v937_v42 }
 0x3f5   : > { %v924_v26 = vpop.xlane.xlu0 %923 }
 0x3f6   : > { %3354 = vpow2.f32 %v952_v25  ;;  %v938_v27 = vsub.f32 %v906_v62, %v924_v26 }
 0x3f7   : > { %v3684_v30 = vpop.eup %3350 }
 0x3f8   : > { %v950_v32 = vmul.f32 1.442695, %v938_v27  ;;  %v958_v33 = vsel %vm425_vm0, %v3684_v30, 0.0 }
 0x3f9   : > { %959 = vadd.xlane.f32.xlu0 %v958_v33  ;;  %v930_v21 = vpop.xlane.xlu0 %929  ;;  %v933_v51 = vpop.xlane.xlu1 %932 }
 0x3fa   : > { %3356 = vpow2.f32 %v950_v32  ;;  %v940_v43 = vsub.f32 %v908_v3, %v930_v21  ;;  %v941_v52 = vsub.f32 %v3679_v5, %v933_v51 }
 0x3fb   : > { %v3353_v20 = vpop.eup %3352  ;;  %3358 = vpow2.f32 %v946_v31 }
 0x3fc   : > { %v961_v34 = vsel %vm425_vm0, %v3353_v20, 0.0  ;;  %v954_v45 = vmul.f32 1.442695, %v940_v43  ;;  %3360 = vpow2.f32 %v948_v44  ;;  %v956_v53 = vmul.f32 1.442695, %v941_v52  ;;  %v2888_v52 = vld [vmem:[%s4224_s7 + $0x10] sm:$0xff] }
 0x3fd   : > { %962 = vadd.xlane.f32.xlu1 %v961_v34 }
 0x3fe   : > { %3362 = vpow2.f32 %v954_v45 }
 0x3ff   : > { %3364 = vpow2.f32 %v956_v53 }
 0x403   : > { %v3689_v35 = vpop.eup %3354 }
 0x404   : > { %v973_v36 = vsel %vm425_vm0, %v3689_v35, 0.0 }
 0x405   : > { %974 = vadd.xlane.f32.xlu1 %v973_v36 }
 0x407   : > { %v3693_v37 = vpop.eup %3356 }
 0x408   : > { %v970_v40 = vsel %vm425_vm0, %v3693_v37, 0.0  ;;  %v3697_v28 = vpop.eup %3358 }
 0x409   : > { %971 = vadd.xlane.f32.xlu0 %v970_v40  ;;  %v964_v41 = vsel %vm425_vm0, %v3697_v28, 0.0  ;;  %v3706_v46 = vpop.eup %3360 }
 0x40a   : > { %v967_v29 = vsel %vm425_vm0, %v3706_v46, 0.0 }
 0x40b   : > { %v3708_v47 = vpop.eup %3362 }
 0x40c   : > { %v976_v50 = vsel %vm425_vm0, %v3708_v47, 0.0  ;;  %v3720_v54 = vpop.eup %3364 }
 0x40d   : > { %965 = vadd.xlane.f32.xlu0 %v964_v41  ;;  %v979_v55 = vsel %vm425_vm0, %v3720_v54, 0.0 }
 0x416   : > { %1049 = vrot.lane.b32.xlu1 %v3628_v8, %s3449_s25 }
 0x41a   : > { %1096 = vrot.lane.b32.xlu1 %v3634_v18, %s3449_s25 }
 0x41e   : > { %1143 = vrot.lane.b32.xlu1 %v3637_v22, %s3449_s25 }
 0x423   : > { %1002 = vrot.lane.b32.xlu0 %v3630_v11, %s3449_s25 }
 0x442   : > { %977 = vadd.xlane.f32.xlu0 %v976_v50  ;;  %968 = vadd.xlane.f32.xlu1 %v967_v29 }
 0x453   : > { %1248 = vrot.lane.b32.xlu1 %v3628_v8, %s3450_s27 }
 0x458   : > { %1197 = vrot.lane.b32.xlu0 %v3630_v11, %s3450_s27 }
 0x45c   : > { %1195 = vrot.lane.b32.xlu0 %v3630_v11, %s3451_s28 }
 0x460   : > { %1246 = vrot.lane.b32.xlu0 %v3628_v8, %s3451_s28 }
 0x464   : > { %1297 = vrot.lane.b32.xlu0 %v3634_v18, %s3451_s28 }
 0x477   : > { %980 = vadd.xlane.f32.xlu1 %v979_v55 }
 0x482   : > { %v960_v56 = vpop.xlane.xlu0 %959 }
 0x486   : > { %v963_v38 = vpop.xlane.xlu1 %962 }
 0x487   : > { %3366 = vrcp.f32 %v963_v38 }
 0x488   : > { %1299 = vrot.lane.b32.xlu1 %v3634_v18, %s3450_s27  ;;  %3368 = vrcp.f32 %v960_v56  ;;  %v2889_v56 = vld [vmem:[%s4224_s7 + $0x18] sm:$0xff] }
 0x48c   : > { %1350 = vrot.lane.b32.xlu1 %v3637_v22, %s3450_s27 }
 0x48e   : > { %v975_v39 = vpop.xlane.xlu1 %974 }
 0x48f   : > { %3370 = vrcp.f32 %v975_v39 }
 0x490   : > { %1348 = vrot.lane.b32.xlu1 %v3637_v22, %s3451_s28 }
 0x492   : > { %v972_v57 = vpop.xlane.xlu0 %971  ;;  %v1050_v48 = vpop.permute.xlu1 %1049 }
 0x493   : > { %3372 = vrcp.f32 %v972_v57  ;;  %3056 = vmatpush3.bf16.msra.mxu1 %v1050_v48 }
 0x494   : > { %3067 = vmatprep.subr.bf16.mxu1 %v3446_v49  ;;  %v3367_v58 = vpop.eup %3366 }
 0x495   : > { %v3369_v60 = vpop.eup %3368  ;;  %v991_v61 = vmul.f32 %v3367_v58, %v3353_v20 }
 0x496   : > { %v966_v59 = vpop.xlane.xlu0 %965  ;;  %v990_v63 = vmul.f32 %v3369_v60, %v3684_v30  ;;  %v1097_v2 = vpop.permute.xlu1 %1096 }
 0x497   : > { %3374 = vrcp.f32 %v966_v59 }
 0x498   : > { %v998_v0 = vpack.c.bf16 %v991_v61, %v990_v63 }
 0x49a   : > { %v1003_v62 = vpop.permute.xlu0 %1002  ;;  %v1144_v7 = vpop.permute.xlu1 %1143 }
 0x49b   : > { %3050 = vmatpush3.bf16.msra.mxu0 %v1003_v62 }
 0x49c   : > { %3061 = vmatprep.subr.bf16.mxu0 %v3446_v49  ;;  %v3371_v1 = vpop.eup %3370 }
 0x49d   : > { %v995_v5 = vmul.f32 %v3371_v1, %v3689_v35 }
 0x49e   : > { %3052 = vmatmul.mubr.msk.bf16.vlgmr.msra.gmra.mxu0 %vm425_vm0, %v998_v0 }
 0x49f   : > { %3062 = vmatpush3.bf16.msra.mxu0 %v1097_v2  ;;  %3063 = vmatprep.mubr.msk.bf16.mxu0 %vm3447_vm1, %v3446_v49 }
 0x4a0   : > { %v3373_v3 = vpop.eup %3372  ;;  %3073 = vmatprep.subr.bf16.mxu0 %v3446_v49 }
 0x4a1   : > { %v994_v4 = vmul.f32 %v3373_v3, %v3693_v37 }
 0x4a3   : > { %v1000_v6 = vpack.c.bf16 %v995_v5, %v994_v4 }
 0x4a4   : > { %v3375_v15 = vpop.eup %3374 }
 0x4a5   : > { %v992_v17 = vmul.f32 %v3375_v15, %v3697_v28 }
 0x4a6   : > { %3064 = vmatmul.mubr.msk.bf16.vlgmr.msra.gmra.mxu0 %vm425_vm0, %v1000_v6 }
 0x4a7   : > { %3075 = vmatprep.mubr.msk.bf16.mxu0 %vm3447_vm1, %v3446_v49 }
 0x4cb   : > { %v978_v9 = vpop.xlane.xlu0 %977  ;;  %v969_v10 = vpop.xlane.xlu1 %968 }
 0x4cc   : > { %3376 = vrcp.f32 %v969_v10 }
 0x4cd   : > { %3378 = vrcp.f32 %v978_v9 }
 0x4cf   : > { %v1198_v12 = vpop.permute.xlu0 %1197  ;;  %v1249_v24 = vpop.permute.xlu1 %1248 }
 0x4d0   : > { %v1203_v13 = vsel %vm694_vm2, %v1198_v12, 0  ;;  %v1254_v36 = vsel %vm694_vm2, %v1249_v24, 0 }
 0x4d1   : > { %3074 = vmatpush3.bf16.xpose.msra.mxu0 %v1203_v13 }
 0x4d2   : > { %3085 = vmatprep.subr.bf16.mxu0 %v3446_v49 }
 0x4d3   : > { %v1196_v14 = vpop.permute.xlu0 %1195 }
 0x4d7   : > { %v1247_v30 = vpop.permute.xlu0 %1246 }
 0x4d8   : > { %3076 = vmatmul.mubr.msk.bf16.vlgmr.msra.gmra.mxu0 %vm694_vm2, %v1196_v14 }
 0x4d9   : > { %3087 = vmatprep.mubr.msk.bf16.mxu0 %vm3447_vm1, %v3446_v49  ;;  %v3377_v16 = vpop.eup %3376 }
 0x4da   : > { %v993_v19 = vmul.f32 %v3377_v16, %v3706_v46  ;;  %v3379_v31 = vpop.eup %3378 }
 0x4db   : > { %v1298_v32 = vpop.permute.xlu0 %1297  ;;  %v996_v20 = vmul.f32 %v3379_v31, %v3708_v47 }
 0x4dc   : > { %v999_v23 = vpack.c.bf16 %v993_v19, %v992_v17 }
 0x4de   : > { %3058 = vmatmul.mubr.msk.bf16.vlgmr.msra.gmra.mxu1 %vm425_vm0, %v999_v23 }
 0x4df   : > { %3068 = vmatpush3.bf16.msra.mxu1 %v1144_v7  ;;  %3069 = vmatprep.mubr.msk.bf16.mxu1 %vm3447_vm1, %v3446_v49 }
 0x4e0   : > { %3079 = vmatprep.subr.bf16.mxu1 %v3446_v49 }
 0x500   : > { %v981_v25 = vpop.xlane.xlu1 %980 }
 0x501   : > { %3380 = vrcp.f32 %v981_v25 }
 0x504   : > { %v1300_v26 = vpop.permute.xlu1 %1299 }
 0x505   : > { %v1305_v27 = vsel %vm694_vm2, %v1300_v26, 0 }
 0x506   : > { %3086 = vmatpush3.bf16.xpose.msra.mxu0 %v1305_v27 }
 0x507   : > { %3097 = vmatprep.subr.bf16.mxu0 %v3446_v49 }
 0x508   : > { %v1351_v37 = vpop.permute.xlu1 %1350 }
 0x509   : > { %v1356_v40 = vsel %vm694_vm2, %v1351_v37, 0 }
 0x50c   : > { %v1349_v28 = vpop.permute.xlu1 %1348 }
 0x50d   : > { %3088 = vmatmul.mubr.msk.bf16.vlgmr.msra.gmra.mxu0 %vm694_vm2, %v1298_v32 }
 0x50e   : > { %v3381_v33 = vpop.eup %3380  ;;  %3099 = vmatprep.mubr.msk.bf16.mxu0 %vm3447_vm1, %v3446_v49 }
 0x50f   : > { %v997_v34 = vmul.f32 %v3381_v33, %v3720_v54 }
 0x511   : > { %v1001_v35 = vpack.c.bf16 %v997_v34, %v996_v20 }
 0x513   : > { %3070 = vmatmul.mubr.msk.bf16.vlgmr.msra.gmra.mxu1 %vm425_vm0, %v1001_v35 }
 0x514   : > { %3080 = vmatpush3.bf16.xpose.msra.mxu1 %v1254_v36  ;;  %3081 = vmatprep.mubr.msk.bf16.mxu1 %vm3447_vm1, %v3446_v49 }
 0x515   : > { %3091 = vmatprep.subr.bf16.mxu1 %v3446_v49 }
 0x51b   : > { %3082 = vmatmul.mubr.msk.bf16.vlgmr.msra.gmra.mxu1 %vm694_vm2, %v1247_v30 }
 0x51c   : > { %3092 = vmatpush3.bf16.xpose.msra.mxu1 %v1356_v40  ;;  %3093 = vmatprep.mubr.msk.bf16.mxu1 %vm3447_vm1, %v3446_v49 }
 0x51d   : > { %3103 = vmatprep.subr.bf16.mxu1 %v3446_v49 }
 0x523   : > { %3094 = vmatmul.mubr.msk.bf16.vlgmr.msra.gmra.mxu1 %vm694_vm2, %v1349_v28 }
 0x524   : > { %3105 = vmatprep.mubr.msk.bf16.mxu1 %vm3447_vm1, %v3446_v49 }
 0x55e   : > { %v3770_v41 = vpop.f32.mrf.mxu0 }
 0x560   : > { %v3053_v21 = vpop.f32.mrf.mxu0 }
 0x562   : > { %v3772_v42 = vpop.f32.mrf.mxu0 }
 0x563   : > { %v1190_v43 = vpack.c.bf16 %v3772_v42, %v3770_v41 }
 0x564   : > { %v3054_v44 = vpop.f32.mrf.mxu0 }
 0x566   : > { %v3776_v45 = vpop.f32.mrf.mxu0 }
 0x568   : > { %v3065_v46 = vpop.f32.mrf.mxu0 }
 0x56a   : > { %v3778_v47 = vpop.f32.mrf.mxu0 }
 0x56b   : > { %v1192_v50 = vpack.c.bf16 %v3778_v47, %v3776_v45 }
 0x56c   : > { %v3066_v29 = vpop.f32.mrf.mxu0 }
 0x598   : > { %v1239_v51 = vpop.f32.mrf.mxu0 }
 0x599   : > { %v1399_v53 = vmul.f32 0.35355338, %v1239_v51 }
 0x59a   : > { %v3077_v54 = vpop.f32.mrf.mxu0 }
 0x59b   : > { %v1410_v55 = vadd.f32 %v2888_v52, %v1399_v53 }
 0x59c   : > { %v1242_v38 = vpop.f32.mrf.mxu0 }
 0x59d   : > { %v1400_v39 = vmul.f32 0.35355338, %v1242_v38  ;;  %v1418_v57 = vsel %vm425_vm0, %v1410_v55, -inf }
 0x59e   : > { %1419 = vmax.xlane.f32.xlu0 %v1418_v57  ;;  %v3078_v48 = vpop.f32.mrf.mxu0  ;;  %v3789_v58 = vpop.f32.mrf.mxu1 }
 0x59f   : > { %v1411_v59 = vadd.f32 %v2889_v56, %v1400_v39 }
 0x5a0   : > { %v3059_v60 = vpop.f32.mrf.mxu1 }
 0x5a1   : > { %v1421_v61 = vsel %vm425_vm0, %v1411_v59, -inf }
 0x5a2   : > { %1422 = vmax.xlane.f32.xlu1 %v1421_v61  ;;  %v3792_v62 = vpop.f32.mrf.mxu1 }
 0x5a3   : > { %v1191_v63 = vpack.c.bf16 %v3792_v62, %v3789_v58 }
 0x5a4   : > { %v3060_v0 = vpop.f32.mrf.mxu1 }
 0x5cd   : > { %v1341_v1 = vpop.f32.mrf.mxu0 }
 0x5ce   : > { %v1403_v24 = vmul.f32 0.35355338, %v1341_v1 }
 0x5cf   : > { %v3089_v2 = vpop.f32.mrf.mxu0 }
 0x5d0   : > { %v1414_v20 = vadd.f32 %v2888_v52, %v1403_v24 }
 0x5d1   : > { %v1344_v3 = vpop.f32.mrf.mxu0 }
 0x5d2   : > { %v1404_v4 = vmul.f32 0.35355338, %v1344_v3  ;;  %v1430_v37 = vsel %vm425_vm0, %v1414_v20, -inf }
 0x5d3   : > { %v3796_v5 = vpop.f32.mrf.mxu1  ;;  %v3090_v6 = vpop.f32.mrf.mxu0 }
 0x5d4   : > { %v1415_v7 = vadd.f32 %v2889_v56, %v1404_v4 }
 0x5d5   : > { %v3071_v9 = vpop.f32.mrf.mxu1 }
 0x5d6   : > { %v1433_v10 = vsel %vm425_vm0, %v1415_v7, -inf }
 0x5d7   : > { %1434 = vmax.xlane.f32.xlu1 %v1433_v10  ;;  %v3799_v12 = vpop.f32.mrf.mxu1 }
 0x5d8   : > { %v1193_v13 = vpack.c.bf16 %v3799_v12, %v3796_v5 }
 0x5d9   : > { %v3072_v14 = vpop.f32.mrf.mxu1 }
 0x5db   : > { %v1290_v15 = vpop.f32.mrf.mxu1 }
 0x5dc   : > { %v1401_v16 = vmul.f32 0.35355338, %v1290_v15 }
 0x5dd   : > { %v3083_v17 = vpop.f32.mrf.mxu1 }
 0x5de   : > { %v1412_v19 = vadd.f32 %v2888_v52, %v1401_v16 }
 0x5df   : > { %v1293_v23 = vpop.f32.mrf.mxu1 }
 0x5e0   : > { %v1402_v25 = vmul.f32 0.35355338, %v1293_v23  ;;  %v1424_v26 = vsel %vm425_vm0, %v1412_v19, -inf }
 0x5e1   : > { %1425 = vmax.xlane.f32.xlu0 %v1424_v26  ;;  %v3084_v27 = vpop.f32.mrf.mxu1 }
 0x5e2   : > { %v1413_v30 = vadd.f32 %v2889_v56, %v1402_v25 }
 0x5e3   : > { %v1392_v31 = vpop.f32.mrf.mxu1 }
 0x5e4   : > { %v1405_v32 = vmul.f32 0.35355338, %v1392_v31  ;;  %v1427_v33 = vsel %vm425_vm0, %v1413_v30, -inf }
 0x5e5   : > { %1428 = vmax.xlane.f32.xlu0 %v1427_v33  ;;  %v3095_v34 = vpop.f32.mrf.mxu1 }
 0x5e6   : > { %v1416_v40 = vadd.f32 %v2888_v52, %v1405_v32 }
 0x5e7   : > { %v1395_v35 = vpop.f32.mrf.mxu1 }
 0x5e8   : > { %v1406_v36 = vmul.f32 0.35355338, %v1395_v35  ;;  %v1436_v44 = vsel %vm425_vm0, %v1416_v40, -inf }
 0x5e9   : > { %1431 = vmax.xlane.f32.xlu0 %v1430_v37  ;;  %v3096_v28 = vpop.f32.mrf.mxu1 }
 0x5ea   : > { %v1417_v21 = vadd.f32 %v2889_v56, %v1406_v36 }
 0x5ec   : > { %v1439_v46 = vsel %vm425_vm0, %v1417_v21, -inf }
 0x5ed   : > { %1437 = vmax.xlane.f32.xlu0 %v1436_v44  ;;  %1440 = vmax.xlane.f32.xlu1 %v1439_v46 }
 0x627   : > { %v1420_v29 = vpop.xlane.xlu0 %1419 }
 0x628   : > { %v1442_v51 = vsub.f32 %v1410_v55, %v1420_v29 }
 0x62a   : > { %v1450_v53 = vmul.f32 1.442695, %v1442_v51 }
 0x62b   : > { %v1423_v54 = vpop.xlane.xlu1 %1422 }
 0x62c   : > { %3382 = vpow2.f32 %v1450_v53  ;;  %v1443_v38 = vsub.f32 %v1411_v59, %v1423_v54 }
 0x62e   : > { %v1452_v39 = vmul.f32 1.442695, %v1443_v38 }
 0x630   : > { %3384 = vpow2.f32 %v1452_v39 }
 0x639   : > { %v3808_v57 = vpop.eup %3382 }
 0x63a   : > { %v1466_v52 = vsel %vm425_vm0, %v3808_v57, 0.0 }
 0x63b   : > { %1467 = vadd.xlane.f32.xlu0 %v1466_v52 }
 0x63d   : > { %v3812_v56 = vpop.eup %3384 }
 0x63e   : > { %v1469_v48 = vsel %vm425_vm0, %v3812_v56, 0.0 }
 0x63f   : > { %1470 = vadd.xlane.f32.xlu1 %v1469_v48 }
 0x660   : > { %v1435_v60 = vpop.xlane.xlu1 %1434 }
 0x661   : > { %v1447_v0 = vsub.f32 %v1415_v7, %v1435_v60 }
 0x663   : > { %v1460_v3 = vmul.f32 1.442695, %v1447_v0 }
 0x66a   : > { %v1426_v55 = vpop.xlane.xlu0 %1425 }
 0x66b   : > { %v1444_v61 = vsub.f32 %v1412_v19, %v1426_v55 }
 0x66d   : > { %v1454_v1 = vmul.f32 1.442695, %v1444_v61 }
 0x66e   : > { %v1429_v59 = vpop.xlane.xlu0 %1428 }
 0x66f   : > { %3386 = vpow2.f32 %v1454_v1  ;;  %v1445_v2 = vsub.f32 %v1413_v30, %v1429_v59  ;;  %v1194_v59 = vld [vmem:[%s4222_s5] sm:$0xf] }
 0x671   : > { %v1456_v4 = vmul.f32 1.442695, %v1445_v2 }
 0x672   : > { %v1432_v6 = vpop.xlane.xlu0 %1431 }
 0x673   : > { %3388 = vpow2.f32 %v1456_v4  ;;  %v1446_v9 = vsub.f32 %v1414_v20, %v1432_v6 }
 0x674   : > { %3390 = vpow2.f32 %v1460_v3 }
 0x675   : > { %v1458_v10 = vmul.f32 1.442695, %v1446_v9 }
 0x676   : > { %v1438_v14 = vpop.xlane.xlu0 %1437  ;;  %v1441_v32 = vpop.xlane.xlu1 %1440 }
 0x677   : > { %3392 = vpow2.f32 %v1458_v10  ;;  %v1448_v15 = vsub.f32 %v1416_v40, %v1438_v14  ;;  %v1449_v33 = vsub.f32 %v1417_v21, %v1441_v32  ;;  %v1797_v14 = vsel %vm1715_vm3, %v1194_v59, 0 }
 0x679   : > { %v1462_v16 = vmul.f32 1.442695, %v1448_v15  ;;  %v1464_v20 = vmul.f32 1.442695, %v1449_v33  ;;  %v1702_v15 = vld [vmem:[%s4222_s5 + $0x4] sm:$0xf] }
 0x67a   : > { %v2902_v33 = vld [vmem:[%s4223_s6] ss:$0 sm:$0xff] }
 0x67b   : > { %3394 = vpow2.f32 %v1462_v16  ;;  %v1717_v16 = vsel %vm1715_vm3, %v1702_v15, 0 }
 0x67c   : > { %v3387_v17 = vpop.eup %3386  ;;  %3396 = vpow2.f32 %v1464_v20 }
 0x67d   : > { %v1472_v19 = vsel %vm425_vm0, %v3387_v17, 0.0 }
 0x67e   : > { %1473 = vadd.xlane.f32.xlu0 %v1472_v19 }
 0x680   : > { %v3389_v7 = vpop.eup %3388 }
 0x681   : > { %v1475_v23 = vsel %vm425_vm0, %v3389_v7, 0.0  ;;  %v3391_v24 = vpop.eup %3390 }
 0x682   : > { %1476 = vadd.xlane.f32.xlu1 %v1475_v23  ;;  %v1481_v27 = vsel %vm425_vm0, %v3391_v24, 0.0 }
 0x684   : > { %v3393_v25 = vpop.eup %3392 }
 0x685   : > { %v1478_v26 = vsel %vm425_vm0, %v3393_v25, 0.0 }
 0x686   : > { %1479 = vadd.xlane.f32.xlu0 %v1478_v26  ;;  %1482 = vadd.xlane.f32.xlu1 %v1481_v27 }
 0x688   : > { %v3820_v30 = vpop.eup %3394 }
 0x689   : > { %v1484_v31 = vsel %vm425_vm0, %v3820_v30, 0.0  ;;  %v3397_v34 = vpop.eup %3396 }
 0x68a   : > { %1485 = vadd.xlane.f32.xlu0 %v1484_v31  ;;  %v1487_v35 = vsel %vm425_vm0, %v3397_v34, 0.0 }
 0x697   : > { %1557 = vrot.lane.b32.xlu1 %v3628_v8, %s3452_s15 }
 0x69b   : > { %1604 = vrot.lane.b32.xlu1 %v3634_v18, %s3452_s15 }
 0x6a0   : > { %1510 = vrot.lane.b32.xlu0 %v3630_v11, %s3452_s15 }
 0x6bf   : > { %1488 = vadd.xlane.f32.xlu1 %v1487_v35 }
 0x6c4   : > { %v1468_v37 = vpop.xlane.xlu0 %1467 }
 0x6c8   : > { %v1471_v36 = vpop.xlane.xlu1 %1470 }
 0x6c9   : > { %3398 = vrcp.f32 %v1471_v36 }
 0x6ca   : > { %3400 = vrcp.f32 %v1468_v37 }
 0x6d0   : > { %1651 = vrot.lane.b32.xlu1 %v3637_v22, %s3452_s15 }
 0x6d6   : > { %v3399_v28 = vpop.eup %3398 }
 0x6d7   : > { %v3401_v46 = vpop.eup %3400  ;;  %v1499_v29 = vmul.f32 %v3399_v28, %v3812_v56 }
 0x6d8   : > { %v1498_v53 = vmul.f32 %v3401_v46, %v3808_v57 }
 0x6da   : > { %v1506_v38 = vpack.c.bf16 %v1499_v29, %v1498_v53  ;;  %v3430_v53 = vld [vmem:[%s3536_s26] sm:$0xff] }
 0x707   : > { %v1474_v40 = vpop.xlane.xlu0 %1473 }
 0x708   : > { %3402 = vrcp.f32 %v1474_v40 }
 0x70b   : > { %v1477_v8 = vpop.xlane.xlu1 %1476 }
 0x70c   : > { %3404 = vrcp.f32 %v1477_v8 }
 0x70f   : > { %v1480_v18 = vpop.xlane.xlu0 %1479  ;;  %v1483_v11 = vpop.xlane.xlu1 %1482 }
 0x710   : > { %3406 = vrcp.f32 %v1480_v18 }
 0x711   : > { %3408 = vrcp.f32 %v1483_v11 }
 0x713   : > { %v1486_v21 = vpop.xlane.xlu0 %1485  ;;  %v1558_v44 = vpop.permute.xlu1 %1557 }
 0x714   : > { %3104 = vmatpush3.bf16.msra.mxu1 %v1558_v44  ;;  %3410 = vrcp.f32 %v1486_v21 }
 0x715   : > { %3115 = vmatprep.subr.bf16.mxu1 %v3446_v49  ;;  %v3403_v22 = vpop.eup %3402 }
 0x716   : > { %v1500_v39 = vmul.f32 %v3403_v22, %v3387_v17 }
 0x717   : > { %v1511_v51 = vpop.permute.xlu0 %1510  ;;  %v1605_v48 = vpop.permute.xlu1 %1604 }
 0x718   : > { %3098 = vmatpush3.bf16.msra.mxu0 %v1511_v51 }
 0x719   : > { %v3405_v54 = vpop.eup %3404  ;;  %3109 = vmatprep.subr.bf16.mxu0 %v3446_v49 }
 0x71a   : > { %v1501_v52 = vmul.f32 %v3405_v54, %v3389_v7 }
 0x71b   : > { %3100 = vmatmul.mubr.msk.bf16.vlgmr.msra.gmra.mxu0 %vm425_vm0, %v1506_v38 }
 0x71c   : > { %3110 = vmatpush3.bf16.msra.mxu0 %v1605_v48  ;;  %v1507_v60 = vpack.c.bf16 %v1501_v52, %v1500_v39  ;;  %3111 = vmatprep.mubr.msk.bf16.mxu0 %vm3447_vm1, %v3446_v49 }
 0x71d   : > { %v3407_v56 = vpop.eup %3406  ;;  %3185 = vmatprep.subr.msk.bf16.mxu0 %vm1715_vm3, %v1702_v15 }
 0x71e   : > { %v3409_v55 = vpop.eup %3408  ;;  %3106 = vmatmul.mubr.msk.bf16.vlgmr.msra.gmra.mxu1 %vm425_vm0, %v1507_v60  ;;  %v1502_v57 = vmul.f32 %v3407_v56, %v3393_v25  ;;  %v3431_v60 = vld [vmem:[%s3536_s26 + $0x8] sm:$0xff] }
 0x71f   : > { %v1503_v61 = vmul.f32 %v3409_v55, %v3391_v24  ;;  %3117 = vmatprep.mubr.msk.bf16.mxu1 %vm3447_vm1, %v3446_v49 }
 0x721   : > { %v1508_v0 = vpack.c.bf16 %v1503_v61, %v1502_v57  ;;  %v3411_v3 = vpop.eup %3410 }
 0x722   : > { %v1504_v6 = vmul.f32 %v3411_v3, %v3820_v30 }
 0x723   : > { %3112 = vmatmul.mubr.msk.bf16.vlgmr.msra.gmra.mxu0 %vm425_vm0, %v1508_v0 }
 0x724   : > { %3122 = vmatpush3.bf16.msra.mxu0 %v1717_v16 }
 0x748   : > { %v1489_v1 = vpop.xlane.xlu1 %1488 }
 0x749   : > { %3412 = vrcp.f32 %v1489_v1  ;;  %v3432_v1 = vld [vmem:[%s3536_s26 + $0x10] sm:$0xff] }
 0x74c   : > { %v1652_v2 = vpop.permute.xlu1 %1651 }
 0x74d   : > { %3116 = vmatpush3.bf16.msra.mxu1 %v1652_v2 }
 0x74e   : > { %3186 = vmatprep.subr.msk.bf16.mxu1 %vm1715_vm3, %v1194_v59 }
 0x756   : > { %v3413_v4 = vpop.eup %3412 }
 0x757   : > { %v1505_v9 = vmul.f32 %v3413_v4, %v3397_v34  ;;  %v3433_v4 = vld [vmem:[%s3536_s26 + $0x18] sm:$0xff] }
 0x759   : > { %v1509_v10 = vpack.c.bf16 %v1505_v9, %v1504_v6 }
 0x75b   : > { %3118 = vmatmul.mubr.msk.bf16.vlgmr.msra.gmra.mxu1 %vm425_vm0, %v1509_v10 }
 0x75c   : > { %3133 = vmatprep.mubr.msk.bf16.mxu1 %vm694_vm2, %v1190_v43  ;;  %3132 = vmatpush3.bf16.msra.mxu1 %v1797_v14 }
 0x763   : > { %3134 = vmatmul.mubr.msk.bf16.vlgmr.msra.gmra.mxu1 %vm694_vm2, %v1191_v63 }
 0x764   : > { %3137 = vmatprep.mubr.msk.bf16.mxu1 %vm694_vm2, %v1192_v50 }
 0x76b   : > { %3138 = vmatmul.mubr.msk.bf16.gmra.mxu1 %vm694_vm2, %v1193_v13 }
 0x7db   : > { %v1550_v41 = vpop.f32.mrf.mxu0 }
 0x7dd   : > { %v3101_v42 = vpop.f32.mrf.mxu0 }
 0x7de   : > { %v1597_v43 = vpop.f32.mrf.mxu1 }
 0x7df   : > { %v1553_v17 = vpop.f32.mrf.mxu0 }
 0x7e0   : > { %v1698_v58 = vpack.c.bf16 %v1553_v17, %v1550_v41  ;;  %v3107_v62 = vpop.f32.mrf.mxu1 }
 0x7e1   : > { %v3102_v63 = vpop.f32.mrf.mxu0 }
 0x7e2   : > { %v1600_v19 = vpop.f32.mrf.mxu1  ;;  %3123 = vmatprep.mubr.msk.bf16.mxu0 %vm694_vm2, %v1698_v58 }
 0x7e3   : > { %v1699_v7 = vpack.c.bf16 %v1600_v19, %v1597_v43  ;;  %v1644_v45 = vpop.f32.mrf.mxu0 }
 0x7e4   : > { %v3108_v47 = vpop.f32.mrf.mxu1 }
 0x7e5   : > { %v3113_v50 = vpop.f32.mrf.mxu0  ;;  %3124 = vmatmul.mubr.msk.bf16.vlgmr.msra.gmra.mxu0 %vm694_vm2, %v1699_v7 }
 0x7e7   : > { %v1647_v23 = vpop.f32.mrf.mxu0 }
 0x7e8   : > { %v1700_v5 = vpack.c.bf16 %v1647_v23, %v1644_v45 }
 0x7e9   : > { %v3114_v12 = vpop.f32.mrf.mxu0 }
 0x7ea   : > { %3127 = vmatprep.mubr.msk.bf16.mxu0 %vm694_vm2, %v1700_v5 }
 0x81b   : > { %v1691_v13 = vpop.f32.mrf.mxu1 }
 0x81d   : > { %v3119_v24 = vpop.f32.mrf.mxu1 }
 0x81f   : > { %v1694_v25 = vpop.f32.mrf.mxu1 }
 0x820   : > { %v1701_v26 = vpack.c.bf16 %v1694_v25, %v1691_v13  ;;  %v3434_v13 = vld [vmem:[%s3536_s26 + $0x20] sm:$0xff] }
 0x821   : > { %v3120_v27 = vpop.f32.mrf.mxu1 }
 0x822   : > { %3128 = vmatmul.mubr.msk.bf16.gmra.mxu0 %vm694_vm2, %v1701_v26 }
 0x823   : > { %v3135_v30 = vpop.f32.mrf.mxu1 }
 0x825   : > { %v1833_v31 = vpop.f32.mrf.mxu1 }
 0x827   : > { %v3136_v34 = vpop.f32.mrf.mxu1 }
 0x829   : > { %v1836_v28 = vpop.f32.mrf.mxu1 }
 0x82b   : > { %v3139_v10 = vpop.f32.mrf.mxu1 }
 0x82d   : > { %v1849_v14 = vpop.f32.mrf.mxu1 }
 0x82f   : > { %v3140_v41 = vpop.f32.mrf.mxu1 }
 0x831   : > { %v1852_v7 = vpop.f32.mrf.mxu1 }
 0x8a5   : > { %v3125_v32 = vpop.f32.mrf.mxu0 }
 0x8a6   : > { %v1842_v20 = vadd.f32 %v3135_v30, %v3125_v32 }
 0x8a7   : > { %v1753_v35 = vpop.f32.mrf.mxu0 }
 0x8a8   : > { %v1873_v36 = vadd.f32 %v2902_v33, %v1842_v20  ;;  %v1834_v37 = vadd.f32 %v1833_v31, %v1753_v35  ;;  %v3435_v31 = vld [vmem:[%s3536_s26 + $0x28] sm:$0xff] }
 0x8a9   : > { %v3126_v40 = vpop.f32.mrf.mxu0 }
 0x8aa   : > { %v1889_v8 = vcombine.low %v1873_v36, %v1873_v36  ;;  %v1871_v18 = vadd.f32 %v2902_v33, %v1834_v37  ;;  %v1845_v11 = vadd.f32 %v3136_v34, %v3126_v40  ;;  %v2903_v21 = vcombine.high %v1873_v36, %v1873_v36  ;;  %v3436_v37 = vld [vmem:[%s3536_s26 + $0x30] sm:$0xff] }
 0x8ab   : > { %v1756_v44 = vpop.f32.mrf.mxu0 }
 0x8ac   : > { %v1881_v46 = vcombine.high %v1871_v18, %v1871_v18  ;;  %v1874_v29 = vadd.f32 %v2902_v33, %v1845_v11  ;;  %v1837_v22 = vadd.f32 %v1836_v28, %v1756_v44  ;;  %v1897_v51 = vsel %vm1715_vm3, %v1871_v18, %v1889_v8  ;;  %v3437_v18 = vld [vmem:[%s3536_s26 + $0x38] sm:$0xff] }
 0x8ad   : > { %v3877_v54 = vadd.f32 %v3430_v53, %v1897_v51 }
 0x8ae   : > { %v1891_v38 = vcombine.low %v1874_v29, %v1874_v29  ;;  %v1872_v39 = vadd.f32 %v2902_v33, %v1837_v22  ;;  %v1898_v52 = vsel %vm1715_vm3, %v1881_v46, %v2903_v21  ;;  %v2904_v55 = vcombine.high %v1874_v29, %v1874_v29 }
 0x8af   : > { %v1933_v48 = vsel %vm425_vm0, %v3877_v54, 0.0  ;;  %v3883_v56 = vadd.f32 %v3431_v60, %v1898_v52 }
 0x8b0   : > { %v1882_v57 = vcombine.high %v1872_v39, %v1872_v39  ;;  %1934 = vadd.xlane.f32.xlu0 %v1933_v48  ;;  %v1899_v61 = vsel %vm1715_vm3, %v1872_v39, %v1891_v38 }
 0x8b1   : > { %v1936_v0 = vsel %vm425_vm0, %v3883_v56, 0.0  ;;  %v3889_v59 = vadd.f32 %v3432_v1, %v1899_v61 }
 0x8b2   : > { %1937 = vadd.xlane.f32.xlu1 %v1936_v0  ;;  %v1900_v2 = vsel %vm1715_vm3, %v1882_v57, %v2904_v55 }
 0x8b3   : > { %v1939_v3 = vsel %vm425_vm0, %v3889_v59, 0.0  ;;  %v3895_v6 = vadd.f32 %v3433_v4, %v1900_v2 }
 0x8b4   : > { %1940 = vadd.xlane.f32.xlu0 %v1939_v3 }
 0x8b5   : > { %v1942_v9 = vsel %vm425_vm0, %v3895_v6, 0.0 }
 0x8b8   : > { %1943 = vadd.xlane.f32.xlu0 %v1942_v9 }
 0x8e2   : > { %v3129_v15 = vpop.f32.mrf.mxu0 }
 0x8e3   : > { %v1858_v16 = vadd.f32 %v3139_v10, %v3129_v15 }
 0x8e4   : > { %v1769_v42 = vpop.f32.mrf.mxu0 }
 0x8e5   : > { %v1877_v43 = vadd.f32 %v2902_v33, %v1858_v16  ;;  %v1850_v17 = vadd.f32 %v1849_v14, %v1769_v42 }
 0x8e6   : > { %v3130_v58 = vpop.f32.mrf.mxu0 }
 0x8e7   : > { %v1911_v62 = vcombine.low %v1877_v43, %v1877_v43  ;;  %v1875_v63 = vadd.f32 %v2902_v33, %v1850_v17  ;;  %v1861_v19 = vadd.f32 %v3140_v41, %v3130_v58  ;;  %v2905_v45 = vcombine.high %v1877_v43, %v1877_v43 }
 0x8e8   : > { %v1772_v47 = vpop.f32.mrf.mxu0 }
 0x8e9   : > { %v1903_v50 = vcombine.high %v1875_v63, %v1875_v63  ;;  %v1878_v23 = vadd.f32 %v2902_v33, %v1861_v19  ;;  %v1853_v5 = vadd.f32 %v1852_v7, %v1772_v47  ;;  %v1919_v12 = vsel %vm1715_vm3, %v1875_v63, %v1911_v62 }
 0x8ea   : > { %v3901_v24 = vadd.f32 %v3434_v13, %v1919_v12 }
 0x8eb   : > { %v1913_v25 = vcombine.low %v1878_v23, %v1878_v23  ;;  %v1876_v26 = vadd.f32 %v2902_v33, %v1853_v5  ;;  %v1920_v27 = vsel %vm1715_vm3, %v1903_v50, %v2905_v45  ;;  %v2906_v20 = vcombine.high %v1878_v23, %v1878_v23 }
 0x8ec   : > { %v1945_v30 = vsel %vm425_vm0, %v3901_v24, 0.0  ;;  %v3907_v32 = vadd.f32 %v3435_v31, %v1920_v27 }
 0x8ed   : > { %v1904_v34 = vcombine.high %v1876_v26, %v1876_v26  ;;  %1946 = vadd.xlane.f32.xlu0 %v1945_v30  ;;  %v1921_v35 = vsel %vm1715_vm3, %v1876_v26, %v1913_v25 }
 0x8ee   : > { %v1948_v36 = vsel %vm425_vm0, %v3907_v32, 0.0  ;;  %v3913_v40 = vadd.f32 %v3436_v37, %v1921_v35 }
 0x8ef   : > { %1949 = vadd.xlane.f32.xlu1 %v1948_v36  ;;  %v1922_v33 = vsel %vm1715_vm3, %v1904_v34, %v2906_v20 }
 0x8f0   : > { %v1951_v8 = vsel %vm425_vm0, %v3913_v40, 0.0  ;;  %v3919_v11 = vadd.f32 %v3437_v18, %v1922_v33 }
 0x8f1   : > { %1952 = vadd.xlane.f32.xlu0 %v1951_v8  ;;  %v3978_v8 = vld [vmem:[%s4225_s8] ss:$0 sm:$0xff] }
 0x8f2   : > { %v1954_v28 = vsel %vm425_vm0, %v3919_v11, 0.0 }
 0x8f3   : > { %1955 = vadd.xlane.f32.xlu1 %v1954_v28 }
 0x939   : > { %v1935_v21 = vpop.xlane.xlu0 %1934 }
 0x93a   : > { %v1957_v44 = vmul.f32 0.0625, %v1935_v21  ;;  %v3984_v21 = vld [vmem:[%s4226_s9] ss:$0 sm:$0xff] }
 0x93b   : > { %v1938_v46 = vpop.xlane.xlu1 %1937 }
 0x93c   : > { %v3928_v29 = vsub.f32 %v3877_v54, %v1957_v44  ;;  %v1958_v22 = vmul.f32 0.0625, %v1938_v46 }
 0x93d   : > { %v1941_v51 = vpop.xlane.xlu0 %1940 }
 0x93e   : > { %v3931_v53 = vsub.f32 %v3883_v56, %v1958_v22  ;;  %v1959_v38 = vmul.f32 0.0625, %v1941_v51  ;;  %v1973_v39 = vmul.f32 %v3928_v29, %v3928_v29 }
 0x940   : > { %v3936_v52 = vsub.f32 %v3889_v59, %v1959_v38  ;;  %v1981_v49 = vsel %vm425_vm0, %v1973_v39, 0.0  ;;  %v1974_v48 = vmul.f32 %v3931_v53, %v3931_v53 }
 0x941   : > { %1982 = vadd.xlane.f32.xlu0 %v1981_v49  ;;  %v1944_v60 = vpop.xlane.xlu0 %1943 }
 0x942   : > { %v1960_v55 = vmul.f32 0.0625, %v1944_v60  ;;  %v1984_v57 = vsel %vm425_vm0, %v1974_v48, 0.0  ;;  %v1975_v61 = vmul.f32 %v3936_v52, %v3936_v52 }
 0x943   : > { %1985 = vadd.xlane.f32.xlu1 %v1984_v57 }
 0x944   : > { %v3945_v0 = vsub.f32 %v3895_v6, %v1960_v55  ;;  %v1987_v1 = vsel %vm425_vm0, %v1975_v61, 0.0 }
 0x945   : > { %1988 = vadd.xlane.f32.xlu0 %v1987_v1  ;;  %v3325_v1 = vld [vmem:[%s4227_s10 + $0x10] sm:$0xff]  }
 0x946   : > { %v1976_v2 = vmul.f32 %v3945_v0, %v3945_v0  ;;  %3155 = vmatprep.subr.bf16.mxu1 %v3325_v1 }
 0x947   : > { %3156 = vmatpush3.bf16.msra.mxu1 %v3325_v1 }
 0x948   : > { %v1990_v3 = vsel %vm425_vm0, %v1976_v2, 0.0 }
 0x949   : > { %1991 = vadd.xlane.f32.xlu1 %v1990_v3 }
 0x976   : > { %v1947_v4 = vpop.xlane.xlu0 %1946 }
 0x977   : > { %v1961_v9 = vmul.f32 0.0625, %v1947_v4 }
 0x978   : > { %v1950_v10 = vpop.xlane.xlu1 %1949 }
 0x979   : > { %v3952_v14 = vsub.f32 %v3901_v24, %v1961_v9  ;;  %v1962_v15 = vmul.f32 0.0625, %v1950_v10 }
 0x97a   : > { %v1953_v16 = vpop.xlane.xlu0 %1952 }
 0x97b   : > { %v3955_v41 = vsub.f32 %v3907_v32, %v1962_v15  ;;  %v1963_v42 = vmul.f32 0.0625, %v1953_v16  ;;  %v1977_v43 = vmul.f32 %v3952_v14, %v3952_v14  ;;  %v3326_v16 = vld [vmem:[%s4227_s10 + $0x8] sm:$0xff]  }
 0x97c   : > { %v1956_v17 = vpop.xlane.xlu1 %1955  ;;  %3157 = vmatprep.subr.bf16.mxu1 %v3326_v16 }
 0x97d   : > { %v3960_v58 = vsub.f32 %v3913_v40, %v1963_v42  ;;  %v1964_v62 = vmul.f32 0.0625, %v1956_v17  ;;  %v1993_v63 = vsel %vm425_vm0, %v1977_v43, 0.0  ;;  %v1978_v19 = vmul.f32 %v3955_v41, %v3955_v41  ;;  %v2137_v42 = vld [vmem:[#allocation2 + $0x1] sm:$0xff]  ;;  %3158 = vmatpush3.bf16.msra.mxu1 %v3326_v16 }
 0x97e   : > { %1994 = vadd.xlane.f32.xlu0 %v1993_v63 }
 0x97f   : > { %v3966_v7 = vsub.f32 %v3919_v11, %v1964_v62  ;;  %v1996_v45 = vsel %vm425_vm0, %v1978_v19, 0.0  ;;  %v1979_v47 = vmul.f32 %v3960_v58, %v3960_v58 }
 0x980   : > { %1997 = vadd.xlane.f32.xlu1 %v1996_v45  ;;  %v3327_v45 = vld [vmem:[%s4227_s10 + $0x28] sm:$0xff]  }
 0x981   : > { %v1999_v50 = vsel %vm425_vm0, %v1979_v47, 0.0  ;;  %v1980_v23 = vmul.f32 %v3966_v7, %v3966_v7  ;;  %v3328_v47 = vld [vmem:[%s4227_s10] sm:$0xff]   ;;  %3141 = vmatprep.subr.bf16.mxu0 %v3327_v45 }
 0x982   : > { %2000 = vadd.xlane.f32.xlu0 %v1999_v50  ;;  %3159 = vmatprep.subr.bf16.mxu1 %v3328_v47 }
 0x983   : > { %v2002_v5 = vsel %vm425_vm0, %v1980_v23, 0.0  ;;  %3142 = vmatpush3.bf16.msra.mxu0 %v3327_v45  ;;  %3160 = vmatpush3.bf16.msra.mxu1 %v3328_v47 }
 0x984   : > { %2003 = vadd.xlane.f32.xlu1 %v2002_v5  ;;  %v2145_v5 = vld [vmem:[#allocation2 + $0x2] sm:$0xff] }
 0x9ca   : > { %v1983_v12 = vpop.xlane.xlu0 %1982 }
 0x9cb   : > { %v2005_v13 = vmul.f32 0.0625, %v1983_v12 }
 0x9cc   : > { %v1986_v25 = vpop.xlane.xlu1 %1985 }
 0x9cd   : > { %v2013_v26 = vadd.f32 1e-05, %v2005_v13  ;;  %v2006_v27 = vmul.f32 0.0625, %v1986_v25 }
 0x9ce   : > { %v1989_v30 = vpop.xlane.xlu0 %1988 }
 0x9cf   : > { %3414 = vrsqrt.f32 %v2013_v26  ;;  %v2014_v31 = vadd.f32 1e-05, %v2006_v27  ;;  %v2007_v20 = vmul.f32 0.0625, %v1989_v30  ;;  %v3329_v26 = vld [vmem:[%s4227_s10 + $0x20] sm:$0xff]  }
 0x9d0   : > { %3143 = vmatprep.subr.bf16.mxu0 %v3329_v26 }
 0x9d1   : > { %3416 = vrsqrt.f32 %v2014_v31  ;;  %v2015_v34 = vadd.f32 1e-05, %v2007_v20  ;;  %3144 = vmatpush3.bf16.msra.mxu0 %v3329_v26 }
 0x9d2   : > { %v1992_v35 = vpop.xlane.xlu1 %1991 }
 0x9d3   : > { %3418 = vrsqrt.f32 %v2015_v34  ;;  %v2008_v36 = vmul.f32 0.0625, %v1992_v35  ;;  %v3330_v34 = vld [vmem:[%s4227_s10 + $0x18] sm:$0xff]  }
 0x9d4   : > { %3145 = vmatprep.subr.bf16.mxu0 %v3330_v34 }
 0x9d5   : > { %v2016_v37 = vadd.f32 1e-05, %v2008_v36  ;;  %3146 = vmatpush3.bf16.msra.mxu0 %v3330_v34 }
 0x9d7   : > { %3420 = vrsqrt.f32 %v2016_v37 }
 0x9dc   : > { %v3415_v33 = vpop.eup %3414 }
 0x9dd   : > { %v2029_v18 = vmul.f32 %v3415_v33, %v3928_v29 }
 0x9de   : > { %v3417_v28 = vpop.eup %3416 }
 0x9df   : > { %v2043_v44 = vmul.f32 %v3978_v8, %v2029_v18  ;;  %v2030_v46 = vmul.f32 %v3417_v28, %v3931_v53 }
 0x9e0   : > { %v3419_v22 = vpop.eup %3418 }
 0x9e1   : > { %v2057_v51 = vadd.f32 %v3984_v21, %v2043_v44  ;;  %v2044_v38 = vmul.f32 %v3978_v8, %v2030_v46  ;;  %v2031_v39 = vmul.f32 %v3419_v22, %v3936_v52 }
 0x9e3   : > { %v2073_v49 = vrot.slane %v2057_v51, 7  ;;  %v2058_v29 = vadd.f32 %v3984_v21, %v2044_v38  ;;  %v2045_v48 = vmul.f32 %v3978_v8, %v2031_v39 }
 0x9e4   : > { %v3421_v60 = vpop.eup %3420 }
 0x9e5   : > { %v2090_v55 = vsel %vm2089_vm5, 0.0, %v2073_v49  ;;  %v2098_v57 = vsel %vm2089_vm5, %v2073_v49, 0.0  ;;  %v2074_v61 = vrot.slane %v2058_v29, 7  ;;  %v2059_v53 = vadd.f32 %v3984_v21, %v2045_v48 }
 0x9e6   : > { %2107 = vst.msk [vmem:[#allocation2 + $0x10] sm:$0xff] %vm425_vm0, %v2090_v55  ;;  %v2032_v52 = vmul.f32 %v3421_v60, %v3945_v0 }
 0x9e7   : > { %2109 = vst.msk [vmem:[#allocation2 + $0x18] sm:$0x3] %vm2108_vm4, %v2098_v57  ;;  %v2091_v2 = vsel %vm2089_vm5, 0.0, %v2074_v61  ;;  %v2099_v3 = vsel %vm2089_vm5, %v2074_v61, 0.0  ;;  %v2075_v4 = vrot.slane %v2059_v53, 7 }
 0x9e8   : > { %2110 = vst.msk [vmem:[#allocation2 + $0x20] sm:$0xff] %vm425_vm0, %v2091_v2  ;;  %v2046_v9 = vmul.f32 %v3978_v8, %v2032_v52 }
 0x9e9   : > { %2111 = vst.msk [vmem:[#allocation2 + $0x28] sm:$0x3] %vm2108_vm4, %v2099_v3  ;;  %v2092_v10 = vsel %vm2089_vm5, 0.0, %v2075_v4  ;;  %v2100_v15 = vsel %vm2089_vm5, %v2075_v4, 0.0 }
 0x9ea   : > { %2112 = vst.msk [vmem:[#allocation2 + $0x30] sm:$0xff] %vm425_vm0, %v2092_v10  ;;  %v2060_v0 = vadd.f32 %v3984_v21, %v2046_v9 }
 0x9eb   : > { %2113 = vst.msk [vmem:[#allocation2 + $0x38] sm:$0x3] %vm2108_vm4, %v2100_v15 }
 0x9ec   : > { %v2076_v43 = vrot.slane %v2060_v0, 7 }
 0x9ee   : > { %v2138_v17 = vld [vmem:[#allocation2 + $0x11] sm:$0xff]  ;;  %v2093_v62 = vsel %vm2089_vm5, 0.0, %v2076_v43  ;;  %v2101_v63 = vsel %vm2089_vm5, %v2076_v43, 0.0 }
 0x9ef   : > { %v3204_v19 = vpack.i.bf16 %v2138_v17, %v2137_v42  ;;  %2114 = vst.msk [vmem:[#allocation2 + $0x40] sm:$0xff] %vm425_vm0, %v2093_v62  ;;  %v2260_v50 = vld [vmem:[#allocation2 + $0x12] sm:$0xff] }
 0x9f0   : > { %2115 = vst.msk [vmem:[#allocation2 + $0x48] sm:$0x3] %vm2108_vm4, %v2101_v63  ;;  %v2261_v23 = vld [vmem:[#allocation2 + $0x22] sm:$0xff]  ;;  %v3209_v25 = vpack.i.bf16 %v2260_v50, %v2145_v5 }
 0x9f1   : > { %3205 = vrot.lane.b32.xlu0 %v3204_v19, %s3453_s19  ;;  %v3219_v12 = vpack.i.bf16 %v2261_v23, %v2260_v50  ;;  %v2139_v27 = vld [vmem:[#allocation2 + $0x21] sm:$0xff] }
 0x9f2   : > { %v2140_v13 = vld [vmem:[#allocation2 + $0x31] sm:$0xff]  ;;  %v3214_v20 = vpack.i.bf16 %v2139_v27, %v2138_v17 }
 0x9f3   : > { %3220 = vrot.lane.b32.xlu1 %v3219_v12, %s3454_s20  ;;  %v3224_v30 = vpack.i.bf16 %v2140_v13, %v2139_v27  ;;  %v2148_v31 = vld [vmem:[#allocation2 + $0x32] sm:$0xff]  ;;  %v4079_v12 = vld [vmem:[%s4227_s10 + $0x40] sm:$0xff]  }
 0x9f4   : > { %v3229_v35 = vpack.i.bf16 %v2148_v31, %v2261_v23  ;;  %3169 = vmatprep.subr.bf16.mxu0 %v4079_v12 }
 0x9f5   : > { %3210 = vrot.lane.b32.xlu0 %v3209_v25, %s3454_s20 }
 0x9f7   : > { %3225 = vrot.lane.b32.xlu1 %v3224_v30, %s3453_s19  ;;  %v4036_v36 = vld [vmem:[#allocation2 + $0x41] sm:$0xff] }
 0x9f8   : > { %v3244_v37 = vpack.i.bf16 %v4036_v36, %v2140_v13  ;;  %v4041_v33 = vld [vmem:[#allocation2 + $0x42] sm:$0xff] }
 0x9f9   : > { %3215 = vrot.lane.b32.xlu0 %v3214_v20, %s3453_s19  ;;  %v3249_v18 = vpack.i.bf16 %v4041_v33, %v2148_v31 }
 0x9fb   : > { %3230 = vrot.lane.b32.xlu1 %v3229_v35, %s3454_s20 }
 0x9fd   : > { %3235 = vrot.lane.b32.xlu0 %v3224_v30, %s3453_s19 }
 0x9ff   : > { %3245 = vrot.lane.b32.xlu1 %v3244_v37, %s3453_s19 }
 0xa01   : > { %3240 = vrot.lane.b32.xlu0 %v3229_v35, %s3454_s20 }
 0xa03   : > { %3250 = vrot.lane.b32.xlu1 %v3249_v18, %s3454_s20 }
 0xa07   : > { %v1995_v28 = vpop.xlane.xlu0 %1994 }
 0xa08   : > { %v2009_v44 = vmul.f32 0.0625, %v1995_v28 }
 0xa09   : > { %v1998_v46 = vpop.xlane.xlu1 %1997 }
 0xa0a   : > { %v2017_v22 = vadd.f32 1e-05, %v2009_v44  ;;  %v2010_v51 = vmul.f32 0.0625, %v1998_v46  ;;  %v2566_v44 = vld [vmem:[#allocation2 + $0x91] sm:$0xff] }
 0xa0b   : > { %v2001_v38 = vpop.xlane.xlu0 %2000 }
 0xa0c   : > { %3422 = vrsqrt.f32 %v2017_v22  ;;  %v2018_v39 = vadd.f32 1e-05, %v2010_v51  ;;  %v2011_v49 = vmul.f32 0.0625, %v2001_v38  ;;  %v2574_v22 = vld [vmem:[#allocation2 + $0x92] sm:$0xff] }
 0xa0d   : > { %v2004_v29 = vpop.xlane.xlu1 %2003 }
 0xa0e   : > { %3424 = vrsqrt.f32 %v2018_v39  ;;  %v2019_v48 = vadd.f32 1e-05, %v2011_v49  ;;  %v2012_v60 = vmul.f32 0.0625, %v2004_v29 }
 0xa10   : > { %3426 = vrsqrt.f32 %v2019_v48  ;;  %v2020_v55 = vadd.f32 1e-05, %v2012_v60  ;;  %v2129_v48 = vld [vmem:[#allocation2] sm:$0xff] }
 0xa12   : > { %3428 = vrsqrt.f32 %v2020_v55  ;;  %v2130_v55 = vld [vmem:[#allocation2 + $0x10] sm:$0xff] }
 0xa19   : > { %v3423_v57 = vpop.eup %3422 }
 0xa1a   : > { %v2033_v61 = vmul.f32 %v3423_v57, %v3952_v14 }
 0xa1b   : > { %v3425_v53 = vpop.eup %3424 }
 0xa1c   : > { %v2047_v1 = vmul.f32 %v3978_v8, %v2033_v61  ;;  %v2034_v52 = vmul.f32 %v3425_v53, %v3955_v41 }
 0xa1d   : > { %v3427_v2 = vpop.eup %3426 }
 0xa1e   : > { %v2061_v3 = vadd.f32 %v3984_v21, %v2047_v1  ;;  %v2048_v4 = vmul.f32 %v3978_v8, %v2034_v52  ;;  %v2035_v9 = vmul.f32 %v3427_v2, %v3960_v58 }
 0xa1f   : > { %v3429_v10 = vpop.eup %3428 }
 0xa20   : > { %v2077_v15 = vrot.slane %v2061_v3, 7  ;;  %v2062_v0 = vadd.f32 %v3984_v21, %v2048_v4  ;;  %v2049_v16 = vmul.f32 %v3978_v8, %v2035_v9  ;;  %v2036_v14 = vmul.f32 %v3429_v10, %v3966_v7 }
 0xa22   : > { %v2094_v42 = vsel %vm2089_vm5, 0.0, %v2077_v15  ;;  %v2102_v43 = vsel %vm2089_vm5, %v2077_v15, 0.0  ;;  %v2078_v41 = vrot.slane %v2062_v0, 7  ;;  %v2063_v17 = vadd.f32 %v3984_v21, %v2049_v16 }
 0xa23   : > { %2116 = vst.msk [vmem:[#allocation2 + $0x50] sm:$0xff] %vm425_vm0, %v2094_v42  ;;  %v2050_v58 = vmul.f32 %v3978_v8, %v2036_v14 }
 0xa24   : > { %2117 = vst.msk [vmem:[#allocation2 + $0x58] sm:$0x3] %vm2108_vm4, %v2102_v43  ;;  %v2095_v62 = vsel %vm2089_vm5, 0.0, %v2078_v41  ;;  %v2103_v63 = vsel %vm2089_vm5, %v2078_v41, 0.0  ;;  %v2079_v19 = vrot.slane %v2063_v17, 7  ;;  %v2131_v43 = vld [vmem:[#allocation2 + $0x20] sm:$0xff] }
 0xa25   : > { %2118 = vst.msk [vmem:[#allocation2 + $0x60] sm:$0xff] %vm425_vm0, %v2095_v62  ;;  %v2064_v7 = vadd.f32 %v3984_v21, %v2050_v58  ;;  %v2132_v17 = vld [vmem:[#allocation2 + $0x30] sm:$0xff] }
 0xa26   : > { %2119 = vst.msk [vmem:[#allocation2 + $0x68] sm:$0x3] %vm2108_vm4, %v2103_v63  ;;  %v2096_v45 = vsel %vm2089_vm5, 0.0, %v2079_v19  ;;  %v2104_v47 = vsel %vm2089_vm5, %v2079_v19, 0.0 }
 0xa27   : > { %2120 = vst.msk [vmem:[#allocation2 + $0x70] sm:$0xff] %vm425_vm0, %v2096_v45  ;;  %v2080_v8 = vrot.slane %v2064_v7, 7 }
 0xa28   : > { %2121 = vst.msk [vmem:[#allocation2 + $0x78] sm:$0x3] %vm2108_vm4, %v2104_v47 }
 0xa29   : > { %v2097_v50 = vsel %vm2089_vm5, 0.0, %v2080_v8  ;;  %v2105_v23 = vsel %vm2089_vm5, %v2080_v8, 0.0 }
 0xa2a   : > { %2122 = vst.msk [vmem:[#allocation2 + $0x80] sm:$0xff] %vm425_vm0, %v2097_v50 }
 0xa2b   : > { %2123 = vst.msk [vmem:[#allocation2 + $0x88] sm:$0x3] %vm2108_vm4, %v2105_v23  ;;  %v2562_v5 = vld [vmem:[#allocation2 + $0x51] sm:$0xff] }
 0xa2c   : > { %v3254_v21 = vpack.i.bf16 %v2562_v5, %v4036_v36  ;;  %v2570_v25 = vld [vmem:[#allocation2 + $0x52] sm:$0xff] }
 0xa2d   : > { %v2257_v13 = vld [vmem:[#allocation2 + $0x61] sm:$0xff]  ;;  %v3259_v30 = vpack.i.bf16 %v2570_v25, %v4041_v33 }
 0xa2e   : > { %3255 = vrot.lane.b32.xlu1 %v3254_v21, %s3453_s19  ;;  %v3264_v26 = vpack.i.bf16 %v2257_v13, %v2562_v5  ;;  %v2265_v27 = vld [vmem:[#allocation2 + $0x62] sm:$0xff] }
 0xa2f   : > { %v3269_v31 = vpack.i.bf16 %v2265_v27, %v2570_v25  ;;  %v2258_v34 = vld [vmem:[#allocation2 + $0x71] sm:$0xff] }
 0xa30   : > { %3265 = vrot.lane.b32.xlu0 %v3264_v26, %s3453_s19  ;;  %v2266_v37 = vld [vmem:[#allocation2 + $0x72] sm:$0xff]  ;;  %v3289_v33 = vpack.i.bf16 %v2258_v34, %v2257_v13 }
 0xa31   : > { %v3299_v28 = vpack.i.bf16 %v2266_v37, %v2265_v27 }
 0xa32   : > { %3260 = vrot.lane.b32.xlu1 %v3259_v30, %s3454_s20  ;;  %v2259_v20 = vld [vmem:[#allocation2 + $0x81] sm:$0xff] }
 0xa33   : > { %v3279_v35 = vpack.i.bf16 %v2259_v20, %v2258_v34  ;;  %v2267_v36 = vld [vmem:[#allocation2 + $0x82] sm:$0xff]  ;;  %v3309_v46 = vpack.i.bf16 %v2566_v44, %v2259_v20 }
 0xa34   : > { %3270 = vrot.lane.b32.xlu0 %v3269_v31, %s3454_s20  ;;  %v3284_v18 = vpack.i.bf16 %v2267_v36, %v2266_v37  ;;  %v3319_v51 = vpack.i.bf16 %v2574_v22, %v2267_v36 }
 0xa36   : > { %3280 = vrot.lane.b32.xlu1 %v3279_v35, %s3453_s19 }
 0xa38   : > { %3275 = vrot.lane.b32.xlu0 %v3254_v21, %s3453_s19 }
 0xa3a   : > { %3285 = vrot.lane.b32.xlu1 %v3284_v18, %s3454_s20 }
 0xa3c   : > { %3295 = vrot.lane.b32.xlu0 %v3259_v30, %s3454_s20 }
 0xa3e   : > { %3290 = vrot.lane.b32.xlu1 %v3289_v33, %s3453_s19 }
 0xa40   : > { %3305 = vrot.lane.b32.xlu0 %v3289_v33, %s3453_s19  ;;  %v4114_v33 = vld [vmem:[#allocation2 + $0x40] sm:$0xff] }
 0xa42   : > { %3300 = vrot.lane.b32.xlu1 %v3299_v28, %s3454_s20 }
 0xa44   : > { %3315 = vrot.lane.b32.xlu0 %v3299_v28, %s3454_s20 }
 0xa46   : > { %3310 = vrot.lane.b32.xlu1 %v3309_v46, %s3453_s19 }
 0xa4a   : > { %3320 = vrot.lane.b32.xlu1 %v3319_v51, %s3454_s20  ;;  %s4188_s20 = scalar_lea.vmem %s4229_s12, %s2945_s23 }
 0xa63   : > { %v3206_v38 = vpop.permute.xlu0 %3205 }
 0xa64   : > { %v3208_v39 = vunpack.i.h.bf16 %v3206_v38  ;;  %v3207_v49 = vunpack.i.l.bf16 %v3206_v38 }
 0xa65   : > { %v3221_v29 = vpop.permute.xlu1 %3220 }
 0xa66   : > { %v2218_v53 = vsel %vm425_vm0, %v2130_v55, %v3208_v39  ;;  %v2217_v1 = vsel %vm425_vm0, %v2129_v48, %v3207_v49  ;;  %v3223_v14 = vunpack.i.h.bf16 %v3221_v29  ;;  %v3222_v42 = vunpack.i.l.bf16 %v3221_v29 }
 0xa67   : > { %v3211_v60 = vpop.permute.xlu0 %3210 }
 0xa68   : > { %v3213_v57 = vunpack.i.h.bf16 %v3211_v60  ;;  %v3212_v61 = vunpack.i.l.bf16 %v3211_v60  ;;  %v3332_v60 = vld [vmem:[%s4227_s10 + $0x38] sm:$0xff]  }
 0xa69   : > { %v3226_v52 = vpop.permute.xlu1 %3225 }
 0xa6a   : > { %v2226_v2 = vsel %vm2225_vm6, %v2217_v1, %v3212_v61  ;;  %v2227_v3 = vsel %vm2225_vm6, %v2218_v53, %v3213_v57  ;;  %v3228_v9 = vunpack.i.h.bf16 %v3226_v52  ;;  %v3227_v10 = vunpack.i.l.bf16 %v3226_v52 }
 0xa6b   : > { %v2234_v4 = vpack.c.bf16 %v2227_v3, %v2226_v2  ;;  %v3216_v15 = vpop.permute.xlu0 %3215  ;;  %v2554_v3 = vld [vmem:[#allocation2 + $0x50] sm:$0xff] }
 0xa6c   : > { %v3218_v0 = vunpack.i.h.bf16 %v3216_v15  ;;  %v3217_v16 = vunpack.i.l.bf16 %v3216_v15  ;;  %v2220_v7 = vsel %vm425_vm0, %v2132_v17, %v3228_v9  ;;  %v2219_v45 = vsel %vm425_vm0, %v2131_v43, %v3227_v10 }
 0xa6d   : > { %3161 = vmatprep.mubr.msk.bf16.mxu1 %vm2377_vm7, %v2234_v4  ;;  %v3231_v41 = vpop.permute.xlu1 %3230  ;;  %v4137_v4 = vld [vmem:[#allocation2 + $0x60] sm:$0xff] }
 0xa6e   : > { %v2332_v58 = vsel %vm425_vm0, %v2130_v55, %v3217_v16  ;;  %v2333_v62 = vsel %vm425_vm0, %v2131_v43, %v3218_v0  ;;  %v3233_v63 = vunpack.i.h.bf16 %v3231_v41  ;;  %v3232_v19 = vunpack.i.l.bf16 %v3231_v41  ;;  %v3333_v55 = vld [vmem:[%s4227_s10 + $0x30] sm:$0xff]  }
 0xa6f   : > { %v3236_v47 = vpop.permute.xlu0 %3235  ;;  %v2340_v8 = vsel %vm2225_vm6, %v2332_v58, %v3222_v42  ;;  %v2341_v50 = vsel %vm2225_vm6, %v2333_v62, %v3223_v14 }
 0xa70   : > { %v2228_v23 = vsel %vm2225_vm6, %v2219_v45, %v3232_v19  ;;  %v2229_v5 = vsel %vm2225_vm6, %v2220_v7, %v3233_v63  ;;  %v3238_v13 = vunpack.i.h.bf16 %v3236_v47  ;;  %v3237_v25 = vunpack.i.l.bf16 %v3236_v47  ;;  %v2250_v19 = vld [vmem:[#allocation2 + $0x70] sm:$0xff]  ;;  %v2251_v7 = vld [vmem:[#allocation2 + $0x80] sm:$0xff] }
 0xa71   : > { %v2235_v21 = vpack.c.bf16 %v2229_v5, %v2228_v23  ;;  %v3246_v26 = vpop.permute.xlu1 %3245  ;;  %v2348_v27 = vpack.c.bf16 %v2341_v50, %v2340_v8 }
 0xa72   : > { %v3248_v30 = vunpack.i.h.bf16 %v3246_v26  ;;  %v3247_v31 = vunpack.i.l.bf16 %v3246_v26  ;;  %v2640_v36 = vsel %vm425_vm0, %v2132_v17, %v3238_v13  ;;  %v2639_v37 = vsel %vm425_vm0, %v2131_v43, %v3237_v25 }
 0xa73   : > { %3147 = vmatprep.mubr.msk.bf16.mxu0 %vm2377_vm7, %v2348_v27  ;;  %v3241_v20 = vpop.permute.xlu0 %3240  ;;  %3162 = vmatmul.mubr.msk.bf16.vlgmr.msra.gmra.mxu1 %vm2377_vm7, %v2235_v21 }
 0xa74   : > { %v3243_v34 = vunpack.i.h.bf16 %v3241_v20  ;;  %v3242_v35 = vunpack.i.l.bf16 %v3241_v20  ;;  %v2335_v51 = vsel %vm425_vm0, %v4114_v33, %v3248_v30  ;;  %v2334_v38 = vsel %vm425_vm0, %v2132_v17, %v3247_v31 }
 0xa75   : > { %v3251_v18 = vpop.permute.xlu1 %3250 }
 0xa76   : > { %v4117_v28 = vsel %vm2225_vm6, %v2639_v37, %v3242_v35  ;;  %v4120_v44 = vsel %vm2225_vm6, %v2640_v36, %v3243_v34  ;;  %v3253_v46 = vunpack.i.h.bf16 %v3251_v18  ;;  %v3252_v22 = vunpack.i.l.bf16 %v3251_v18 }
 0xa77   : > { %v2655_v39 = vpack.c.bf16 %v4120_v44, %v4117_v28 }
 0xa78   : > { %v2342_v49 = vsel %vm2225_vm6, %v2334_v38, %v3252_v22  ;;  %v2343_v29 = vsel %vm2225_vm6, %v2335_v51, %v3253_v46 }
 0xa79   : > { %v2349_v48 = vpack.c.bf16 %v2343_v29, %v2342_v49 }
 0xa7b   : > { %3148 = vmatmul.mubr.msk.bf16.vlgmr.msra.gmra.mxu0 %vm2377_vm7, %v2349_v48 }
 0xa7c   : > { %3170 = vmatpush3.bf16.msra.mxu0 %v4079_v12 }
 0xa7d   : > { %3171 = vmatprep.subr.bf16.mxu0 %v3332_v60 }
 0xa80   : > { %3172 = vmatpush3.bf16.msra.mxu0 %v3332_v60 }
 0xa81   : > { %3173 = vmatprep.subr.bf16.mxu0 %v3333_v55 }
 0xa84   : > { %3174 = vmatpush3.bf16.msra.mxu0 %v3333_v55 }
 0xaa0   : > { %v3256_v57 = vpop.permute.xlu1 %3255 }
 0xaa1   : > { %v3258_v8 = vunpack.i.h.bf16 %v3256_v57  ;;  %v3257_v27 = vunpack.i.l.bf16 %v3256_v57 }
 0xaa2   : > { %v3266_v61 = vpop.permute.xlu0 %3265 }
 0xaa3   : > { %v3268_v53 = vunpack.i.h.bf16 %v3266_v61  ;;  %v3267_v1 = vunpack.i.l.bf16 %v3266_v61  ;;  %v2642_v51 = vsel %vm425_vm0, %v2554_v3, %v3258_v8  ;;  %v2641_v38 = vsel %vm425_vm0, %v4114_v33, %v3257_v27 }
 0xaa4   : > { %v3261_v52 = vpop.permute.xlu1 %3260 }
 0xaa5   : > { %v2336_v12 = vsel %vm425_vm0, %v2554_v3, %v3267_v1  ;;  %v2337_v15 = vsel %vm425_vm0, %v4137_v4, %v3268_v53  ;;  %v3263_v35 = vunpack.i.h.bf16 %v3261_v52  ;;  %v3262_v36 = vunpack.i.l.bf16 %v3261_v52 }
 0xaa6   : > { %v3271_v2 = vpop.permute.xlu0 %3270 }
 0xaa7   : > { %v3273_v9 = vunpack.i.h.bf16 %v3271_v2  ;;  %v3272_v10 = vunpack.i.l.bf16 %v3271_v2  ;;  %v2649_v60 = vsel %vm2225_vm6, %v2641_v38, %v3262_v36  ;;  %v2650_v55 = vsel %vm2225_vm6, %v2642_v51, %v3263_v35 }
 0xaa8   : > { %v3281_v0 = vpop.permute.xlu1 %3280 }
 0xaa9   : > { %v2344_v16 = vsel %vm2225_vm6, %v2336_v12, %v3272_v10  ;;  %v2345_v14 = vsel %vm2225_vm6, %v2337_v15, %v3273_v9  ;;  %v3283_v43 = vunpack.i.h.bf16 %v3281_v0  ;;  %v3282_v41 = vunpack.i.l.bf16 %v3281_v0 }
 0xaaa   : > { %v2350_v42 = vpack.c.bf16 %v2345_v14, %v2344_v16  ;;  %v3276_v17 = vpop.permute.xlu0 %3275  ;;  %v2656_v9 = vpack.c.bf16 %v2650_v55, %v2649_v60 }
 0xaab   : > { %v3278_v58 = vunpack.i.h.bf16 %v3276_v17  ;;  %v3277_v62 = vunpack.i.l.bf16 %v3276_v17  ;;  %v2339_v50 = vsel %vm425_vm0, %v2251_v7, %v3283_v43  ;;  %v2338_v23 = vsel %vm425_vm0, %v2250_v19, %v3282_v41  ;;  %v2558_v17 = vld [vmem:[#allocation2 + $0x90] sm:$0xff] }
 0xaac   : > { %v3286_v63 = vpop.permute.xlu1 %3285  ;;  %3151 = vmatprep.mubr.msk.bf16.mxu0 %vm2377_vm7, %v2350_v42 }
 0xaad   : > { %v3288_v45 = vunpack.i.h.bf16 %v3286_v63  ;;  %v3287_v47 = vunpack.i.l.bf16 %v3286_v63  ;;  %v2222_v30 = vsel %vm425_vm0, %v2554_v3, %v3278_v58  ;;  %v2221_v31 = vsel %vm425_vm0, %v4114_v33, %v3277_v62 }
 0xaae   : > { %v3296_v5 = vpop.permute.xlu0 %3295 }
 0xaaf   : > { %v2346_v21 = vsel %vm2225_vm6, %v2338_v23, %v3287_v47  ;;  %v2347_v13 = vsel %vm2225_vm6, %v2339_v50, %v3288_v45  ;;  %v3298_v25 = vunpack.i.h.bf16 %v3296_v5  ;;  %v3297_v26 = vunpack.i.l.bf16 %v3296_v5 }
 0xab0   : > { %v2351_v20 = vpack.c.bf16 %v2347_v13, %v2346_v21  ;;  %v3291_v34 = vpop.permute.xlu1 %3290 }
 0xab1   : > { %v2230_v37 = vsel %vm2225_vm6, %v2221_v31, %v3297_v26  ;;  %v2231_v18 = vsel %vm2225_vm6, %v2222_v30, %v3298_v25  ;;  %v3293_v44 = vunpack.i.h.bf16 %v3291_v34  ;;  %v3292_v46 = vunpack.i.l.bf16 %v3291_v34 }
 0xab2   : > { %v2236_v28 = vpack.c.bf16 %v2231_v18, %v2230_v37  ;;  %v3306_v22 = vpop.permute.xlu0 %3305  ;;  %3152 = vmatmul.mubr.msk.bf16.gmra.mxu0 %vm2377_vm7, %v2351_v20  ;;  %v2942_v37 = vld [vmem:[%s4228_s11] ss:$0 sm:$0xff] }
 0xab3   : > { %3175 = vmatprep.mubr.msk.bf16.mxu0 %vm2377_vm7, %v2655_v39  ;;  %v3308_v49 = vunpack.i.h.bf16 %v3306_v22  ;;  %v3307_v29 = vunpack.i.l.bf16 %v3306_v22  ;;  %v2224_v53 = vsel %vm425_vm0, %v2250_v19, %v3293_v44  ;;  %v2223_v39 = vsel %vm425_vm0, %v4137_v4, %v3292_v46 }
 0xab4   : > { %v3301_v48 = vpop.permute.xlu1 %3300  ;;  %3165 = vmatprep.mubr.msk.bf16.mxu1 %vm2377_vm7, %v2236_v28 }
 0xab5   : > { %v3303_v57 = vunpack.i.h.bf16 %v3301_v48  ;;  %v3302_v61 = vunpack.i.l.bf16 %v3301_v48  ;;  %v2644_v10 = vsel %vm425_vm0, %v2250_v19, %v3308_v49  ;;  %v2643_v12 = vsel %vm425_vm0, %v4137_v4, %v3307_v29 }
 0xab6   : > { %v3316_v1 = vpop.permute.xlu0 %3315 }
 0xab7   : > { %v2232_v52 = vsel %vm2225_vm6, %v2223_v39, %v3302_v61  ;;  %v2233_v33 = vsel %vm2225_vm6, %v2224_v53, %v3303_v57  ;;  %v3318_v2 = vunpack.i.h.bf16 %v3316_v1  ;;  %v3317_v3 = vunpack.i.l.bf16 %v3316_v1 }
 0xab8   : > { %v2237_v15 = vpack.c.bf16 %v2233_v33, %v2232_v52  ;;  %v3311_v0 = vpop.permute.xlu1 %3310 }
 0xab9   : > { %v2651_v16 = vsel %vm2225_vm6, %v2643_v12, %v3317_v3  ;;  %v2652_v14 = vsel %vm2225_vm6, %v2644_v10, %v3318_v2  ;;  %v3313_v43 = vunpack.i.h.bf16 %v3311_v0  ;;  %v3312_v41 = vunpack.i.l.bf16 %v3311_v0 }
 0xaba   : > { %v2657_v42 = vpack.c.bf16 %v2652_v14, %v2651_v16  ;;  %3166 = vmatmul.mubr.msk.bf16.gmra.mxu1 %vm2377_vm7, %v2237_v15  ;;  %3176 = vmatmul.mubr.msk.bf16.vlgmr.msra.gmra.mxu0 %vm2377_vm7, %v2656_v9 }
 0xabb   : > { %v2646_v4 = vsel %vm425_vm0, %v2558_v17, %v3313_v43  ;;  %v2645_v19 = vsel %vm425_vm0, %v2251_v7, %v3312_v41 }
 0xabc   : > { %v3321_v58 = vpop.permute.xlu1 %3320  ;;  %3179 = vmatprep.mubr.msk.bf16.mxu0 %vm2377_vm7, %v2657_v42 }
 0xabd   : > { %v3323_v62 = vunpack.i.h.bf16 %v3321_v58  ;;  %v3322_v63 = vunpack.i.l.bf16 %v3321_v58 }
 0xabf   : > { %v2653_v45 = vsel %vm2225_vm6, %v2645_v19, %v3322_v63  ;;  %v2654_v47 = vsel %vm2225_vm6, %v2646_v4, %v3323_v62 }
 0xac0   : > { %v2658_v8 = vpack.c.bf16 %v2654_v47, %v2653_v45 }
 0xac2   : > { %3180 = vmatmul.mubr.msk.bf16.gmra.mxu0 %vm2377_vm7, %v2658_v8 }
 0xb33   : > { %v3163_v5 = vpop.f32.mrf.mxu1 }
 0xb35   : > { %v2519_v13 = vpop.f32.mrf.mxu1 }
 0xb37   : > { %v3164_v27 = vpop.f32.mrf.mxu1 }
 0xb39   : > { %v2522_v20 = vpop.f32.mrf.mxu1 }
 0xb3b   : > { %v3149_v50 = vpop.f32.mrf.mxu0 }
 0xb3c   : > { %v2528_v34 = vadd.f32 %v3163_v5, %v3149_v50 }
 0xb3d   : > { %v2424_v23 = vpop.f32.mrf.mxu0 }
 0xb3e   : > { %v2520_v18 = vadd.f32 %v2519_v13, %v2424_v23 }
 0xb3f   : > { %v3150_v21 = vpop.f32.mrf.mxu0 }
 0xb40   : > { %v2531_v22 = vadd.f32 %v3164_v27, %v3150_v21 }
 0xb41   : > { %v2427_v25 = vpop.f32.mrf.mxu0 }
 0xb42   : > { %v2523_v29 = vadd.f32 %v2522_v20, %v2427_v25 }
 0xb72   : > { %v3153_v26 = vpop.f32.mrf.mxu0 }
 0xb74   : > { %v2440_v30 = vpop.f32.mrf.mxu0 }
 0xb76   : > { %v3154_v31 = vpop.f32.mrf.mxu0 }
 0xb78   : > { %v2443_v7 = vpop.f32.mrf.mxu0 }
 0xb7a   : > { %v3167_v35 = vpop.f32.mrf.mxu1  ;;  %v3177_v36 = vpop.f32.mrf.mxu0 }
 0xb7b   : > { %v2763_v28 = vadd.f32 %v3177_v36, %v2528_v34  ;;  %v2544_v53 = vadd.f32 %v3167_v35, %v3153_v26 }
 0xb7c   : > { %v2535_v44 = vpop.f32.mrf.mxu1  ;;  %v2730_v46 = vpop.f32.mrf.mxu0 }
 0xb7d   : > { %v2778_v51 = vadd.f32 %v2942_v37, %v2763_v28  ;;  %v2761_v38 = vadd.f32 %v2730_v46, %v2520_v18  ;;  %v2536_v2 = vadd.f32 %v2535_v44, %v2440_v30 }
 0xb7e   : > { %v3178_v49 = vpop.f32.mrf.mxu0  ;;  %v3168_v57 = vpop.f32.mrf.mxu1 }
 0xb7f   : > { %v2786_v48 = vadd.f32 %v2778_v51, %v3889_v59  ;;  %v2776_v60 = vadd.f32 %v2942_v37, %v2761_v38  ;;  %v2764_v55 = vadd.f32 %v3178_v49, %v2531_v22  ;;  %v2547_v15 = vadd.f32 %v3168_v57, %v3154_v31 }
 0xb80   : > { %v2733_v61 = vpop.f32.mrf.mxu0  ;;  %v2538_v10 = vpop.f32.mrf.mxu1 }
 0xb81   : > { %2794 = vst.msk [vmem:[%s4188_s20 + $0x10] sm:$0xff] %vm425_vm0, %v2786_v48  ;;  %v2784_v39 = vadd.f32 %v2776_v60, %v3877_v54  ;;  %v2779_v1 = vadd.f32 %v2942_v37, %v2764_v55  ;;  %v2762_v52 = vadd.f32 %v2733_v61, %v2523_v29  ;;  %v2539_v42 = vadd.f32 %v2538_v10, %v2443_v7 }
 0xb82   : > { %v3181_v33 = vpop.f32.mrf.mxu0 }
 0xb83   : > { %2792 = vst.msk [vmem:[%s4188_s20] sm:$0xff] %vm425_vm0, %v2784_v39  ;;  %v2787_v3 = vadd.f32 %v2779_v1, %v3895_v6  ;;  %v2777_v59 = vadd.f32 %v2942_v37, %v2762_v52  ;;  %v2767_v9 = vadd.f32 %v3181_v33, %v2544_v53 }
 0xb84   : > { %v2746_v12 = vpop.f32.mrf.mxu0 }
 0xb85   : > { %2795 = vst.msk [vmem:[%s4188_s20 + $0x18] sm:$0xff] %vm425_vm0, %v2787_v3  ;;  %v2785_v54 = vadd.f32 %v2777_v59, %v3883_v56  ;;  %v2782_v0 = vadd.f32 %v2942_v37, %v2767_v9  ;;  %v2765_v16 = vadd.f32 %v2746_v12, %v2536_v2 }
 0xb86   : > { %v3182_v14 = vpop.f32.mrf.mxu0 }
 0xb87   : > { %2793 = vst.msk [vmem:[%s4188_s20 + $0x8] sm:$0xff] %vm425_vm0, %v2785_v54  ;;  %v2790_v6 = vadd.f32 %v2782_v0, %v3913_v40  ;;  %v2780_v43 = vadd.f32 %v2942_v37, %v2765_v16  ;;  %v2768_v41 = vadd.f32 %v3182_v14, %v2547_v15 }
 0xb88   : > { %v2749_v17 = vpop.f32.mrf.mxu0 }
 0xb89   : > { %2798 = vst.msk [vmem:[%s4188_s20 + $0x30] sm:$0xff] %vm425_vm0, %v2790_v6  ;;  %v2788_v58 = vadd.f32 %v2780_v43, %v3901_v24  ;;  %v2783_v62 = vadd.f32 %v2942_v37, %v2768_v41  ;;  %v2766_v63 = vadd.f32 %v2749_v17, %v2539_v42 }
 0xb8b   : > { %2796 = vst.msk [vmem:[%s4188_s20 + $0x20] sm:$0xff] %vm425_vm0, %v2788_v58  ;;  %v2791_v56 = vadd.f32 %v2783_v62, %v3919_v11  ;;  %v2781_v4 = vadd.f32 %v2942_v37, %v2766_v63 }
 0xb8d   : > { %2799 = vst.msk [vmem:[%s4188_s20 + $0x38] sm:$0xff] %vm425_vm0, %v2791_v56  ;;  %v2789_v19 = vadd.f32 %v2781_v4, %v3907_v32 }
 0xb8f   : > { %2797 = vst.msk [vmem:[%s4188_s20 + $0x28] sm:$0xff] %vm425_vm0, %v2789_v19 }
 0xb90 PF: > { %s22_s21 = sadd.s32 1, %s3444_s21  }
 0xb91   : > { %p19_p4 = scmp.ge.s32.totalorder %s22_s21, 4  }
 0xb93   :  { %21 = sbr.rel (!%p19_p4) target bundleno = 1 (0x1), region = 104 }

// kernel: rstb_forward.4
= control target key start
LH: loop header
LB: loop body
LE: loop exit
PB: predicated region body
PF: predicated region fallthrough
CT: control target
= control target key end

     0   :  { %s3650_s25 = smov 0   ;;  %s4421_s0 = inlined_call_operand.vmem [shape: f32[2,8,8,16], index: 0, kind: input, shape index: {}]   ;;  %s4422_s1 = inlined_call_operand.vmem [shape: f32[1,16], index: 1, kind: input, shape index: {}]   ;;  %s4423_s2 = inlined_call_operand.vmem [shape: f32[1,16], index: 2, kind: input, shape index: {}]   ;;  %s4424_s3 = inlined_call_operand.vmem [shape: bf16[16,48], index: 3, kind: input, shape index: {}]   ;;  %s4425_s4 = inlined_call_operand.vmem [shape: f32[1,48], index: 4, kind: input, shape index: {}]   ;;  %s4426_s5 = inlined_call_operand.vmem [shape: bf16[16,16], index: 5, kind: input, shape index: {}]   ;;  %s4427_s6 = inlined_call_operand.vmem [shape: f32[1,16], index: 6, kind: input, shape index: {}]   ;;  %s4428_s7 = inlined_call_operand.vmem [shape: f32[2,16,16], index: 7, kind: input, shape index: {}]   ;;  %s4429_s8 = inlined_call_operand.vmem [shape: f32[1,16], index: 8, kind: input, shape index: {}]   ;;  %s4430_s9 = inlined_call_operand.vmem [shape: f32[1,16], index: 9, kind: input, shape index: {}]   ;;  %s4431_s10 = inlined_call_operand.vmem [shape: bf16[3,48,16], index: 10, kind: input, shape index: {}]   ;;  %s4432_s11 = inlined_call_operand.vmem [shape: f32[1,16], index: 11, kind: input, shape index: {}]   ;;  %s4433_s12 = inlined_call_operand.vmem [shape: f32[4,16,16], index: 12, kind: input, shape index: {}]   ;;  %s4434_s13 = inlined_call_operand.vmem [shape: f32[2,8,8,16], index: 13, kind: output, shape index: {}]  }
   0x1 LB: > { %s2980_s26 = sadd.s32 4294967295, %s3569_s25   ;;  %p2984_p0 = scmp.ge.s32.totalorder %s3569_s25, 1  ;;  %s3569_s25 = sphi %s3650_s25, %s23_s25  }
   0x2   : > { %p387_p1 = scmp.lt.s32.totalorder %s3569_s25, 3 }
   0x4   : > { %p388_p2 = pnand %p2984_p0, %p387_p1 }
   0x5   : > { %p431_p3 = scmp.lt.s32.totalorder (!%p388_p2), %s2980_s26, 1  ;;  %s3573_s22 = smov (!%p388_p2), 112  }
   0x6   : > { %391 = sbr.rel (%p388_p2) target bundleno = 3001 (0xbb9), region = 72  ;;  %s3574_s17 = smov (!%p388_p2), 96  }
   0x7   : > { %s3575_s18 = smov (!%p388_p2), 104   ;;  %s3576_s19 = smov (!%p388_p2), 120  }
   0x8   : > { %s3577_s24 = smov (!%p388_p2), 88   ;;  %s3578_s21 = smov (!%p388_p2), 16  }
   0xb   : > { %s4436_s26 = smov (!%p431_p3, %s2980_s26), 1  ;;  %vm452_vm0 = vcmask 130048   ;;  %v3449_v56 = vld [vmem:[%s4424_s3] sm:$0xff]   ;;  %vm3572_vm1 = vmmov 0   ;;  %vm754_vm2 = vcmask 64512   ;;  %vm1807_vm3 = vcmask 1043456  }
   0xc   : > { %s3070_s27 = sshll.u32 %s4436_s26, 6  ;;  %3140 = vmatprep.subr.bf16.mxu0 %v3449_v56  ;;  %3308 = vmatprep.subr.bf16.mxu1 %v3449_v56  ;;  %vm2233_vm4 = vcmask 123904   ;;  %vm2214_vm5 = vcmask 1040384   ;;  %vm2350_vm6 = vcmask 261120   ;;  %vm2502_vm7 = vcmask 392192  }
   0xd   : > { %s3666_s30 = scalar_lea.vmem %s4421_s0, %s3070_s27  ;;  %3141 = vmatpush3.bf16.msra.mxu0 %v3449_v56  ;;  %3309 = vmatpush3.bf16.msra.mxu1 %v3449_v56 }
   0xe   : > { %v444_v0 = vld [vmem:[%s3666_s30 + $0x10] sm:$0xff]  ;;  %v446_v1 = vld [vmem:[%s3666_s30 + $0x20] sm:$0xff]  ;;  %v445_v2 = vld [vmem:[%s3666_s30 + $0x18] sm:$0xff] }
   0xf   : > { %v459_v3 = vsel %vm452_vm0, %v444_v0, 0.0  ;;  %v465_v4 = vsel %vm452_vm0, %v446_v1, 0.0  ;;  %v447_v5 = vld [vmem:[%s3666_s30 + $0x28] sm:$0xff]  ;;  %v462_v6 = vsel %vm452_vm0, %v445_v2, 0.0  ;;  %v442_v7 = vld [vmem:[%s3666_s30] sm:$0xff]  ;;  %v448_v12 = vld [vmem:[%s3666_s30 + $0x30] sm:$0xff] }
  0x10   : > { %460 = vadd.xlane.f32.xlu0 %v459_v3  ;;  %466 = vadd.xlane.f32.xlu1 %v465_v4  ;;  %v468_v8 = vsel %vm452_vm0, %v447_v5, 0.0  ;;  %v443_v9 = vld [vmem:[%s3666_s30 + $0x8] sm:$0xff]  ;;  %v453_v10 = vsel %vm452_vm0, %v442_v7, 0.0  ;;  %v449_v13 = vld [vmem:[%s3666_s30 + $0x38] sm:$0xff]  ;;  %v471_v14 = vsel %vm452_vm0, %v448_v12, 0.0 }
  0x11   : > { %v456_v11 = vsel %vm452_vm0, %v443_v9, 0.0  ;;  %v474_v15 = vsel %vm452_vm0, %v449_v13, 0.0 }
  0x14   : > { %463 = vadd.xlane.f32.xlu0 %v462_v6  ;;  %469 = vadd.xlane.f32.xlu1 %v468_v8 }
  0x18   : > { %454 = vadd.xlane.f32.xlu0 %v453_v10  ;;  %457 = vadd.xlane.f32.xlu1 %v456_v11 }
  0x1c   : > { %472 = vadd.xlane.f32.xlu0 %v471_v14  ;;  %475 = vadd.xlane.f32.xlu1 %v474_v15 }
  0x99   : > { %v461_v16 = vpop.xlane.xlu0 %460  ;;  %v467_v17 = vpop.xlane.xlu1 %466 }
  0x9a   : > { %v480_v18 = vmul.f32 0.0625, %v461_v16  ;;  %v482_v19 = vmul.f32 0.0625, %v467_v17 }
  0x9c   : > { %v3684_v20 = vsub.f32 %v444_v0, %v480_v18  ;;  %v3686_v21 = vsub.f32 %v446_v1, %v482_v19  ;;  %v2989_v19 = vld [vmem:[%s4422_s1] ss:$0 sm:$0xff] }
  0x9d   : > { %v464_v22 = vpop.xlane.xlu0 %463  ;;  %v470_v23 = vpop.xlane.xlu1 %469 }
  0x9e   : > { %v481_v24 = vmul.f32 0.0625, %v464_v22  ;;  %v483_v25 = vmul.f32 0.0625, %v470_v23  ;;  %v496_v26 = vmul.f32 %v3684_v20, %v3684_v20  ;;  %v498_v27 = vmul.f32 %v3686_v21, %v3686_v21 }
  0xa0   : > { %v3692_v28 = vsub.f32 %v445_v2, %v481_v24  ;;  %v3694_v29 = vsub.f32 %v447_v5, %v483_v25  ;;  %v508_v30 = vsel %vm452_vm0, %v496_v26, 0.0  ;;  %v514_v33 = vsel %vm452_vm0, %v498_v27, 0.0  ;;  %v2990_v27 = vld [vmem:[%s4423_s2] ss:$0 sm:$0xff] }
  0xa1   : > { %509 = vadd.xlane.f32.xlu0 %v508_v30  ;;  %v455_v31 = vpop.xlane.xlu0 %454  ;;  %v458_v32 = vpop.xlane.xlu1 %457 }
  0xa2   : > { %v478_v34 = vmul.f32 0.0625, %v455_v31  ;;  %v497_v35 = vmul.f32 %v3692_v28, %v3692_v28  ;;  %v479_v36 = vmul.f32 0.0625, %v458_v32  ;;  %v499_v37 = vmul.f32 %v3694_v29, %v3694_v29 }
  0xa4   : > { %v3702_v38 = vsub.f32 %v442_v7, %v478_v34  ;;  %v511_v39 = vsel %vm452_vm0, %v497_v35, 0.0  ;;  %v3705_v40 = vsub.f32 %v443_v9, %v479_v36  ;;  %v517_v42 = vsel %vm452_vm0, %v499_v37, 0.0 }
  0xa5   : > { %512 = vadd.xlane.f32.xlu1 %v511_v39  ;;  %515 = vadd.xlane.f32.xlu0 %v514_v33  ;;  %v473_v41 = vpop.xlane.xlu0 %472  ;;  %v476_v43 = vpop.xlane.xlu1 %475 }
  0xa6   : > { %v484_v44 = vmul.f32 0.0625, %v473_v41  ;;  %v485_v45 = vmul.f32 0.0625, %v476_v43  ;;  %v494_v46 = vmul.f32 %v3702_v38, %v3702_v38  ;;  %v495_v47 = vmul.f32 %v3705_v40, %v3705_v40 }
  0xa8   : > { %v3712_v48 = vsub.f32 %v448_v12, %v484_v44  ;;  %v3714_v49 = vsub.f32 %v449_v13, %v485_v45  ;;  %v502_v50 = vsel %vm452_vm0, %v494_v46, 0.0  ;;  %v505_v51 = vsel %vm452_vm0, %v495_v47, 0.0 }
  0xa9   : > { %518 = vadd.xlane.f32.xlu1 %v517_v42  ;;  %503 = vadd.xlane.f32.xlu0 %v502_v50 }
  0xaa   : > { %v500_v52 = vmul.f32 %v3712_v48, %v3712_v48  ;;  %v501_v53 = vmul.f32 %v3714_v49, %v3714_v49 }
  0xac   : > { %v520_v54 = vsel %vm452_vm0, %v500_v52, 0.0  ;;  %v523_v55 = vsel %vm452_vm0, %v501_v53, 0.0 }
  0xad   : > { %506 = vadd.xlane.f32.xlu1 %v505_v51  ;;  %521 = vadd.xlane.f32.xlu0 %v520_v54 }
  0xb1   : > { %524 = vadd.xlane.f32.xlu1 %v523_v55 }
 0x12a   : > { %v510_v57 = vpop.xlane.xlu0 %509 }
 0x12b   : > { %v528_v58 = vmul.f32 0.0625, %v510_v57 }
 0x12d   : > { %v536_v59 = vadd.f32 1e-05, %v528_v58 }
 0x12e   : > { %v513_v60 = vpop.xlane.xlu1 %512  ;;  %v516_v61 = vpop.xlane.xlu0 %515 }
 0x12f   : > { %3459 = vrsqrt.f32 %v536_v59  ;;  %v529_v62 = vmul.f32 0.0625, %v513_v60  ;;  %v530_v63 = vmul.f32 0.0625, %v516_v61 }
 0x131   : > { %v537_v0 = vadd.f32 1e-05, %v529_v62  ;;  %v538_v1 = vadd.f32 1e-05, %v530_v63 }
 0x132   : > { %v519_v2 = vpop.xlane.xlu1 %518  ;;  %v504_v3 = vpop.xlane.xlu0 %503 }
 0x133   : > { %3461 = vrsqrt.f32 %v537_v0  ;;  %v531_v4 = vmul.f32 0.0625, %v519_v2  ;;  %v526_v5 = vmul.f32 0.0625, %v504_v3 }
 0x134   : > { %3463 = vrsqrt.f32 %v538_v1 }
 0x135   : > { %v539_v6 = vadd.f32 1e-05, %v531_v4  ;;  %v534_v7 = vadd.f32 1e-05, %v526_v5 }
 0x136   : > { %v507_v8 = vpop.xlane.xlu1 %506  ;;  %v522_v9 = vpop.xlane.xlu0 %521 }
 0x137   : > { %3465 = vrsqrt.f32 %v539_v6  ;;  %v527_v10 = vmul.f32 0.0625, %v507_v8  ;;  %v532_v11 = vmul.f32 0.0625, %v522_v9  ;;  %v2995_v9 = vld [vmem:[%s4425_s4] ss:$0 sm:$0xff] }
 0x138   : > { %3467 = vrsqrt.f32 %v534_v7  ;;  %v3571_v7 = vmov 0.0  }
 0x139   : > { %v535_v12 = vadd.f32 1e-05, %v527_v10  ;;  %v540_v13 = vadd.f32 1e-05, %v532_v11  ;;  %3150 = vmatprep.subr.bf16.mxu1 %v3571_v7  ;;  %2249 = vst.msk [vmem:[#allocation2] sm:$0xff] %vm452_vm0, %v3571_v7  ;;  %2252 = vst.msk [vmem:[#allocation2 + $0x90] sm:$0xff] %vm452_vm0, %v3571_v7  ;;  %3162 = vmatprep.subr.bf16.mxu0 %v3571_v7 }
 0x13a   : > { %v525_v14 = vpop.xlane.xlu1 %524  ;;  %2250 = vst.msk [vmem:[#allocation2 + $0x8] sm:$0x3] %vm2233_vm4, %v3571_v7  ;;  %2253 = vst.msk [vmem:[#allocation2 + $0x98] sm:$0x3] %vm2233_vm4, %v3571_v7 }
 0x13b   : > { %3469 = vrsqrt.f32 %v535_v12  ;;  %v533_v15 = vmul.f32 0.0625, %v525_v14 }
 0x13c   : > { %v3460_v16 = vpop.eup %3459  ;;  %3471 = vrsqrt.f32 %v540_v13 }
 0x13d   : > { %v541_v17 = vadd.f32 1e-05, %v533_v15  ;;  %v552_v18 = vmul.f32 %v3460_v16, %v3684_v20 }
 0x13f   : > { %3473 = vrsqrt.f32 %v541_v17  ;;  %v566_v26 = vmul.f32 %v2989_v19, %v552_v18 }
 0x140   : > { %v3462_v22 = vpop.eup %3461 }
 0x141   : > { %v3464_v23 = vpop.eup %3463  ;;  %v553_v24 = vmul.f32 %v3462_v22, %v3692_v28  ;;  %v580_v35 = vadd.f32 %v2990_v27, %v566_v26 }
 0x142   : > { %v554_v25 = vmul.f32 %v3464_v23, %v3686_v21 }
 0x143   : > { %v567_v30 = vmul.f32 %v2989_v19, %v553_v24  ;;  %v594_v44 = vrot.slane %v580_v35, 2 }
 0x144   : > { %v3466_v31 = vpop.eup %3465  ;;  %v568_v32 = vmul.f32 %v2989_v19, %v554_v25 }
 0x145   : > { %v3468_v20 = vpop.eup %3467  ;;  %v555_v33 = vmul.f32 %v3466_v31, %v3694_v29  ;;  %v581_v34 = vadd.f32 %v2990_v27, %v567_v30 }
 0x146   : > { %v550_v36 = vmul.f32 %v3468_v20, %v3702_v38  ;;  %v582_v39 = vadd.f32 %v2990_v27, %v568_v32 }
 0x147   : > { %v569_v37 = vmul.f32 %v2989_v19, %v555_v33  ;;  %v595_v41 = vrot.slane %v581_v34, 2 }
 0x148   : > { %v3470_v28 = vpop.eup %3469  ;;  %v564_v46 = vmul.f32 %v2989_v19, %v550_v36  ;;  %v596_v47 = vrot.slane %v582_v39, 2 }
 0x149   : > { %v3472_v21 = vpop.eup %3471  ;;  %v583_v42 = vadd.f32 %v2990_v27, %v569_v37  ;;  %v551_v43 = vmul.f32 %v3470_v28, %v3705_v40  ;;  %v635_v52 = vcombine.low %v594_v44, %v595_v41  ;;  %v2991_v53 = vcombine.high %v594_v44, %v595_v41  ;;  %v3800_v44 = vld [vmem:[%s4433_s12] sm:$0xff] }
 0x14a   : > { %v556_v45 = vmul.f32 %v3472_v21, %v3712_v48  ;;  %v578_v58 = vadd.f32 %v2990_v27, %v564_v46  ;;  %v960_v21 = vld [vmem:[%s4428_s7] sm:$0xff] }
 0x14b   : > { %v597_v50 = vrot.slane %v583_v42, 2  ;;  %v565_v51 = vmul.f32 %v2989_v19, %v551_v43 }
 0x14c   : > { %v3474_v29 = vpop.eup %3473  ;;  %v570_v54 = vmul.f32 %v2989_v19, %v556_v45  ;;  %v600_v1 = vrot.slane %v578_v58, 2 }
 0x14d   : > { %v636_v38 = vcombine.low %v596_v47, %v597_v50  ;;  %v2992_v55 = vcombine.high %v596_v47, %v597_v50  ;;  %v557_v56 = vmul.f32 %v3474_v29, %v3714_v49  ;;  %v579_v57 = vadd.f32 %v2990_v27, %v565_v51  ;;  %v961_v47 = vld [vmem:[%s4428_s7 + $0x8] sm:$0xff] }
 0x14e   : > { %v584_v61 = vadd.f32 %v2990_v27, %v570_v54 }
 0x14f   : > { %v651_v59 = vpack.c.bf16 %v636_v38, %v635_v52  ;;  %v652_v60 = vpack.c.bf16 %v2992_v55, %v2991_v53  ;;  %v571_v40 = vmul.f32 %v2989_v19, %v557_v56  ;;  %v601_v62 = vrot.slane %v579_v57, 2  ;;  %v3809_v52 = vld [vmem:[%s4433_s12 + $0x8] sm:$0xff] }
 0x150   : > { %v598_v63 = vrot.slane %v584_v61, 2 }
 0x151   : > { %3142 = vmatprep.mubr.msk.bf16.mxu0 %vm452_vm0, %v651_v59  ;;  %v585_v48 = vadd.f32 %v2990_v27, %v571_v40  ;;  %v644_v3 = vcombine.low %v600_v1, %v601_v62  ;;  %v2994_v5 = vcombine.high %v600_v1, %v601_v62 }
 0x152   : > { %3143 = vmatmul.mubr.msk.bf16.vlgmr.msra.gmra.mxu0 %vm452_vm0, %v652_v60  ;;  %v3816_v60 = vld [vmem:[%s4433_s12 + $0x10] sm:$0xff] }
 0x153   : > { %v599_v0 = vrot.slane %v585_v48, 2  ;;  %3164 = vmatprep.mubr.msk.bf16.mxu0 %vm3572_vm1, %v3571_v7 }
 0x155   : > { %v643_v2 = vcombine.low %v598_v63, %v599_v0  ;;  %v2993_v4 = vcombine.high %v598_v63, %v599_v0 }
 0x157   : > { %v653_v49 = vpack.c.bf16 %v644_v3, %v643_v2  ;;  %v654_v6 = vpack.c.bf16 %v2994_v5, %v2993_v4  ;;  %v3823_v5 = vld [vmem:[%s4433_s12 + $0x28] sm:$0xff] }
 0x159   : > { %3146 = vmatprep.mubr.msk.bf16.mxu1 %vm452_vm0, %v653_v49  ;;  %v3828_v49 = vld [vmem:[%s4433_s12 + $0x18] sm:$0xff] }
 0x15a   : > { %3147 = vmatmul.mubr.msk.bf16.vlgmr.msra.gmra.mxu1 %vm452_vm0, %v654_v6 }
 0x15b   : > { %3152 = vmatprep.mubr.msk.bf16.mxu1 %vm3572_vm1, %v3571_v7 }
 0x212   : > { %v3144_v8 = vpop.f32.mrf.mxu0 }
 0x213   : > { %v725_v12 = vadd.f32 %v3144_v8, %v2995_v9 }
 0x214   : > { %v716_v10 = vpop.f32.mrf.mxu0 }
 0x215   : > { %v717_v15 = vadd.f32 %v2995_v9, %v716_v10 }
 0x216   : > { %v3145_v11 = vpop.f32.mrf.mxu0 }
 0x217   : > { %v728_v13 = vadd.f32 %v3145_v11, %v2995_v9 }
 0x218   : > { %v719_v14 = vpop.f32.mrf.mxu0 }
 0x219   : > { %v3758_v16 = vpack.c.bf16 %v728_v13, %v725_v12  ;;  %v720_v17 = vadd.f32 %v2995_v9, %v719_v14  ;;  %v3834_v12 = vld [vmem:[%s4433_s12 + $0x20] sm:$0xff] }
 0x21a   : > { %v3148_v18 = vpop.f32.mrf.mxu1 }
 0x21b   : > { %v3760_v19 = vpack.c.bf16 %v720_v17, %v717_v15  ;;  %803 = vrot.lane.b32.xlu1 %v3758_v16, %s3573_s22  ;;  %v741_v31 = vadd.f32 %v3148_v18, %v2995_v9 }
 0x21c   : > { %v732_v22 = vpop.f32.mrf.mxu1 }
 0x21d   : > { %752 = vrot.lane.b32.xlu0 %v3760_v19, %s3573_s22  ;;  %v733_v25 = vadd.f32 %v2995_v9, %v732_v22 }
 0x21e   : > { %v3149_v23 = vpop.f32.mrf.mxu1 }
 0x21f   : > { %v744_v27 = vadd.f32 %v3149_v23, %v2995_v9 }
 0x220   : > { %v735_v24 = vpop.f32.mrf.mxu1 }
 0x221   : > { %v736_v26 = vadd.f32 %v2995_v9, %v735_v24  ;;  %v3767_v32 = vpack.c.bf16 %v744_v27, %v741_v31 }
 0x223   : > { %v3764_v30 = vpack.c.bf16 %v736_v26, %v733_v25  ;;  %v3847_v26 = vld [vmem:[%s4433_s12 + $0x30] sm:$0xff] }
 0x225   : > { %853 = vrot.lane.b32.xlu1 %v3764_v30, %s3573_s22 }
 0x229   : > { %903 = vrot.lane.b32.xlu1 %v3767_v32, %s3573_s22 }
 0x28d   : > { %v804_v34 = vpop.permute.xlu1 %803 }
 0x28e   : > { %v809_v36 = vsel %vm754_vm2, %v804_v34, 0 }
 0x28f   : > { %v753_v20 = vpop.permute.xlu0 %752 }
 0x290   : > { %v759_v33 = vsel %vm754_vm2, %v753_v20, 0  ;;  %v3852_v20 = vld [vmem:[%s4433_s12 + $0x38] sm:$0xff] }
 0x291   : > { %3151 = vmatpush3.bf16.xpose.msra.mxu1 %v759_v33 }
 0x292   : > { %3156 = vmatprep.subr.bf16.mxu1 %v3571_v7 }
 0x297   : > { %v854_v35 = vpop.permute.xlu1 %853 }
 0x298   : > { %v859_v37 = vsel %vm754_vm2, %v854_v35, 0  ;;  %3153 = vmatmul.mubr.msk.bf16.vlgmr.msra.gmra.mxu1 %vm754_vm2, %v3760_v19 }
 0x299   : > { %3157 = vmatpush3.bf16.xpose.msra.mxu1 %v809_v36  ;;  %3163 = vmatpush3.bf16.xpose.msra.mxu0 %v859_v37 }
 0x29a   : > { %3158 = vmatprep.mubr.msk.bf16.mxu1 %vm3572_vm1, %v3571_v7  ;;  %3168 = vmatprep.subr.bf16.mxu1 %v3571_v7 }
 0x29b   : > { %3174 = vmatprep.subr.bf16.mxu0 %v3571_v7  ;;  %v904_v39 = vpop.permute.xlu1 %903 }
 0x29c   : > { %v909_v28 = vsel %vm754_vm2, %v904_v39, 0 }
 0x2a0   : > { %3159 = vmatmul.mubr.msk.bf16.vlgmr.msra.gmra.mxu1 %vm754_vm2, %v3758_v16  ;;  %3165 = vmatmul.mubr.msk.bf16.vlgmr.msra.gmra.mxu0 %vm754_vm2, %v3764_v30 }
 0x2a1   : > { %3169 = vmatpush3.bf16.xpose.msra.mxu1 %v909_v28  ;;  %3170 = vmatprep.mubr.msk.bf16.mxu1 %vm3572_vm1, %v3571_v7 }
 0x2a2   : > { %3180 = vmatprep.subr.bf16.mxu1 %v3571_v7  ;;  %3176 = vmatprep.mubr.msk.bf16.mxu0 %vm3572_vm1, %v3571_v7 }
 0x2a8   : > { %3171 = vmatmul.mubr.msk.bf16.vlgmr.msra.gmra.mxu1 %vm754_vm2, %v3767_v32 }
 0x2a9   : > { %3182 = vmatprep.mubr.msk.bf16.mxu1 %vm3572_vm1, %v3571_v7 }
 0x358   : > { %v795_v41 = vpop.f32.mrf.mxu1 }
 0x359   : > { %v952_v42 = vmul.f32 0.35355338, %v795_v41 }
 0x35a   : > { %v3154_v43 = vpop.f32.mrf.mxu1 }
 0x35b   : > { %v962_v45 = vadd.f32 %v960_v21, %v952_v42 }
 0x35c   : > { %v798_v46 = vpop.f32.mrf.mxu1 }
 0x35d   : > { %v953_v50 = vmul.f32 0.35355338, %v798_v46  ;;  %v978_v51 = vadd.f32 %v3800_v44, %v962_v45 }
 0x35e   : > { %v3155_v29 = vpop.f32.mrf.mxu1 }
 0x35f   : > { %v963_v53 = vadd.f32 %v961_v47, %v953_v50  ;;  %v986_v54 = vsel %vm452_vm0, %v978_v51, -inf }
 0x360   : > { %v895_v38 = vpop.f32.mrf.mxu0  ;;  %987 = vmax.xlane.f32.xlu0 %v986_v54  ;;  %v845_v55 = vpop.f32.mrf.mxu1 }
 0x361   : > { %v954_v56 = vmul.f32 0.35355338, %v845_v55  ;;  %v979_v57 = vadd.f32 %v3809_v52, %v963_v53  ;;  %v956_v40 = vmul.f32 0.35355338, %v895_v38 }
 0x362   : > { %v3160_v58 = vpop.f32.mrf.mxu1  ;;  %v3166_v59 = vpop.f32.mrf.mxu0 }
 0x363   : > { %v964_v61 = vadd.f32 %v960_v21, %v954_v56  ;;  %v989_v48 = vsel %vm452_vm0, %v979_v57, -inf  ;;  %v966_v6 = vadd.f32 %v960_v21, %v956_v40 }
 0x364   : > { %v898_v62 = vpop.f32.mrf.mxu0  ;;  %990 = vmax.xlane.f32.xlu1 %v989_v48  ;;  %v848_v63 = vpop.f32.mrf.mxu1 }
 0x365   : > { %v957_v0 = vmul.f32 0.35355338, %v898_v62  ;;  %v955_v1 = vmul.f32 0.35355338, %v848_v63  ;;  %v980_v2 = vadd.f32 %v3816_v60, %v964_v61  ;;  %v982_v24 = vadd.f32 %v3834_v12, %v966_v6 }
 0x366   : > { %v3161_v3 = vpop.f32.mrf.mxu1  ;;  %v3167_v4 = vpop.f32.mrf.mxu0 }
 0x367   : > { %v967_v8 = vadd.f32 %v961_v47, %v957_v0  ;;  %v965_v9 = vadd.f32 %v961_v47, %v955_v1  ;;  %v992_v10 = vsel %vm452_vm0, %v980_v2, -inf  ;;  %v998_v34 = vsel %vm452_vm0, %v982_v24, -inf }
 0x368   : > { %993 = vmax.xlane.f32.xlu0 %v992_v10  ;;  %v945_v11 = vpop.f32.mrf.mxu1 }
 0x369   : > { %v958_v13 = vmul.f32 0.35355338, %v945_v11  ;;  %v983_v14 = vadd.f32 %v3823_v5, %v967_v8  ;;  %v3838_v15 = vadd.f32 %v3828_v49, %v965_v9 }
 0x36a   : > { %v3172_v17 = vpop.f32.mrf.mxu1 }
 0x36b   : > { %v968_v18 = vadd.f32 %v960_v21, %v958_v13  ;;  %v1001_v22 = vsel %vm452_vm0, %v983_v14, -inf  ;;  %v995_v23 = vsel %vm452_vm0, %v3838_v15, -inf }
 0x36c   : > { %1002 = vmax.xlane.f32.xlu1 %v1001_v22  ;;  %996 = vmax.xlane.f32.xlu0 %v995_v23  ;;  %v948_v25 = vpop.f32.mrf.mxu1 }
 0x36d   : > { %v959_v27 = vmul.f32 0.35355338, %v948_v25  ;;  %v984_v35 = vadd.f32 %v3847_v26, %v968_v18 }
 0x36e   : > { %v3173_v31 = vpop.f32.mrf.mxu1 }
 0x36f   : > { %v969_v33 = vadd.f32 %v961_v47, %v959_v27  ;;  %v1004_v37 = vsel %vm452_vm0, %v984_v35, -inf }
 0x370   : > { %999 = vmax.xlane.f32.xlu0 %v998_v34 }
 0x371   : > { %v3857_v36 = vadd.f32 %v3852_v20, %v969_v33 }
 0x373   : > { %v1007_v39 = vsel %vm452_vm0, %v3857_v36, -inf }
 0x374   : > { %1005 = vmax.xlane.f32.xlu0 %v1004_v37  ;;  %1008 = vmax.xlane.f32.xlu1 %v1007_v39 }
 0x3e9   : > { %v988_v28 = vpop.xlane.xlu0 %987 }
 0x3ea   : > { %v1010_v41 = vsub.f32 %v978_v51, %v988_v28 }
 0x3ec   : > { %v1018_v21 = vmul.f32 1.442695, %v1010_v41 }
 0x3ed   : > { %v991_v42 = vpop.xlane.xlu1 %990 }
 0x3ee   : > { %3475 = vpow2.f32 %v1018_v21  ;;  %v1011_v43 = vsub.f32 %v979_v57, %v991_v42 }
 0x3f0   : > { %v1020_v45 = vmul.f32 1.442695, %v1011_v43 }
 0x3f1   : > { %v994_v46 = vpop.xlane.xlu0 %993 }
 0x3f2   : > { %3477 = vpow2.f32 %v1020_v45  ;;  %v1012_v53 = vsub.f32 %v980_v2, %v994_v46 }
 0x3f4   : > { %v1022_v58 = vmul.f32 1.442695, %v1012_v53 }
 0x3f5   : > { %v1003_v47 = vpop.xlane.xlu1 %1002  ;;  %v997_v50 = vpop.xlane.xlu0 %996 }
 0x3f6   : > { %v1015_v29 = vsub.f32 %v983_v14, %v1003_v47  ;;  %v1013_v3 = vsub.f32 %v3838_v15, %v997_v50 }
 0x3f8   : > { %v1028_v54 = vmul.f32 1.442695, %v1015_v29  ;;  %v1024_v6 = vmul.f32 1.442695, %v1013_v3 }
 0x3f9   : > { %v1000_v38 = vpop.xlane.xlu0 %999 }
 0x3fa   : > { %3479 = vpow2.f32 %v1028_v54  ;;  %v1014_v55 = vsub.f32 %v982_v24, %v1000_v38 }
 0x3fb   : > { %v3862_v56 = vpop.eup %3475 }
 0x3fc   : > { %v1026_v59 = vmul.f32 1.442695, %v1014_v55  ;;  %v1034_v51 = vsel %vm452_vm0, %v3862_v56, 0.0 }
 0x3fd   : > { %1035 = vadd.xlane.f32.xlu0 %v1034_v51  ;;  %v1006_v2 = vpop.xlane.xlu0 %1005  ;;  %v1009_v14 = vpop.xlane.xlu1 %1008 }
 0x3fe   : > { %3481 = vpow2.f32 %v1026_v59  ;;  %v1016_v4 = vsub.f32 %v984_v35, %v1006_v2  ;;  %v1017_v15 = vsub.f32 %v3857_v36, %v1009_v14 }
 0x3ff   : > { %v3478_v57 = vpop.eup %3477  ;;  %3483 = vpow2.f32 %v1022_v58 }
 0x400   : > { %v1037_v40 = vsel %vm452_vm0, %v3478_v57, 0.0  ;;  %v1030_v8 = vmul.f32 1.442695, %v1016_v4  ;;  %3485 = vpow2.f32 %v1024_v6  ;;  %v1032_v17 = vmul.f32 1.442695, %v1017_v15 }
 0x401   : > { %1038 = vadd.xlane.f32.xlu1 %v1037_v40 }
 0x402   : > { %3487 = vpow2.f32 %v1030_v8 }
 0x403   : > { %3489 = vpow2.f32 %v1032_v17 }
 0x407   : > { %v3867_v61 = vpop.eup %3479 }
 0x408   : > { %v1049_v48 = vsel %vm452_vm0, %v3867_v61, 0.0 }
 0x409   : > { %1050 = vadd.xlane.f32.xlu1 %v1049_v48 }
 0x40b   : > { %v3871_v62 = vpop.eup %3481 }
 0x40c   : > { %v1046_v63 = vsel %vm452_vm0, %v3871_v62, 0.0  ;;  %v3875_v0 = vpop.eup %3483 }
 0x40d   : > { %1047 = vadd.xlane.f32.xlu0 %v1046_v63  ;;  %v1040_v1 = vsel %vm452_vm0, %v3875_v0, 0.0  ;;  %v3884_v9 = vpop.eup %3485 }
 0x40e   : > { %v1043_v13 = vsel %vm452_vm0, %v3884_v9, 0.0 }
 0x40f   : > { %v3886_v10 = vpop.eup %3487 }
 0x410   : > { %v1052_v11 = vsel %vm452_vm0, %v3886_v10, 0.0  ;;  %v3898_v18 = vpop.eup %3489 }
 0x411   : > { %1041 = vadd.xlane.f32.xlu0 %v1040_v1  ;;  %v1055_v22 = vsel %vm452_vm0, %v3898_v18, 0.0 }
 0x41a   : > { %1125 = vrot.lane.b32.xlu1 %v3758_v16, %s3574_s17 }
 0x41e   : > { %1172 = vrot.lane.b32.xlu1 %v3764_v30, %s3574_s17 }
 0x422   : > { %1219 = vrot.lane.b32.xlu1 %v3767_v32, %s3574_s17 }
 0x427   : > { %1078 = vrot.lane.b32.xlu0 %v3760_v19, %s3574_s17 }
 0x446   : > { %1053 = vadd.xlane.f32.xlu0 %v1052_v11  ;;  %1044 = vadd.xlane.f32.xlu1 %v1043_v13 }
 0x457   : > { %1324 = vrot.lane.b32.xlu1 %v3758_v16, %s3575_s18 }
 0x45c   : > { %1273 = vrot.lane.b32.xlu0 %v3760_v19, %s3575_s18 }
 0x460   : > { %1271 = vrot.lane.b32.xlu0 %v3760_v19, %s3576_s19 }
 0x464   : > { %1322 = vrot.lane.b32.xlu0 %v3758_v16, %s3576_s19 }
 0x468   : > { %1373 = vrot.lane.b32.xlu0 %v3764_v30, %s3576_s19 }
 0x47b   : > { %1056 = vadd.xlane.f32.xlu1 %v1055_v22 }
 0x486   : > { %v1036_v24 = vpop.xlane.xlu0 %1035 }
 0x48a   : > { %v1039_v23 = vpop.xlane.xlu1 %1038 }
 0x48b   : > { %3491 = vrcp.f32 %v1039_v23 }
 0x48c   : > { %1375 = vrot.lane.b32.xlu1 %v3764_v30, %s3575_s18  ;;  %3493 = vrcp.f32 %v1036_v24 }
 0x490   : > { %1426 = vrot.lane.b32.xlu1 %v3767_v32, %s3575_s18 }
 0x492   : > { %v1051_v25 = vpop.xlane.xlu1 %1050 }
 0x493   : > { %3495 = vrcp.f32 %v1051_v25 }
 0x494   : > { %1424 = vrot.lane.b32.xlu1 %v3767_v32, %s3576_s19 }
 0x496   : > { %v1048_v27 = vpop.xlane.xlu0 %1047  ;;  %v1126_v31 = vpop.permute.xlu1 %1125 }
 0x497   : > { %3497 = vrcp.f32 %v1048_v27  ;;  %3181 = vmatpush3.bf16.msra.mxu1 %v1126_v31  ;;  %v3013_v31 = vld [vmem:[%s4428_s7 + $0x10] sm:$0xff] }
 0x498   : > { %3192 = vmatprep.subr.bf16.mxu1 %v3571_v7  ;;  %v3492_v33 = vpop.eup %3491 }
 0x499   : > { %v3494_v35 = vpop.eup %3493  ;;  %v1067_v36 = vmul.f32 %v3492_v33, %v3478_v57 }
 0x49a   : > { %v1042_v34 = vpop.xlane.xlu0 %1041  ;;  %v1066_v39 = vmul.f32 %v3494_v35, %v3862_v56  ;;  %v1173_v21 = vpop.permute.xlu1 %1172 }
 0x49b   : > { %3499 = vrcp.f32 %v1042_v34 }
 0x49c   : > { %v1074_v28 = vpack.c.bf16 %v1067_v36, %v1066_v39 }
 0x49e   : > { %v1079_v37 = vpop.permute.xlu0 %1078  ;;  %v1220_v47 = vpop.permute.xlu1 %1219 }
 0x49f   : > { %3175 = vmatpush3.bf16.msra.mxu0 %v1079_v37  ;;  %v3014_v37 = vld [vmem:[%s4428_s7 + $0x18] sm:$0xff] }
 0x4a0   : > { %3186 = vmatprep.subr.bf16.mxu0 %v3571_v7  ;;  %v3496_v41 = vpop.eup %3495 }
 0x4a1   : > { %v1071_v45 = vmul.f32 %v3496_v41, %v3867_v61 }
 0x4a2   : > { %3177 = vmatmul.mubr.msk.bf16.vlgmr.msra.gmra.mxu0 %vm452_vm0, %v1074_v28 }
 0x4a3   : > { %3187 = vmatpush3.bf16.msra.mxu0 %v1173_v21  ;;  %3188 = vmatprep.mubr.msk.bf16.mxu0 %vm3572_vm1, %v3571_v7 }
 0x4a4   : > { %v3498_v42 = vpop.eup %3497  ;;  %3198 = vmatprep.subr.bf16.mxu0 %v3571_v7 }
 0x4a5   : > { %v1070_v43 = vmul.f32 %v3498_v42, %v3871_v62 }
 0x4a7   : > { %v1076_v46 = vpack.c.bf16 %v1071_v45, %v1070_v43 }
 0x4a8   : > { %v3500_v55 = vpop.eup %3499 }
 0x4a9   : > { %v1068_v58 = vmul.f32 %v3500_v55, %v3875_v0 }
 0x4aa   : > { %3189 = vmatmul.mubr.msk.bf16.vlgmr.msra.gmra.mxu0 %vm452_vm0, %v1076_v46 }
 0x4ab   : > { %3200 = vmatprep.mubr.msk.bf16.mxu0 %vm3572_vm1, %v3571_v7 }
 0x4cf   : > { %v1054_v50 = vpop.xlane.xlu0 %1053  ;;  %v1045_v29 = vpop.xlane.xlu1 %1044 }
 0x4d0   : > { %3501 = vrcp.f32 %v1045_v29 }
 0x4d1   : > { %3503 = vrcp.f32 %v1054_v50 }
 0x4d3   : > { %v1274_v53 = vpop.permute.xlu0 %1273  ;;  %v1325_v57 = vpop.permute.xlu1 %1324 }
 0x4d4   : > { %v1279_v54 = vsel %vm754_vm2, %v1274_v53, 0  ;;  %v1330_v6 = vsel %vm754_vm2, %v1325_v57, 0 }
 0x4d5   : > { %3199 = vmatpush3.bf16.xpose.msra.mxu0 %v1279_v54 }
 0x4d6   : > { %3210 = vmatprep.subr.bf16.mxu0 %v3571_v7 }
 0x4d7   : > { %v1272_v38 = vpop.permute.xlu0 %1271 }
 0x4db   : > { %v1323_v62 = vpop.permute.xlu0 %1322 }
 0x4dc   : > { %3201 = vmatmul.mubr.msk.bf16.vlgmr.msra.gmra.mxu0 %vm754_vm2, %v1272_v38 }
 0x4dd   : > { %3212 = vmatprep.mubr.msk.bf16.mxu0 %vm3572_vm1, %v3571_v7  ;;  %v3502_v56 = vpop.eup %3501 }
 0x4de   : > { %v1069_v59 = vmul.f32 %v3502_v56, %v3884_v9  ;;  %v3504_v63 = vpop.eup %3503 }
 0x4df   : > { %v1374_v0 = vpop.permute.xlu0 %1373  ;;  %v1072_v2 = vmul.f32 %v3504_v63, %v3886_v10 }
 0x4e0   : > { %v1075_v51 = vpack.c.bf16 %v1069_v59, %v1068_v58 }
 0x4e2   : > { %3183 = vmatmul.mubr.msk.bf16.vlgmr.msra.gmra.mxu1 %vm452_vm0, %v1075_v51 }
 0x4e3   : > { %3193 = vmatpush3.bf16.msra.mxu1 %v1220_v47  ;;  %3194 = vmatprep.mubr.msk.bf16.mxu1 %vm3572_vm1, %v3571_v7 }
 0x4e4   : > { %3204 = vmatprep.subr.bf16.mxu1 %v3571_v7 }
 0x504   : > { %v1057_v40 = vpop.xlane.xlu1 %1056 }
 0x505   : > { %3505 = vrcp.f32 %v1057_v40 }
 0x508   : > { %v1376_v61 = vpop.permute.xlu1 %1375 }
 0x509   : > { %v1381_v48 = vsel %vm754_vm2, %v1376_v61, 0 }
 0x50a   : > { %3211 = vmatpush3.bf16.xpose.msra.mxu0 %v1381_v48 }
 0x50b   : > { %3222 = vmatprep.subr.bf16.mxu0 %v3571_v7 }
 0x50c   : > { %v1427_v8 = vpop.permute.xlu1 %1426 }
 0x50d   : > { %v1432_v9 = vsel %vm754_vm2, %v1427_v8, 0 }
 0x510   : > { %v1425_v10 = vpop.permute.xlu1 %1424 }
 0x511   : > { %3213 = vmatmul.mubr.msk.bf16.vlgmr.msra.gmra.mxu0 %vm754_vm2, %v1374_v0 }
 0x512   : > { %v3506_v1 = vpop.eup %3505  ;;  %3224 = vmatprep.mubr.msk.bf16.mxu0 %vm3572_vm1, %v3571_v7 }
 0x513   : > { %v1073_v3 = vmul.f32 %v3506_v1, %v3898_v18 }
 0x515   : > { %v1077_v4 = vpack.c.bf16 %v1073_v3, %v1072_v2 }
 0x517   : > { %3195 = vmatmul.mubr.msk.bf16.vlgmr.msra.gmra.mxu1 %vm452_vm0, %v1077_v4 }
 0x518   : > { %3205 = vmatpush3.bf16.xpose.msra.mxu1 %v1330_v6  ;;  %3206 = vmatprep.mubr.msk.bf16.mxu1 %vm3572_vm1, %v3571_v7 }
 0x519   : > { %3216 = vmatprep.subr.bf16.mxu1 %v3571_v7 }
 0x51f   : > { %3207 = vmatmul.mubr.msk.bf16.vlgmr.msra.gmra.mxu1 %vm754_vm2, %v1323_v62 }
 0x520   : > { %3217 = vmatpush3.bf16.xpose.msra.mxu1 %v1432_v9  ;;  %3218 = vmatprep.mubr.msk.bf16.mxu1 %vm3572_vm1, %v3571_v7 }
 0x521   : > { %3228 = vmatprep.subr.bf16.mxu1 %v3571_v7 }
 0x527   : > { %3219 = vmatmul.mubr.msk.bf16.vlgmr.msra.gmra.mxu1 %vm754_vm2, %v1425_v10 }
 0x528   : > { %3230 = vmatprep.mubr.msk.bf16.mxu1 %vm3572_vm1, %v3571_v7 }
 0x562   : > { %v3948_v11 = vpop.f32.mrf.mxu0 }
 0x564   : > { %v3178_v13 = vpop.f32.mrf.mxu0 }
 0x566   : > { %v3950_v14 = vpop.f32.mrf.mxu0 }
 0x567   : > { %v1266_v15 = vpack.c.bf16 %v3950_v14, %v3948_v11 }
 0x568   : > { %v3179_v17 = vpop.f32.mrf.mxu0 }
 0x56a   : > { %v3954_v18 = vpop.f32.mrf.mxu0 }
 0x56c   : > { %v3190_v22 = vpop.f32.mrf.mxu0 }
 0x56e   : > { %v3956_v23 = vpop.f32.mrf.mxu0 }
 0x56f   : > { %v1268_v24 = vpack.c.bf16 %v3956_v23, %v3954_v18 }
 0x570   : > { %v3191_v25 = vpop.f32.mrf.mxu0 }
 0x59c   : > { %v1315_v27 = vpop.f32.mrf.mxu0 }
 0x59d   : > { %v1475_v33 = vmul.f32 0.35355338, %v1315_v27 }
 0x59e   : > { %v3202_v34 = vpop.f32.mrf.mxu0 }
 0x59f   : > { %v1486_v35 = vadd.f32 %v3013_v31, %v1475_v33 }
 0x5a0   : > { %v1318_v36 = vpop.f32.mrf.mxu0 }
 0x5a1   : > { %v1476_v39 = vmul.f32 0.35355338, %v1318_v36  ;;  %v1502_v28 = vadd.f32 %v1486_v35, %v3800_v44 }
 0x5a2   : > { %v3203_v41 = vpop.f32.mrf.mxu0  ;;  %v3967_v42 = vpop.f32.mrf.mxu1 }
 0x5a3   : > { %v1487_v21 = vadd.f32 %v3014_v37, %v1476_v39  ;;  %v1510_v43 = vsel %vm452_vm0, %v1502_v28, -inf }
 0x5a4   : > { %1511 = vmax.xlane.f32.xlu0 %v1510_v43  ;;  %v3184_v45 = vpop.f32.mrf.mxu1 }
 0x5a5   : > { %v1503_v46 = vadd.f32 %v1487_v21, %v3809_v52 }
 0x5a6   : > { %v3971_v47 = vpop.f32.mrf.mxu1 }
 0x5a7   : > { %v1513_v50 = vsel %vm452_vm0, %v1503_v46, -inf  ;;  %v1267_v29 = vpack.c.bf16 %v3971_v47, %v3967_v42 }
 0x5a8   : > { %1514 = vmax.xlane.f32.xlu1 %v1513_v50  ;;  %v3185_v53 = vpop.f32.mrf.mxu1 }
 0x5d1   : > { %v1417_v44 = vpop.f32.mrf.mxu0 }
 0x5d2   : > { %v1479_v1 = vmul.f32 0.35355338, %v1417_v44 }
 0x5d3   : > { %v3214_v54 = vpop.f32.mrf.mxu0 }
 0x5d5   : > { %v1420_v38 = vpop.f32.mrf.mxu0 }
 0x5d6   : > { %v1480_v55 = vmul.f32 0.35355338, %v1420_v38 }
 0x5d7   : > { %v3976_v56 = vpop.f32.mrf.mxu1  ;;  %v3215_v58 = vpop.f32.mrf.mxu0 }
 0x5d8   : > { %v1491_v59 = vadd.f32 %v3014_v37, %v1480_v55 }
 0x5d9   : > { %v3196_v51 = vpop.f32.mrf.mxu1 }
 0x5da   : > { %v1507_v52 = vadd.f32 %v1491_v59, %v3823_v5  ;;  %v1490_v5 = vadd.f32 %v3013_v31, %v1479_v1 }
 0x5db   : > { %v3979_v57 = vpop.f32.mrf.mxu1 }
 0x5dc   : > { %v1269_v40 = vpack.c.bf16 %v3979_v57, %v3976_v56  ;;  %v1525_v61 = vsel %vm452_vm0, %v1507_v52, -inf  ;;  %v1506_v34 = vadd.f32 %v1490_v5, %v3834_v12 }
 0x5dd   : > { %1526 = vmax.xlane.f32.xlu1 %v1525_v61  ;;  %v3197_v48 = vpop.f32.mrf.mxu1 }
 0x5de   : > { %v1522_v41 = vsel %vm452_vm0, %v1506_v34, -inf }
 0x5df   : > { %v1366_v62 = vpop.f32.mrf.mxu1 }
 0x5e0   : > { %v1477_v63 = vmul.f32 0.35355338, %v1366_v62 }
 0x5e1   : > { %v3208_v0 = vpop.f32.mrf.mxu1 }
 0x5e2   : > { %v1488_v2 = vadd.f32 %v3013_v31, %v1477_v63 }
 0x5e3   : > { %v1369_v3 = vpop.f32.mrf.mxu1 }
 0x5e4   : > { %v1478_v4 = vmul.f32 0.35355338, %v1369_v3  ;;  %v1504_v6 = vadd.f32 %v1488_v2, %v3816_v60 }
 0x5e5   : > { %v3209_v8 = vpop.f32.mrf.mxu1 }
 0x5e6   : > { %v1489_v9 = vadd.f32 %v3014_v37, %v1478_v4  ;;  %v1516_v10 = vsel %vm452_vm0, %v1504_v6, -inf }
 0x5e7   : > { %1517 = vmax.xlane.f32.xlu0 %v1516_v10  ;;  %v1468_v13 = vpop.f32.mrf.mxu1 }
 0x5e8   : > { %v1481_v17 = vmul.f32 0.35355338, %v1468_v13  ;;  %v1505_v22 = vadd.f32 %v1489_v9, %v3828_v49 }
 0x5e9   : > { %v3220_v25 = vpop.f32.mrf.mxu1 }
 0x5ea   : > { %v1492_v27 = vadd.f32 %v3013_v31, %v1481_v17  ;;  %v1519_v33 = vsel %vm452_vm0, %v1505_v22, -inf }
 0x5eb   : > { %1520 = vmax.xlane.f32.xlu0 %v1519_v33  ;;  %v1471_v35 = vpop.f32.mrf.mxu1 }
 0x5ec   : > { %v1482_v36 = vmul.f32 0.35355338, %v1471_v35  ;;  %v1508_v21 = vadd.f32 %v1492_v27, %v3847_v26 }
 0x5ed   : > { %v3221_v60 = vpop.f32.mrf.mxu1 }
 0x5ee   : > { %v1493_v39 = vadd.f32 %v3014_v37, %v1482_v36  ;;  %v1528_v49 = vsel %vm452_vm0, %v1508_v21, -inf }
 0x5ef   : > { %1523 = vmax.xlane.f32.xlu0 %v1522_v41 }
 0x5f0   : > { %v1509_v43 = vadd.f32 %v1493_v39, %v3852_v20 }
 0x5f2   : > { %v1531_v31 = vsel %vm452_vm0, %v1509_v43, -inf }
 0x5f3   : > { %1529 = vmax.xlane.f32.xlu0 %v1528_v49  ;;  %1532 = vmax.xlane.f32.xlu1 %v1531_v31 }
 0x62d   : > { %v1512_v45 = vpop.xlane.xlu0 %1511 }
 0x62e   : > { %v1534_v12 = vsub.f32 %v1502_v28, %v1512_v45 }
 0x630   : > { %v1542_v50 = vmul.f32 1.442695, %v1534_v12 }
 0x631   : > { %v1515_v53 = vpop.xlane.xlu1 %1514 }
 0x632   : > { %3507 = vpow2.f32 %v1542_v50  ;;  %v1535_v44 = vsub.f32 %v1503_v46, %v1515_v53 }
 0x634   : > { %v1544_v37 = vmul.f32 1.442695, %v1535_v44 }
 0x636   : > { %3509 = vpow2.f32 %v1544_v37 }
 0x63f   : > { %v3994_v54 = vpop.eup %3507 }
 0x640   : > { %v1558_v26 = vsel %vm452_vm0, %v3994_v54, 0.0 }
 0x641   : > { %1559 = vadd.xlane.f32.xlu0 %v1558_v26 }
 0x643   : > { %v3998_v20 = vpop.eup %3509 }
 0x644   : > { %v1561_v38 = vsel %vm452_vm0, %v3998_v20, 0.0 }
 0x645   : > { %1562 = vadd.xlane.f32.xlu1 %v1561_v38 }
 0x666   : > { %v1527_v55 = vpop.xlane.xlu1 %1526 }
 0x667   : > { %v1539_v59 = vsub.f32 %v1507_v52, %v1527_v55 }
 0x669   : > { %v1552_v48 = vmul.f32 1.442695, %v1539_v59 }
 0x670   : > { %v1518_v28 = vpop.xlane.xlu0 %1517 }
 0x671   : > { %v1536_v58 = vsub.f32 %v1504_v6, %v1518_v28 }
 0x673   : > { %v1546_v51 = vmul.f32 1.442695, %v1536_v58 }
 0x674   : > { %v1521_v46 = vpop.xlane.xlu0 %1520 }
 0x675   : > { %3511 = vpow2.f32 %v1546_v51  ;;  %v1537_v61 = vsub.f32 %v1505_v22, %v1521_v46  ;;  %v1270_v46 = vld [vmem:[%s4426_s5] sm:$0xf] }
 0x677   : > { %v1548_v62 = vmul.f32 1.442695, %v1537_v61 }
 0x678   : > { %v1524_v63 = vpop.xlane.xlu0 %1523 }
 0x679   : > { %3513 = vpow2.f32 %v1548_v62  ;;  %v1538_v0 = vsub.f32 %v1506_v34, %v1524_v63 }
 0x67a   : > { %3515 = vpow2.f32 %v1552_v48 }
 0x67b   : > { %v1550_v1 = vmul.f32 1.442695, %v1538_v0 }
 0x67c   : > { %v1530_v2 = vpop.xlane.xlu0 %1529  ;;  %v1533_v27 = vpop.xlane.xlu1 %1532 }
 0x67d   : > { %3517 = vpow2.f32 %v1550_v1  ;;  %v1540_v3 = vsub.f32 %v1508_v21, %v1530_v2  ;;  %v1541_v33 = vsub.f32 %v1509_v43, %v1533_v27  ;;  %v1889_v2 = vsel %vm1807_vm3, %v1270_v46, 0 }
 0x67f   : > { %v1554_v4 = vmul.f32 1.442695, %v1540_v3  ;;  %v1556_v34 = vmul.f32 1.442695, %v1541_v33  ;;  %v1794_v3 = vld [vmem:[%s4426_s5 + $0x4] sm:$0xf] }
 0x681   : > { %3519 = vpow2.f32 %v1554_v4  ;;  %v1809_v4 = vsel %vm1807_vm3, %v1794_v3, 0 }
 0x682   : > { %v3512_v8 = vpop.eup %3511  ;;  %3521 = vpow2.f32 %v1556_v34 }
 0x683   : > { %v1564_v6 = vsel %vm452_vm0, %v3512_v8, 0.0 }
 0x684   : > { %1565 = vadd.xlane.f32.xlu0 %v1564_v6 }
 0x686   : > { %v3514_v52 = vpop.eup %3513 }
 0x687   : > { %v1567_v5 = vsel %vm452_vm0, %v3514_v52, 0.0  ;;  %v3516_v9 = vpop.eup %3515 }
 0x688   : > { %1568 = vadd.xlane.f32.xlu1 %v1567_v5  ;;  %v1573_v17 = vsel %vm452_vm0, %v3516_v9, 0.0 }
 0x68a   : > { %v3518_v10 = vpop.eup %3517 }
 0x68b   : > { %v1570_v13 = vsel %vm452_vm0, %v3518_v10, 0.0 }
 0x68c   : > { %1571 = vadd.xlane.f32.xlu0 %v1570_v13  ;;  %1574 = vadd.xlane.f32.xlu1 %v1573_v17 }
 0x68e   : > { %v4006_v22 = vpop.eup %3519 }
 0x68f   : > { %v1576_v25 = vsel %vm452_vm0, %v4006_v22, 0.0  ;;  %v3522_v35 = vpop.eup %3521 }
 0x690   : > { %1577 = vadd.xlane.f32.xlu0 %v1576_v25  ;;  %v1579_v36 = vsel %vm452_vm0, %v3522_v35, 0.0 }
 0x69d   : > { %1649 = vrot.lane.b32.xlu1 %v3758_v16, %s3577_s24 }
 0x6a1   : > { %1696 = vrot.lane.b32.xlu1 %v3764_v30, %s3577_s24 }
 0x6a6   : > { %1602 = vrot.lane.b32.xlu0 %v3760_v19, %s3577_s24 }
 0x6c5   : > { %1580 = vadd.xlane.f32.xlu1 %v1579_v36 }
 0x6ca   : > { %v1560_v39 = vpop.xlane.xlu0 %1559 }
 0x6ce   : > { %v1563_v60 = vpop.xlane.xlu1 %1562 }
 0x6cf   : > { %3523 = vrcp.f32 %v1563_v60 }
 0x6d0   : > { %3525 = vrcp.f32 %v1560_v39 }
 0x6d6   : > { %1743 = vrot.lane.b32.xlu1 %v3767_v32, %s3577_s24  ;;  %s3579_s24 = smov 32  }
 0x6dc   : > { %v3524_v21 = vpop.eup %3523 }
 0x6dd   : > { %v3526_v31 = vpop.eup %3525  ;;  %v1591_v45 = vmul.f32 %v3524_v21, %v3998_v20 }
 0x6de   : > { %v1590_v50 = vmul.f32 %v3526_v31, %v3994_v54 }
 0x6e0   : > { %v1598_v44 = vpack.c.bf16 %v1591_v45, %v1590_v50 }
 0x70d   : > { %v1566_v41 = vpop.xlane.xlu0 %1565 }
 0x70e   : > { %3527 = vrcp.f32 %v1566_v41 }
 0x711   : > { %v1569_v16 = vpop.xlane.xlu1 %1568 }
 0x712   : > { %3529 = vrcp.f32 %v1569_v16 }
 0x715   : > { %v1572_v30 = vpop.xlane.xlu0 %1571  ;;  %v1575_v19 = vpop.xlane.xlu1 %1574 }
 0x716   : > { %3531 = vrcp.f32 %v1572_v30  ;;  %v3027_v30 = vld [vmem:[%s4427_s6] ss:$0 sm:$0xff] }
 0x717   : > { %3533 = vrcp.f32 %v1575_v19 }
 0x719   : > { %v1578_v43 = vpop.xlane.xlu0 %1577  ;;  %v1650_v49 = vpop.permute.xlu1 %1649 }
 0x71a   : > { %3229 = vmatpush3.bf16.msra.mxu1 %v1650_v49  ;;  %3535 = vrcp.f32 %v1578_v43 }
 0x71b   : > { %3240 = vmatprep.subr.bf16.mxu1 %v3571_v7  ;;  %v3528_v32 = vpop.eup %3527 }
 0x71c   : > { %v1592_v37 = vmul.f32 %v3528_v32, %v3512_v8 }
 0x71d   : > { %v1603_v12 = vpop.permute.xlu0 %1602  ;;  %v1697_v38 = vpop.permute.xlu1 %1696 }
 0x71e   : > { %3223 = vmatpush3.bf16.msra.mxu0 %v1603_v12 }
 0x71f   : > { %v3530_v53 = vpop.eup %3529  ;;  %3234 = vmatprep.subr.bf16.mxu0 %v3571_v7 }
 0x720   : > { %v1593_v26 = vmul.f32 %v3530_v53, %v3514_v52 }
 0x721   : > { %3225 = vmatmul.mubr.msk.bf16.vlgmr.msra.gmra.mxu0 %vm452_vm0, %v1598_v44 }
 0x722   : > { %3235 = vmatpush3.bf16.msra.mxu0 %v1697_v38  ;;  %v1599_v55 = vpack.c.bf16 %v1593_v26, %v1592_v37  ;;  %3236 = vmatprep.mubr.msk.bf16.mxu0 %vm3572_vm1, %v3571_v7 }
 0x723   : > { %v3532_v20 = vpop.eup %3531  ;;  %3310 = vmatprep.subr.msk.bf16.mxu0 %vm1807_vm3, %v1794_v3 }
 0x724   : > { %v3534_v28 = vpop.eup %3533  ;;  %3231 = vmatmul.mubr.msk.bf16.vlgmr.msra.gmra.mxu1 %vm452_vm0, %v1599_v55  ;;  %v1594_v54 = vmul.f32 %v3532_v20, %v3518_v10 }
 0x725   : > { %v1595_v58 = vmul.f32 %v3534_v28, %v3516_v9  ;;  %3242 = vmatprep.mubr.msk.bf16.mxu1 %vm3572_vm1, %v3571_v7 }
 0x727   : > { %v1600_v59 = vpack.c.bf16 %v1595_v58, %v1594_v54  ;;  %v3536_v48 = vpop.eup %3535 }
 0x728   : > { %v1596_v63 = vmul.f32 %v3536_v48, %v4006_v22 }
 0x729   : > { %3237 = vmatmul.mubr.msk.bf16.vlgmr.msra.gmra.mxu0 %vm452_vm0, %v1600_v59 }
 0x72a   : > { %3247 = vmatpush3.bf16.msra.mxu0 %v1809_v4 }
 0x74e   : > { %v1581_v51 = vpop.xlane.xlu1 %1580 }
 0x74f   : > { %3537 = vrcp.f32 %v1581_v51 }
 0x752   : > { %v1744_v61 = vpop.permute.xlu1 %1743 }
 0x753   : > { %3241 = vmatpush3.bf16.msra.mxu1 %v1744_v61 }
 0x754   : > { %3311 = vmatprep.subr.msk.bf16.mxu1 %vm1807_vm3, %v1270_v46 }
 0x75c   : > { %v3538_v62 = vpop.eup %3537 }
 0x75d   : > { %v1597_v0 = vmul.f32 %v3538_v62, %v3522_v35 }
 0x75f   : > { %v1601_v1 = vpack.c.bf16 %v1597_v0, %v1596_v63 }
 0x761   : > { %3243 = vmatmul.mubr.msk.bf16.vlgmr.msra.gmra.mxu1 %vm452_vm0, %v1601_v1 }
 0x762   : > { %3258 = vmatprep.mubr.msk.bf16.mxu1 %vm754_vm2, %v1266_v15  ;;  %3257 = vmatpush3.bf16.msra.mxu1 %v1889_v2 }
 0x769   : > { %3259 = vmatmul.mubr.msk.bf16.vlgmr.msra.gmra.mxu1 %vm754_vm2, %v1267_v29 }
 0x76a   : > { %3262 = vmatprep.mubr.msk.bf16.mxu1 %vm754_vm2, %v1268_v24 }
 0x771   : > { %3263 = vmatmul.mubr.msk.bf16.gmra.mxu1 %vm754_vm2, %v1269_v40 }
 0x7e1   : > { %v1642_v11 = vpop.f32.mrf.mxu0 }
 0x7e3   : > { %v3226_v14 = vpop.f32.mrf.mxu0 }
 0x7e4   : > { %v1689_v15 = vpop.f32.mrf.mxu1 }
 0x7e5   : > { %v1645_v8 = vpop.f32.mrf.mxu0 }
 0x7e6   : > { %v1790_v42 = vpack.c.bf16 %v1645_v8, %v1642_v11  ;;  %v3232_v47 = vpop.f32.mrf.mxu1 }
 0x7e7   : > { %v3227_v29 = vpop.f32.mrf.mxu0 }
 0x7e8   : > { %v1692_v6 = vpop.f32.mrf.mxu1  ;;  %3248 = vmatprep.mubr.msk.bf16.mxu0 %vm754_vm2, %v1790_v42 }
 0x7e9   : > { %v1791_v52 = vpack.c.bf16 %v1692_v6, %v1689_v15  ;;  %v1736_v18 = vpop.f32.mrf.mxu0 }
 0x7ea   : > { %v3233_v23 = vpop.f32.mrf.mxu1 }
 0x7eb   : > { %v3238_v24 = vpop.f32.mrf.mxu0  ;;  %3249 = vmatmul.mubr.msk.bf16.vlgmr.msra.gmra.mxu0 %vm754_vm2, %v1791_v52  ;;  %v3555_v52 = vld [vmem:[%s3666_s30] sm:$0xff] }
 0x7ed   : > { %v1739_v5 = vpop.f32.mrf.mxu0 }
 0x7ee   : > { %v1792_v56 = vpack.c.bf16 %v1739_v5, %v1736_v18 }
 0x7ef   : > { %v3239_v57 = vpop.f32.mrf.mxu0 }
 0x7f0   : > { %3252 = vmatprep.mubr.msk.bf16.mxu0 %vm754_vm2, %v1792_v56  ;;  %v3556_v57 = vld [vmem:[%s3666_s30 + $0x8] sm:$0xff] }
 0x821   : > { %v1783_v40 = vpop.f32.mrf.mxu1 }
 0x823   : > { %v3244_v9 = vpop.f32.mrf.mxu1 }
 0x824   : > { %v3557_v9 = vld [vmem:[%s3666_s30 + $0x10] sm:$0xff] }
 0x825   : > { %v1786_v10 = vpop.f32.mrf.mxu1 }
 0x826   : > { %v1793_v13 = vpack.c.bf16 %v1786_v10, %v1783_v40 }
 0x827   : > { %v3245_v17 = vpop.f32.mrf.mxu1 }
 0x828   : > { %3253 = vmatmul.mubr.msk.bf16.gmra.mxu0 %vm754_vm2, %v1793_v13 }
 0x829   : > { %v3260_v22 = vpop.f32.mrf.mxu1 }
 0x82b   : > { %v1925_v25 = vpop.f32.mrf.mxu1 }
 0x82d   : > { %v3261_v33 = vpop.f32.mrf.mxu1 }
 0x82f   : > { %v1928_v35 = vpop.f32.mrf.mxu1 }
 0x831   : > { %v3264_v60 = vpop.f32.mrf.mxu1 }
 0x833   : > { %v1941_v16 = vpop.f32.mrf.mxu1 }
 0x835   : > { %v3265_v45 = vpop.f32.mrf.mxu1 }
 0x837   : > { %v1944_v20 = vpop.f32.mrf.mxu1 }
 0x8ab   : > { %v3250_v27 = vpop.f32.mrf.mxu0 }
 0x8ac   : > { %v1934_v41 = vadd.f32 %v3260_v22, %v3250_v27  ;;  %v3558_v27 = vld [vmem:[%s3666_s30 + $0x28] sm:$0xff] }
 0x8ad   : > { %v1845_v34 = vpop.f32.mrf.mxu0 }
 0x8ae   : > { %v1926_v21 = vadd.f32 %v1925_v25, %v1845_v34  ;;  %v1965_v31 = vadd.f32 %v3027_v30, %v1934_v41 }
 0x8af   : > { %v3251_v36 = vpop.f32.mrf.mxu0 }
 0x8b0   : > { %v1937_v43 = vadd.f32 %v3261_v33, %v3251_v36  ;;  %v1963_v53 = vadd.f32 %v3027_v30, %v1926_v21  ;;  %v1981_v26 = vcombine.low %v1965_v31, %v1965_v31  ;;  %v3028_v1 = vcombine.high %v1965_v31, %v1965_v31  ;;  %v3559_v36 = vld [vmem:[%s3666_s30 + $0x18] sm:$0xff] }
 0x8b1   : > { %v1848_v39 = vpop.f32.mrf.mxu0 }
 0x8b2   : > { %v1929_v19 = vadd.f32 %v1928_v35, %v1848_v39  ;;  %v1966_v44 = vadd.f32 %v3027_v30, %v1937_v43  ;;  %v1973_v46 = vcombine.high %v1963_v53, %v1963_v53  ;;  %v1989_v48 = vsel %vm1807_vm3, %v1963_v53, %v1981_v26  ;;  %v3561_v43 = vld [vmem:[%s3666_s30 + $0x20] sm:$0xff] }
 0x8b3   : > { %v2025_v8 = vrot.slane %v1989_v48, 6 }
 0x8b4   : > { %v1964_v32 = vadd.f32 %v3027_v30, %v1929_v19  ;;  %v3029_v61 = vcombine.high %v1966_v44, %v1966_v44  ;;  %v1983_v42 = vcombine.low %v1966_v44, %v1966_v44  ;;  %v1990_v6 = vsel %vm1807_vm3, %v1973_v46, %v3028_v1 }
 0x8b5   : > { %v4076_v10 = vadd.f32 %v3557_v9, %v2025_v8  ;;  %v2026_v13 = vrot.slane %v1990_v6, 6 }
 0x8b6   : > { %v1974_v28 = vcombine.high %v1964_v32, %v1964_v32  ;;  %v1991_v17 = vsel %vm1807_vm3, %v1964_v32, %v1983_v42 }
 0x8b7   : > { %v2064_v35 = vsel %vm452_vm0, %v4076_v10, 0.0  ;;  %v2027_v39 = vrot.slane %v1991_v17, 6 }
 0x8b8   : > { %v1992_v2 = vsel %vm1807_vm3, %v1974_v28, %v3029_v61 }
 0x8b9   : > { %v2028_v24 = vrot.slane %v1992_v2, 6 }
 0x8bb   : > { %v4082_v33 = vadd.f32 %v3558_v27, %v2028_v24 }
 0x8e8   : > { %v3254_v49 = vpop.f32.mrf.mxu0 }
 0x8e9   : > { %v1950_v38 = vadd.f32 %v3264_v60, %v3254_v49  ;;  %v4087_v60 = vadd.f32 %v3559_v36, %v2026_v13  ;;  %v4098_v49 = vadd.f32 %v3561_v43, %v2027_v39 }
 0x8ea   : > { %v1861_v12 = vpop.f32.mrf.mxu0 }
 0x8eb   : > { %v1942_v50 = vadd.f32 %v1941_v16, %v1861_v12  ;;  %v1969_v62 = vadd.f32 %v3027_v30, %v1950_v38  ;;  %v2073_v16 = vsel %vm452_vm0, %v4082_v33, 0.0  ;;  %v2067_v21 = vsel %vm452_vm0, %v4087_v60, 0.0  ;;  %v3562_v12 = vld [vmem:[%s3666_s30 + $0x30] sm:$0xff] }
 0x8ec   : > { %v3255_v37 = vpop.f32.mrf.mxu0  ;;  %v2070_v32 = vsel %vm452_vm0, %v4098_v49, 0.0 }
 0x8ed   : > { %v1953_v55 = vadd.f32 %v3265_v45, %v3255_v37  ;;  %v1967_v58 = vadd.f32 %v3027_v30, %v1942_v50  ;;  %v3030_v47 = vcombine.high %v1969_v62, %v1969_v62  ;;  %v2003_v22 = vcombine.low %v1969_v62, %v1969_v62 }
 0x8ee   : > { %v1864_v54 = vpop.f32.mrf.mxu0 }
 0x8ef   : > { %v1970_v59 = vadd.f32 %v3027_v30, %v1953_v55  ;;  %v1945_v51 = vadd.f32 %v1944_v20, %v1864_v54  ;;  %v1995_v3 = vcombine.high %v1967_v58, %v1967_v58  ;;  %v2011_v41 = vsel %vm1807_vm3, %v1967_v58, %v2003_v22 }
 0x8f0   : > { %v2029_v31 = vrot.slane %v2011_v41, 6 }
 0x8f1   : > { %v2005_v63 = vcombine.low %v1970_v59, %v1970_v59  ;;  %v1968_v0 = vadd.f32 %v3027_v30, %v1945_v51  ;;  %v3031_v4 = vcombine.high %v1970_v59, %v1970_v59  ;;  %v2012_v5 = vsel %vm1807_vm3, %v1995_v3, %v3030_v47  ;;  %v3560_v30 = vld [vmem:[%s3666_s30 + $0x38] sm:$0xff]  ;;  %s4392_s30 = scalar_lea.vmem %s4434_s13, %s3070_s27 }
 0x8f2   : > { %v2030_v34 = vrot.slane %v2012_v5, 6  ;;  %v4105_v50 = vadd.f32 %v3562_v12, %v2029_v31 }
 0x8f3   : > { %v1996_v11 = vcombine.high %v1968_v0, %v1968_v0  ;;  %v2013_v14 = vsel %vm1807_vm3, %v1968_v0, %v2005_v63 }
 0x8f4   : > { %v2023_v15 = vrot.slane %v2013_v14, 6  ;;  %v4093_v19 = vadd.f32 %v3560_v30, %v2030_v34  ;;  %v2076_v53 = vsel %vm452_vm0, %v4105_v50, 0.0 }
 0x8f5   : > { %v2014_v29 = vsel %vm1807_vm3, %v1996_v11, %v3031_v4 }
 0x8f6   : > { %v4067_v18 = vadd.f32 %v3555_v52, %v2023_v15  ;;  %v2024_v23 = vrot.slane %v2014_v29, 6  ;;  %v2079_v45 = vsel %vm452_vm0, %v4093_v19, 0.0 }
 0x8f8   : > { %v2058_v56 = vsel %vm452_vm0, %v4067_v18, 0.0  ;;  %v4073_v40 = vadd.f32 %v3556_v57, %v2024_v23 }
 0x8f9   : > { %2059 = vadd.xlane.f32.xlu0 %v2058_v56 }
 0x8fa   : > { %v2061_v25 = vsel %vm452_vm0, %v4073_v40, 0.0 }
 0x8fb   : > { %2062 = vadd.xlane.f32.xlu1 %v2061_v25 }
 0x8fd   : > { %2065 = vadd.xlane.f32.xlu0 %v2064_v35 }
 0x8ff   : > { %2074 = vadd.xlane.f32.xlu1 %v2073_v16 }
 0x901   : > { %2068 = vadd.xlane.f32.xlu0 %v2067_v21 }
 0x903   : > { %2080 = vadd.xlane.f32.xlu1 %v2079_v45 }
 0x905   : > { %2071 = vadd.xlane.f32.xlu0 %v2070_v32 }
 0x909   : > { %2077 = vadd.xlane.f32.xlu0 %v2076_v53 }
 0x982   : > { %v2060_v44 = vpop.xlane.xlu0 %2059 }
 0x983   : > { %v2082_v37 = vmul.f32 0.0625, %v2060_v44 }
 0x984   : > { %v2063_v26 = vpop.xlane.xlu1 %2062 }
 0x985   : > { %v4114_v38 = vsub.f32 %v4067_v18, %v2082_v37  ;;  %v2083_v55 = vmul.f32 0.0625, %v2063_v26 }
 0x986   : > { %v2066_v20 = vpop.xlane.xlu0 %2065 }
 0x987   : > { %v4117_v28 = vsub.f32 %v4073_v40, %v2083_v55  ;;  %v2084_v54 = vmul.f32 0.0625, %v2066_v20  ;;  %v2098_v58 = vmul.f32 %v4114_v38, %v4114_v38 }
 0x988   : > { %v2075_v59 = vpop.xlane.xlu1 %2074 }
 0x989   : > { %v4122_v51 = vsub.f32 %v4076_v10, %v2084_v54  ;;  %v2087_v7 = vmul.f32 0.0625, %v2075_v59  ;;  %v2106_v46 = vsel %vm452_vm0, %v2098_v58, 0.0  ;;  %v2099_v61 = vmul.f32 %v4117_v28, %v4117_v28  ;;  %v3032_v59 = vld [vmem:[%s4429_s8] ss:$0 sm:$0xff] }
 0x98a   : > { %2107 = vadd.xlane.f32.xlu0 %v2106_v46  ;;  %v2069_v48 = vpop.xlane.xlu0 %2068 }
 0x98b   : > { %v2085_v62 = vmul.f32 0.0625, %v2069_v48  ;;  %v2109_v63 = vsel %vm452_vm0, %v2099_v61, 0.0  ;;  %v2100_v0 = vmul.f32 %v4122_v51, %v4122_v51  ;;  %v4131_v2 = vsub.f32 %v4082_v33, %v2087_v7 }
 0x98c   : > { %2110 = vadd.xlane.f32.xlu1 %v2109_v63  ;;  %v2081_v1 = vpop.xlane.xlu1 %2080 }
 0x98d   : > { %v4134_v3 = vsub.f32 %v4087_v60, %v2085_v62  ;;  %v2089_v4 = vmul.f32 0.0625, %v2081_v1  ;;  %v2112_v11 = vsel %vm452_vm0, %v2100_v0, 0.0  ;;  %v2103_v6 = vmul.f32 %v4131_v2, %v4131_v2  ;;  %v3033_v62 = vld [vmem:[%s4430_s9] ss:$0 sm:$0xff] }
 0x98e   : > { %2113 = vadd.xlane.f32.xlu0 %v2112_v11  ;;  %v2072_v14 = vpop.xlane.xlu0 %2071 }
 0x98f   : > { %v2086_v15 = vmul.f32 0.0625, %v2072_v14  ;;  %v2101_v8 = vmul.f32 %v4134_v3, %v4134_v3  ;;  %v4140_v42 = vsub.f32 %v4093_v19, %v2089_v4  ;;  %v2121_v56 = vsel %vm452_vm0, %v2103_v6, 0.0 }
 0x991   : > { %v4143_v47 = vsub.f32 %v4098_v49, %v2086_v15  ;;  %v2115_v29 = vsel %vm452_vm0, %v2101_v8, 0.0  ;;  %v2105_v9 = vmul.f32 %v4140_v42, %v4140_v42 }
 0x992   : > { %2116 = vadd.xlane.f32.xlu1 %v2115_v29  ;;  %v2078_v52 = vpop.xlane.xlu0 %2077 }
 0x993   : > { %v2088_v23 = vmul.f32 0.0625, %v2078_v52  ;;  %v2102_v24 = vmul.f32 %v4143_v47, %v4143_v47  ;;  %v2127_v17 = vsel %vm452_vm0, %v2105_v9, 0.0 }
 0x995   : > { %v4151_v5 = vsub.f32 %v4105_v50, %v2088_v23  ;;  %v2118_v57 = vsel %vm452_vm0, %v2102_v24, 0.0 }
 0x996   : > { %2122 = vadd.xlane.f32.xlu1 %v2121_v56  ;;  %2119 = vadd.xlane.f32.xlu0 %v2118_v57 }
 0x997   : > { %v2104_v13 = vmul.f32 %v4151_v5, %v4151_v5 }
 0x999   : > { %v2124_v22 = vsel %vm452_vm0, %v2104_v13, 0.0 }
 0x99a   : > { %2128 = vadd.xlane.f32.xlu1 %v2127_v17  ;;  %2125 = vadd.xlane.f32.xlu0 %v2124_v22 }
 0xa13   : > { %v2108_v25 = vpop.xlane.xlu0 %2107 }
 0xa14   : > { %v2130_v27 = vmul.f32 0.0625, %v2108_v25 }
 0xa15   : > { %v2111_v34 = vpop.xlane.xlu1 %2110 }
 0xa16   : > { %v2138_v35 = vadd.f32 1e-05, %v2130_v27  ;;  %v2131_v36 = vmul.f32 0.0625, %v2111_v34 }
 0xa17   : > { %v2114_v39 = vpop.xlane.xlu0 %2113 }
 0xa18   : > { %3539 = vrsqrt.f32 %v2138_v35  ;;  %v2139_v41 = vadd.f32 1e-05, %v2131_v36  ;;  %v2132_v16 = vmul.f32 0.0625, %v2114_v39 }
 0xa1a   : > { %3541 = vrsqrt.f32 %v2139_v41  ;;  %v2140_v30 = vadd.f32 1e-05, %v2132_v16 }
 0xa1b   : > { %v2117_v21 = vpop.xlane.xlu1 %2116 }
 0xa1c   : > { %3543 = vrsqrt.f32 %v2140_v30  ;;  %v2133_v43 = vmul.f32 0.0625, %v2117_v21 }
 0xa1e   : > { %v2141_v31 = vadd.f32 1e-05, %v2133_v43 }
 0xa1f   : > { %v2123_v45 = vpop.xlane.xlu1 %2122  ;;  %v2120_v32 = vpop.xlane.xlu0 %2119 }
 0xa20   : > { %3545 = vrsqrt.f32 %v2141_v31  ;;  %v2135_v12 = vmul.f32 0.0625, %v2123_v45  ;;  %v2134_v53 = vmul.f32 0.0625, %v2120_v32 }
 0xa22   : > { %v2143_v44 = vadd.f32 1e-05, %v2135_v12  ;;  %v2142_v37 = vadd.f32 1e-05, %v2134_v53 }
 0xa23   : > { %v2129_v26 = vpop.xlane.xlu1 %2128  ;;  %v2126_v55 = vpop.xlane.xlu0 %2125 }
 0xa24   : > { %3547 = vrsqrt.f32 %v2143_v44  ;;  %v2137_v20 = vmul.f32 0.0625, %v2129_v26  ;;  %v2136_v54 = vmul.f32 0.0625, %v2126_v55 }
 0xa25   : > { %v3540_v58 = vpop.eup %3539  ;;  %3549 = vrsqrt.f32 %v2142_v37 }
 0xa26   : > { %v2154_v7 = vmul.f32 %v3540_v58, %v4114_v38  ;;  %v2145_v46 = vadd.f32 1e-05, %v2137_v20  ;;  %v2144_v61 = vadd.f32 1e-05, %v2136_v54 }
 0xa27   : > { %v3542_v48 = vpop.eup %3541 }
 0xa28   : > { %v2168_v63 = vmul.f32 %v3032_v59, %v2154_v7  ;;  %v2155_v0 = vmul.f32 %v3542_v48, %v4117_v28  ;;  %3551 = vrsqrt.f32 %v2145_v46 }
 0xa29   : > { %v3544_v1 = vpop.eup %3543  ;;  %3553 = vrsqrt.f32 %v2144_v61 }
 0xa2a   : > { %v2182_v4 = vadd.f32 %v3033_v62, %v2168_v63  ;;  %v2169_v11 = vmul.f32 %v3032_v59, %v2155_v0  ;;  %v2156_v14 = vmul.f32 %v3544_v1, %v4122_v51 }
 0xa2c   : > { %v2198_v15 = vrot.slane %v2182_v4, 7  ;;  %v2183_v38 = vadd.f32 %v3033_v62, %v2169_v11  ;;  %v2170_v8 = vmul.f32 %v3032_v59, %v2156_v14 }
 0xa2d   : > { %v3546_v29 = vpop.eup %3545 }
 0xa2e   : > { %v2215_v6 = vsel %vm2214_vm5, 0.0, %v2198_v15  ;;  %v2223_v52 = vsel %vm2214_vm5, %v2198_v15, 0.0  ;;  %v2199_v23 = vrot.slane %v2183_v38, 7  ;;  %v2184_v24 = vadd.f32 %v3033_v62, %v2170_v8  ;;  %v3450_v15 = vld [vmem:[%s4431_s10 + $0x28] sm:$0xff]  }
 0xa2f   : > { %2232 = vst.msk [vmem:[#allocation2 + $0x10] sm:$0xff] %vm452_vm0, %v2215_v6  ;;  %v2157_v28 = vmul.f32 %v3546_v29, %v4134_v3  ;;  %3266 = vmatprep.subr.bf16.mxu0 %v3450_v15 }
 0xa30   : > { %2234 = vst.msk [vmem:[#allocation2 + $0x18] sm:$0x3] %vm2233_vm4, %v2223_v52  ;;  %v2216_v56 = vsel %vm2214_vm5, 0.0, %v2199_v23  ;;  %v2224_v51 = vsel %vm2214_vm5, %v2199_v23, 0.0  ;;  %v2200_v57 = vrot.slane %v2184_v24, 7  ;;  %v2262_v24 = vld [vmem:[#allocation2 + $0x1] sm:$0xff]  ;;  %3267 = vmatpush3.bf16.msra.mxu0 %v3450_v15 }
 0xa31   : > { %v3548_v9 = vpop.eup %3547  ;;  %2235 = vst.msk [vmem:[#allocation2 + $0x20] sm:$0xff] %vm452_vm0, %v2216_v56  ;;  %v2171_v13 = vmul.f32 %v3032_v59, %v2157_v28  ;;  %v3451_v28 = vld [vmem:[%s4431_s10 + $0x20] sm:$0xff]  }
 0xa32   : > { %2236 = vst.msk [vmem:[#allocation2 + $0x28] sm:$0x3] %vm2233_vm4, %v2224_v51  ;;  %v3550_v17 = vpop.eup %3549  ;;  %v2217_v22 = vsel %vm2214_vm5, 0.0, %v2200_v57  ;;  %v2225_v25 = vsel %vm2214_vm5, %v2200_v57, 0.0  ;;  %v2159_v27 = vmul.f32 %v3548_v9, %v4131_v2  ;;  %v3452_v9 = vld [vmem:[%s4431_s10 + $0x18] sm:$0xff]   ;;  %3268 = vmatprep.subr.bf16.mxu0 %v3451_v28 }
 0xa33   : > { %2237 = vst.msk [vmem:[#allocation2 + $0x30] sm:$0xff] %vm452_vm0, %v2217_v22  ;;  %v2185_v3 = vadd.f32 %v3033_v62, %v2171_v13  ;;  %v2158_v34 = vmul.f32 %v3550_v17, %v4143_v47 }
 0xa34   : > { %2238 = vst.msk [vmem:[#allocation2 + $0x38] sm:$0x3] %vm2233_vm4, %v2225_v25  ;;  %v2173_v35 = vmul.f32 %v3032_v59, %v2159_v27  ;;  %3269 = vmatpush3.bf16.msra.mxu0 %v3451_v28 }
 0xa35   : > { %v3552_v36 = vpop.eup %3551  ;;  %v2201_v39 = vrot.slane %v2185_v3, 7  ;;  %v2172_v41 = vmul.f32 %v3032_v59, %v2158_v34  ;;  %3270 = vmatprep.subr.bf16.mxu0 %v3452_v9  ;;  %v3453_v3 = vld [vmem:[%s4431_s10 + $0x10] sm:$0xff]   ;;  %v2270_v34 = vld [vmem:[#allocation2 + $0x2] sm:$0xff] }
 0xa36   : > { %v3554_v16 = vpop.eup %3553  ;;  %v2187_v30 = vadd.f32 %v3033_v62, %v2173_v35  ;;  %v2161_v21 = vmul.f32 %v3552_v36, %v4140_v42  ;;  %3280 = vmatprep.subr.bf16.mxu1 %v3453_v3 }
 0xa37   : > { %v2218_v43 = vsel %vm2214_vm5, 0.0, %v2201_v39  ;;  %v2226_v31 = vsel %vm2214_vm5, %v2201_v39, 0.0  ;;  %v2186_v2 = vadd.f32 %v3033_v62, %v2172_v41  ;;  %v2160_v45 = vmul.f32 %v3554_v16, %v4151_v5  ;;  %v2263_v56 = vld [vmem:[#allocation2 + $0x11] sm:$0xff]  ;;  %v4240_v39 = vld [vmem:[%s4431_s10 + $0x40] sm:$0xff]   ;;  %3281 = vmatpush3.bf16.msra.mxu1 %v3453_v3 }
 0xa38   : > { %2239 = vst.msk [vmem:[#allocation2 + $0x40] sm:$0xff] %vm452_vm0, %v2218_v43  ;;  %v2203_v47 = vrot.slane %v2187_v30, 7  ;;  %v2175_v32 = vmul.f32 %v3032_v59, %v2161_v21  ;;  %v3359_v13 = vpack.i.bf16 %v2263_v56, %v2262_v24  ;;  %3271 = vmatpush3.bf16.msra.mxu0 %v3452_v9  ;;  %v2271_v35 = vld [vmem:[#allocation2 + $0x12] sm:$0xff]  ;;  %v3455_v30 = vld [vmem:[%s4431_s10 + $0x8] sm:$0xff]   ;;  %v3457_v43 = vld [vmem:[%s4431_s10] sm:$0xff]  }
 0xa39   : > { %2240 = vst.msk [vmem:[#allocation2 + $0x48] sm:$0x3] %vm2233_vm4, %v2226_v31  ;;  %v2202_v12 = vrot.slane %v2186_v2, 7  ;;  %v2174_v53 = vmul.f32 %v3032_v59, %v2160_v45  ;;  %v2378_v22 = vld [vmem:[#allocation2 + $0x21] sm:$0xff]  ;;  %v3369_v41 = vpack.i.bf16 %v2271_v35, %v2270_v34  ;;  %3294 = vmatprep.subr.bf16.mxu0 %v4240_v39  ;;  %3282 = vmatprep.subr.bf16.mxu1 %v3455_v30 }
 0xa3a   : > { %v2220_v44 = vsel %vm2214_vm5, 0.0, %v2203_v47  ;;  %v2228_v37 = vsel %vm2214_vm5, %v2203_v47, 0.0  ;;  %v2189_v42 = vadd.f32 %v3033_v62, %v2175_v32  ;;  %v3364_v25 = vpack.i.bf16 %v2378_v22, %v2263_v56  ;;  %v2386_v36 = vld [vmem:[#allocation2 + $0x22] sm:$0xff]  ;;  %v2691_v32 = vld [vmem:[#allocation2 + $0x91] sm:$0xff] }
 0xa3b   : > { %2243 = vst.msk [vmem:[#allocation2 + $0x60] sm:$0xff] %vm452_vm0, %v2220_v44  ;;  %v2219_v26 = vsel %vm2214_vm5, 0.0, %v2202_v12  ;;  %v2227_v5 = vsel %vm2214_vm5, %v2202_v12, 0.0  ;;  %v2188_v55 = vadd.f32 %v3033_v62, %v2174_v53  ;;  %v4205_v61 = vld [vmem:[#allocation2 + $0x31] sm:$0xff]  ;;  %v3379_v16 = vpack.i.bf16 %v2386_v36, %v2271_v35  ;;  %3283 = vmatpush3.bf16.msra.mxu1 %v3455_v30  ;;  %v2254_v56 = vld [vmem:[#allocation2] sm:$0xff] }
 0xa3c   : > { %2244 = vst.msk [vmem:[#allocation2 + $0x68] sm:$0x3] %vm2233_vm4, %v2228_v37  ;;  %2242 = vst.msk [vmem:[#allocation2 + $0x58] sm:$0x3] %vm2233_vm4, %v2227_v5  ;;  %v2205_v20 = vrot.slane %v2189_v42, 7  ;;  %v4211_v1 = vld [vmem:[#allocation2 + $0x32] sm:$0xff]  ;;  %3284 = vmatprep.subr.bf16.mxu1 %v3457_v43  ;;  %v3419_v2 = vpack.i.bf16 %v4205_v61, %v2378_v22 }
 0xa3d   : > { %2241 = vst.msk [vmem:[#allocation2 + $0x50] sm:$0xff] %vm452_vm0, %v2219_v26  ;;  %v2204_v54 = vrot.slane %v2188_v55, 7  ;;  %v3424_v45 = vpack.i.bf16 %v4211_v1, %v2386_v36  ;;  %v2699_v53 = vld [vmem:[#allocation2 + $0x92] sm:$0xff] }
 0xa3e   : > { %v2222_v58 = vsel %vm2214_vm5, 0.0, %v2205_v20  ;;  %v2230_v59 = vsel %vm2214_vm5, %v2205_v20, 0.0 }
 0xa3f   : > { %2247 = vst.msk [vmem:[#allocation2 + $0x80] sm:$0xff] %vm452_vm0, %v2222_v58  ;;  %v2221_v7 = vsel %vm2214_vm5, 0.0, %v2204_v54  ;;  %v2229_v46 = vsel %vm2214_vm5, %v2204_v54, 0.0  ;;  %3285 = vmatpush3.bf16.msra.mxu1 %v3457_v43 }
 0xa40   : > { %2248 = vst.msk [vmem:[#allocation2 + $0x88] sm:$0x3] %vm2233_vm4, %v2230_v59  ;;  %v2380_v48 = vld [vmem:[#allocation2 + $0x41] sm:$0xff]  ;;  %2246 = vst.msk [vmem:[#allocation2 + $0x78] sm:$0x3] %vm2233_vm4, %v2229_v46 }
 0xa41   : > { %2245 = vst.msk [vmem:[#allocation2 + $0x70] sm:$0xff] %vm452_vm0, %v2221_v7  ;;  %v3329_v62 = vpack.i.bf16 %v2380_v48, %v4205_v61  ;;  %v2388_v63 = vld [vmem:[#allocation2 + $0x42] sm:$0xff] }
 0xa42   : > { %v3334_v11 = vpack.i.bf16 %v2388_v63, %v4211_v1  ;;  %v4279_v15 = vld [vmem:[#allocation2 + $0x60] sm:$0xff] }
 0xa43   : > { %3330 = vrot.lane.b32.xlu1 %v3329_v62, %s3578_s21  ;;  %v2382_v0 = vld [vmem:[#allocation2 + $0x61] sm:$0xff] }
 0xa44   : > { %v2381_v4 = vld [vmem:[#allocation2 + $0x51] sm:$0xff]  ;;  %v2390_v8 = vld [vmem:[#allocation2 + $0x62] sm:$0xff] }
 0xa45   : > { %v3339_v14 = vpack.i.bf16 %v2382_v0, %v2381_v4  ;;  %v2389_v38 = vld [vmem:[#allocation2 + $0x52] sm:$0xff]  ;;  %v3374_v27 = vpack.i.bf16 %v2381_v4, %v2380_v48 }
 0xa46   : > { %v3344_v52 = vpack.i.bf16 %v2390_v8, %v2389_v38  ;;  %v3384_v21 = vpack.i.bf16 %v2389_v38, %v2388_v63  ;;  %v4273_v4 = vld [vmem:[#allocation2 + $0x30] sm:$0xff] }
 0xa47   : > { %3335 = vrot.lane.b32.xlu1 %v3334_v11, %s3579_s24  ;;  %3340 = vrot.lane.b32.xlu0 %v3339_v14, %s3578_s21  ;;  %v4219_v29 = vld [vmem:[#allocation2 + $0x81] sm:$0xff]  ;;  %v4277_v14 = vld [vmem:[#allocation2 + $0x50] sm:$0xff] }
 0xa48   : > { %v2383_v6 = vld [vmem:[#allocation2 + $0x71] sm:$0xff]  ;;  %v2392_v57 = vld [vmem:[#allocation2 + $0x82] sm:$0xff]  ;;  %v3434_v12 = vpack.i.bf16 %v2691_v32, %v4219_v29 }
 0xa49   : > { %v3349_v23 = vpack.i.bf16 %v4219_v29, %v2383_v6  ;;  %v2391_v51 = vld [vmem:[#allocation2 + $0x72] sm:$0xff]  ;;  %v3394_v31 = vpack.i.bf16 %v2383_v6, %v2382_v0  ;;  %v3444_v44 = vpack.i.bf16 %v2699_v53, %v2392_v57  ;;  %v4275_v11 = vld [vmem:[#allocation2 + $0x40] sm:$0xff] }
 0xa4a   : > { %v3354_v17 = vpack.i.bf16 %v2392_v57, %v2391_v51  ;;  %v3414_v47 = vpack.i.bf16 %v2391_v51, %v2390_v8 }
 0xa4b   : > { %3345 = vrot.lane.b32.xlu0 %v3344_v52, %s3579_s24  ;;  %3350 = vrot.lane.b32.xlu1 %v3349_v23, %s3578_s21 }
 0xa4f   : > { %3360 = vrot.lane.b32.xlu0 %v3359_v13, %s3578_s21  ;;  %3355 = vrot.lane.b32.xlu1 %v3354_v17, %s3579_s24 }
 0xa53   : > { %3365 = vrot.lane.b32.xlu0 %v3364_v25, %s3578_s21  ;;  %3375 = vrot.lane.b32.xlu1 %v3374_v27, %s3578_s21  ;;  %v2255_v25 = vld [vmem:[#allocation2 + $0x10] sm:$0xff] }
 0xa57   : > { %3370 = vrot.lane.b32.xlu0 %v3369_v41, %s3579_s24  ;;  %3380 = vrot.lane.b32.xlu1 %v3379_v16, %s3579_s24 }
 0xa5b   : > { %3390 = vrot.lane.b32.xlu0 %v3374_v27, %s3578_s21  ;;  %3385 = vrot.lane.b32.xlu1 %v3384_v21, %s3579_s24  ;;  %v4293_v27 = vld [vmem:[#allocation2 + $0x20] sm:$0xff] }
 0xa5f   : > { %3400 = vrot.lane.b32.xlu0 %v3384_v21, %s3579_s24  ;;  %3395 = vrot.lane.b32.xlu1 %v3394_v31, %s3578_s21 }
 0xa63   : > { %3420 = vrot.lane.b32.xlu0 %v3419_v2, %s3578_s21  ;;  %3405 = vrot.lane.b32.xlu1 %v3419_v2, %s3578_s21 }
 0xa67   : > { %3425 = vrot.lane.b32.xlu0 %v3424_v45, %s3579_s24  ;;  %3410 = vrot.lane.b32.xlu1 %v3424_v45, %s3579_s24 }
 0xa6b   : > { %3430 = vrot.lane.b32.xlu0 %v3394_v31, %s3578_s21  ;;  %3415 = vrot.lane.b32.xlu1 %v3414_v47, %s3579_s24 }
 0xa6f   : > { %3440 = vrot.lane.b32.xlu0 %v3414_v47, %s3579_s24  ;;  %3435 = vrot.lane.b32.xlu1 %v3434_v12, %s3578_s21 }
 0xa73   : > { %3445 = vrot.lane.b32.xlu1 %v3444_v44, %s3579_s24 }
 0xab5   : > { %v3331_v37 = vpop.permute.xlu1 %3330 }
 0xab6   : > { %v3333_v58 = vunpack.i.h.bf16 %v3331_v37  ;;  %v3332_v59 = vunpack.i.l.bf16 %v3331_v37 }
 0xab8   : > { %v2460_v52 = vsel %vm452_vm0, %v4275_v11, %v3333_v58  ;;  %v2459_v23 = vsel %vm452_vm0, %v4273_v4, %v3332_v59  ;;  %v4314_v59 = vld [vmem:[#allocation2 + $0x80] sm:$0xff] }
 0xab9   : > { %v3336_v42 = vpop.permute.xlu1 %3335  ;;  %v3341_v26 = vpop.permute.xlu0 %3340 }
 0xaba   : > { %v3343_v7 = vunpack.i.h.bf16 %v3341_v26  ;;  %v3342_v46 = vunpack.i.l.bf16 %v3341_v26  ;;  %v3338_v61 = vunpack.i.h.bf16 %v3336_v42  ;;  %v3337_v48 = vunpack.i.l.bf16 %v3336_v42  ;;  %v3456_v26 = vld [vmem:[%s4431_s10 + $0x38] sm:$0xff]  }
 0xabc   : > { %v2462_v24 = vsel %vm452_vm0, %v4279_v15, %v3343_v7  ;;  %v2461_v28 = vsel %vm452_vm0, %v4277_v14, %v3342_v46  ;;  %v2467_v51 = vsel %vm2350_vm6, %v2459_v23, %v3337_v48  ;;  %v2468_v57 = vsel %vm2350_vm6, %v2460_v52, %v3338_v61  ;;  %v4316_v7 = vld [vmem:[#allocation2 + $0x70] sm:$0xff] }
 0xabd   : > { %v4267_v5 = vpop.permute.xlu1 %3350  ;;  %v3346_v55 = vpop.permute.xlu0 %3345  ;;  %v2474_v44 = vpack.c.bf16 %v2468_v57, %v2467_v51  ;;  %v3458_v48 = vld [vmem:[%s4431_s10 + $0x30] sm:$0xff]  }
 0xabe   : > { %v3348_v62 = vunpack.i.h.bf16 %v3346_v55  ;;  %v3347_v63 = vunpack.i.l.bf16 %v3346_v55  ;;  %v3353_v37 = vunpack.i.h.bf16 %v4267_v5  ;;  %v3352_v42 = vunpack.i.l.bf16 %v4267_v5 }
 0xac0   : > { %v2469_v9 = vsel %vm2350_vm6, %v2461_v28, %v3347_v63  ;;  %v2470_v13 = vsel %vm2350_vm6, %v2462_v24, %v3348_v62  ;;  %v2463_v61 = vsel %vm452_vm0, %v4316_v7, %v3352_v42 }
 0xac1   : > { %v4269_v20 = vpop.permute.xlu1 %3355  ;;  %v3361_v54 = vpop.permute.xlu0 %3360  ;;  %v2475_v55 = vpack.c.bf16 %v2470_v13, %v2469_v9 }
 0xac2   : > { %v3363_v38 = vunpack.i.h.bf16 %v3361_v54  ;;  %v3362_v8 = vunpack.i.l.bf16 %v3361_v54  ;;  %v3358_v54 = vunpack.i.h.bf16 %v4269_v20  ;;  %v3357_v58 = vunpack.i.l.bf16 %v4269_v20 }
 0xac3   : > { %v2464_v20 = vsel %vm452_vm0, %v4314_v59, %v3353_v37 }
 0xac4   : > { %v2343_v41 = vsel %vm452_vm0, %v2255_v25, %v3363_v38  ;;  %v2342_v16 = vsel %vm452_vm0, %v2254_v56, %v3362_v8  ;;  %v2471_v62 = vsel %vm2350_vm6, %v2463_v61, %v3357_v58  ;;  %v2472_v63 = vsel %vm2350_vm6, %v2464_v20, %v3358_v54 }
 0xac5   : > { %v4271_v0 = vpop.permute.xlu1 %3375  ;;  %v3366_v1 = vpop.permute.xlu0 %3365  ;;  %v2476_v56 = vpack.c.bf16 %v2472_v63, %v2471_v62 }
 0xac6   : > { %v3368_v29 = vunpack.i.h.bf16 %v3366_v1  ;;  %v3367_v6 = vunpack.i.l.bf16 %v3366_v1  ;;  %v3378_v1 = vunpack.i.h.bf16 %v4271_v0  ;;  %v3377_v38 = vunpack.i.l.bf16 %v4271_v0 }
 0xac8   : > { %v2458_v30 = vsel %vm452_vm0, %v4293_v27, %v3368_v29  ;;  %v2457_v21 = vsel %vm452_vm0, %v2255_v25, %v3367_v6  ;;  %v2766_v0 = vsel %vm452_vm0, %v4275_v11, %v3377_v38 }
 0xac9   : > { %v3381_v17 = vpop.permute.xlu1 %3380  ;;  %v3371_v22 = vpop.permute.xlu0 %3370 }
 0xaca   : > { %v3383_v3 = vunpack.i.h.bf16 %v3381_v17  ;;  %v3382_v34 = vunpack.i.l.bf16 %v3381_v17  ;;  %v3373_v35 = vunpack.i.h.bf16 %v3371_v22  ;;  %v3372_v36 = vunpack.i.l.bf16 %v3371_v22 }
 0xacb   : > { %v2767_v17 = vsel %vm452_vm0, %v4277_v14, %v3378_v1 }
 0xacc   : > { %v2465_v43 = vsel %vm2350_vm6, %v2457_v21, %v3382_v34  ;;  %v2466_v31 = vsel %vm2350_vm6, %v2458_v30, %v3383_v3  ;;  %v2351_v2 = vsel %vm2350_vm6, %v2342_v16, %v3372_v36  ;;  %v2352_v45 = vsel %vm2350_vm6, %v2343_v41, %v3373_v35 }
 0xacd   : > { %v2473_v47 = vpack.c.bf16 %v2466_v31, %v2465_v43  ;;  %v2359_v32 = vpack.c.bf16 %v2352_v45, %v2351_v2  ;;  %v3386_v12 = vpop.permute.xlu1 %3385  ;;  %v3391_v53 = vpop.permute.xlu0 %3390 }
 0xace   : > { %v3392_v8 = vunpack.i.l.bf16 %v3391_v53  ;;  %v3388_v29 = vunpack.i.h.bf16 %v3386_v12  ;;  %v3387_v6 = vunpack.i.l.bf16 %v3386_v12 }
 0xacf   : > { %3272 = vmatprep.mubr.msk.bf16.mxu0 %vm2502_vm7, %v2473_v47  ;;  %3286 = vmatprep.mubr.msk.bf16.mxu1 %vm2502_vm7, %v2359_v32 }
 0xad0   : > { %3273 = vmatmul.mubr.msk.bf16.vlgmr.msra.gmra.mxu0 %vm2502_vm7, %v2474_v44  ;;  %v2346_v25 = vsel %vm452_vm0, %v4275_v11, %v3392_v8  ;;  %v2774_v3 = vsel %vm2350_vm6, %v2766_v0, %v3387_v6  ;;  %v2775_v34 = vsel %vm2350_vm6, %v2767_v17, %v3388_v29 }
 0xad1   : > { %v4318_v5 = vpop.permute.xlu1 %3395  ;;  %v3401_v46 = vpop.permute.xlu0 %3400  ;;  %3276 = vmatprep.mubr.msk.bf16.mxu0 %vm2502_vm7, %v2475_v55  ;;  %3295 = vmatpush3.bf16.msra.mxu0 %v4240_v39  ;;  %v3393_v39 = vunpack.i.h.bf16 %v3391_v53 }
 0xad2   : > { %3296 = vmatprep.subr.bf16.mxu0 %v3456_v26  ;;  %v3403_v52 = vunpack.i.h.bf16 %v3401_v46  ;;  %v3402_v23 = vunpack.i.l.bf16 %v3401_v46  ;;  %v3398_v44 = vunpack.i.h.bf16 %v4318_v5  ;;  %v3397_v37 = vunpack.i.l.bf16 %v4318_v5 }
 0xad3   : > { %v2347_v22 = vsel %vm452_vm0, %v4277_v14, %v3393_v39 }
 0xad4   : > { %v2355_v35 = vsel %vm2350_vm6, %v2346_v25, %v3402_v23  ;;  %v2356_v36 = vsel %vm2350_vm6, %v2347_v22, %v3403_v52  ;;  %v2349_v5 = vsel %vm452_vm0, %v4316_v7, %v3398_v44 }
 0xad5   : > { %v3406_v24 = vpop.permute.xlu1 %3405  ;;  %v3421_v28 = vpop.permute.xlu0 %3420  ;;  %3297 = vmatpush3.bf16.msra.mxu0 %v3456_v26 }
 0xad6   : > { %3298 = vmatprep.subr.bf16.mxu0 %v3458_v48  ;;  %v3408_v51 = vunpack.i.h.bf16 %v3406_v24  ;;  %v3407_v57 = vunpack.i.l.bf16 %v3406_v24  ;;  %v3423_v9 = vunpack.i.h.bf16 %v3421_v28  ;;  %v3422_v13 = vunpack.i.l.bf16 %v3421_v28  ;;  %v2683_v24 = vld [vmem:[#allocation2 + $0x90] sm:$0xff] }
 0xad8   : > { %3277 = vmatmul.mubr.msk.bf16.gmra.mxu0 %vm2502_vm7, %v2476_v56  ;;  %v2345_v11 = vsel %vm452_vm0, %v4273_v4, %v3408_v51  ;;  %v2344_v31 = vsel %vm452_vm0, %v4293_v27, %v3407_v57  ;;  %v2765_v2 = vsel %vm452_vm0, %v4273_v4, %v3423_v9  ;;  %v2764_v45 = vsel %vm452_vm0, %v4293_v27, %v3422_v13 }
 0xad9   : > { %v3411_v41 = vpop.permute.xlu1 %3410  ;;  %v3426_v16 = vpop.permute.xlu0 %3425  ;;  %3299 = vmatpush3.bf16.msra.mxu0 %v3458_v48  ;;  %v2361_v4 = vpack.c.bf16 %v2356_v36, %v2355_v35  ;;  %v2781_v27 = vpack.c.bf16 %v2775_v34, %v2774_v3  ;;  %v2348_v48 = vsel %vm452_vm0, %v4279_v15, %v3397_v37 }
 0xada   : > { %v3413_v30 = vunpack.i.h.bf16 %v3411_v41  ;;  %v3412_v21 = vunpack.i.l.bf16 %v3411_v41  ;;  %v3428_v43 = vunpack.i.h.bf16 %v3426_v16  ;;  %v3427_v14 = vunpack.i.l.bf16 %v3426_v16 }
 0xadc   : > { %v2353_v47 = vsel %vm2350_vm6, %v2344_v31, %v3412_v21  ;;  %v2354_v32 = vsel %vm2350_vm6, %v2345_v11, %v3413_v30  ;;  %v2772_v12 = vsel %vm2350_vm6, %v2764_v45, %v3427_v14  ;;  %v2773_v53 = vsel %vm2350_vm6, %v2765_v2, %v3428_v43  ;;  %v3067_v11 = vld [vmem:[%s4432_s11] ss:$0 sm:$0xff] }
 0xadd   : > { %v2360_v42 = vpack.c.bf16 %v2354_v32, %v2353_v47  ;;  %v2780_v26 = vpack.c.bf16 %v2773_v53, %v2772_v12  ;;  %v3416_v55 = vpop.permute.xlu1 %3415  ;;  %v3431_v54 = vpop.permute.xlu0 %3430 }
 0xade   : > { %v3418_v58 = vunpack.i.h.bf16 %v3416_v55  ;;  %v3417_v46 = vunpack.i.l.bf16 %v3416_v55  ;;  %v3433_v20 = vunpack.i.h.bf16 %v3431_v54  ;;  %v3432_v61 = vunpack.i.l.bf16 %v3431_v54 }
 0xadf   : > { %3287 = vmatmul.mubr.msk.bf16.vlgmr.msra.gmra.mxu1 %vm2502_vm7, %v2360_v42  ;;  %3300 = vmatprep.mubr.msk.bf16.mxu0 %vm2502_vm7, %v2780_v26 }
 0xae0   : > { %3290 = vmatprep.mubr.msk.bf16.mxu1 %vm2502_vm7, %v2361_v4  ;;  %3301 = vmatmul.mubr.msk.bf16.vlgmr.msra.gmra.mxu0 %vm2502_vm7, %v2781_v27  ;;  %v2357_v1 = vsel %vm2350_vm6, %v2348_v48, %v3417_v46  ;;  %v2358_v38 = vsel %vm2350_vm6, %v2349_v5, %v3418_v58  ;;  %v2769_v29 = vsel %vm452_vm0, %v4316_v7, %v3433_v20 }
 0xae1   : > { %v3436_v62 = vpop.permute.xlu1 %3435  ;;  %v3441_v63 = vpop.permute.xlu0 %3440  ;;  %v2768_v6 = vsel %vm452_vm0, %v4279_v15, %v3432_v61  ;;  %v2362_v51 = vpack.c.bf16 %v2358_v38, %v2357_v1 }
 0xae2   : > { %v3443_v39 = vunpack.i.h.bf16 %v3441_v63  ;;  %v3442_v8 = vunpack.i.l.bf16 %v3441_v63  ;;  %v3438_v52 = vunpack.i.h.bf16 %v3436_v62  ;;  %v3437_v23 = vunpack.i.l.bf16 %v3436_v62 }
 0xae4   : > { %v2776_v28 = vsel %vm2350_vm6, %v2768_v6, %v3442_v8  ;;  %v2777_v56 = vsel %vm2350_vm6, %v2769_v29, %v3443_v39  ;;  %v2771_v0 = vsel %vm452_vm0, %v2683_v24, %v3438_v52  ;;  %v2770_v7 = vsel %vm452_vm0, %v4314_v59, %v3437_v23 }
 0xae5   : > { %v2782_v57 = vpack.c.bf16 %v2777_v56, %v2776_v28  ;;  %v3446_v9 = vpop.permute.xlu1 %3445 }
 0xae6   : > { %v3448_v13 = vunpack.i.h.bf16 %v3446_v9  ;;  %v3447_v17 = vunpack.i.l.bf16 %v3446_v9 }
 0xae7   : > { %3291 = vmatmul.mubr.msk.bf16.gmra.mxu1 %vm2502_vm7, %v2362_v51  ;;  %3304 = vmatprep.mubr.msk.bf16.mxu0 %vm2502_vm7, %v2782_v57 }
 0xae8   : > { %v2778_v15 = vsel %vm2350_vm6, %v2770_v7, %v3447_v17  ;;  %v2779_v22 = vsel %vm2350_vm6, %v2771_v0, %v3448_v13 }
 0xae9   : > { %v2783_v25 = vpack.c.bf16 %v2779_v22, %v2778_v15 }
 0xaeb   : > { %3305 = vmatmul.mubr.msk.bf16.gmra.mxu0 %vm2502_vm7, %v2783_v25 }
 0xb90   : > { %v3274_v3 = vpop.f32.mrf.mxu0 }
 0xb92   : > { %v2549_v34 = vpop.f32.mrf.mxu0 }
 0xb94   : > { %v3275_v35 = vpop.f32.mrf.mxu0 }
 0xb96   : > { %v2552_v36 = vpop.f32.mrf.mxu0 }
 0xb98   : > { %v3278_v41 = vpop.f32.mrf.mxu0 }
 0xb9a   : > { %v2565_v16 = vpop.f32.mrf.mxu0 }
 0xb9c   : > { %v3279_v30 = vpop.f32.mrf.mxu0 }
 0xb9e   : > { %v2568_v59 = vpop.f32.mrf.mxu0 }
 0xb9f   : > { %v3288_v21 = vpop.f32.mrf.mxu1 }
 0xba0   : > { %v2653_v43 = vadd.f32 %v3288_v21, %v3274_v3  ;;  %v3302_v14 = vpop.f32.mrf.mxu0 }
 0xba1   : > { %v2644_v31 = vpop.f32.mrf.mxu1 }
 0xba2   : > { %v2888_v2 = vadd.f32 %v3302_v14, %v2653_v43  ;;  %v2645_v45 = vadd.f32 %v2644_v31, %v2549_v34  ;;  %v2855_v47 = vpop.f32.mrf.mxu0 }
 0xba3   : > { %v3289_v32 = vpop.f32.mrf.mxu1 }
 0xba4   : > { %v2903_v12 = vadd.f32 %v3067_v11, %v2888_v2  ;;  %v2886_v53 = vadd.f32 %v2855_v47, %v2645_v45  ;;  %v2656_v44 = vadd.f32 %v3289_v32, %v3275_v35  ;;  %v3303_v37 = vpop.f32.mrf.mxu0 }
 0xba5   : > { %v2647_v42 = vpop.f32.mrf.mxu1 }
 0xba6   : > { %v2911_v26 = vadd.f32 %v2903_v12, %v4076_v10  ;;  %v2901_v55 = vadd.f32 %v3067_v11, %v2886_v53  ;;  %v2889_v54 = vadd.f32 %v3303_v37, %v2656_v44  ;;  %v2648_v4 = vadd.f32 %v2647_v42, %v2552_v36  ;;  %v2858_v58 = vpop.f32.mrf.mxu0 }
 0xba7   : > { %v3292_v46 = vpop.f32.mrf.mxu1 }
 0xba8   : > { %2919 = vst.msk [vmem:[%s4392_s30 + $0x10] sm:$0xff] %vm452_vm0, %v2911_v26  ;;  %v2909_v27 = vadd.f32 %v2901_v55, %v4067_v18  ;;  %v2904_v20 = vadd.f32 %v3067_v11, %v2889_v54  ;;  %v2887_v61 = vadd.f32 %v2858_v58, %v2648_v4  ;;  %v2669_v10 = vadd.f32 %v3292_v46, %v3278_v41 }
 0xba9   : > { %v2660_v48 = vpop.f32.mrf.mxu1 }
 0xbaa   : > { %2917 = vst.msk [vmem:[%s4392_s30] sm:$0xff] %vm452_vm0, %v2909_v27  ;;  %v2912_v5 = vadd.f32 %v2904_v20, %v4087_v60  ;;  %v2902_v62 = vadd.f32 %v3067_v11, %v2887_v61  ;;  %v2661_v39 = vadd.f32 %v2660_v48, %v2565_v16 }
 0xbab   : > { %v3293_v63 = vpop.f32.mrf.mxu1  ;;  %v3306_v1 = vpop.f32.mrf.mxu0 }
 0xbac   : > { %2920 = vst.msk [vmem:[%s4392_s30 + $0x18] sm:$0xff] %vm452_vm0, %v2912_v5  ;;  %v2910_v38 = vadd.f32 %v2902_v62, %v4073_v40  ;;  %v2892_v8 = vadd.f32 %v3306_v1, %v2669_v10  ;;  %v2672_v6 = vadd.f32 %v3293_v63, %v3279_v30 }
 0xbad   : > { %v2663_v18 = vpop.f32.mrf.mxu1  ;;  %v2871_v29 = vpop.f32.mrf.mxu0 }
 0xbae   : > { %2918 = vst.msk [vmem:[%s4392_s30 + $0x8] sm:$0xff] %vm452_vm0, %v2910_v38  ;;  %v2907_v52 = vadd.f32 %v3067_v11, %v2892_v8  ;;  %v2890_v60 = vadd.f32 %v2871_v29, %v2661_v39  ;;  %v2664_v28 = vadd.f32 %v2663_v18, %v2568_v59 }
 0xbaf   : > { %v3307_v23 = vpop.f32.mrf.mxu0 }
 0xbb0   : > { %v2915_v24 = vadd.f32 %v2907_v52, %v4105_v50  ;;  %v2905_v56 = vadd.f32 %v3067_v11, %v2890_v60  ;;  %v2893_v51 = vadd.f32 %v3307_v23, %v2672_v6 }
 0xbb1   : > { %v2874_v57 = vpop.f32.mrf.mxu0 }
 0xbb2   : > { %2923 = vst.msk [vmem:[%s4392_s30 + $0x30] sm:$0xff] %vm452_vm0, %v2915_v24  ;;  %v2913_v40 = vadd.f32 %v2905_v56, %v4098_v49  ;;  %v2908_v9 = vadd.f32 %v3067_v11, %v2893_v51  ;;  %v2891_v13 = vadd.f32 %v2874_v57, %v2664_v28 }
 0xbb4   : > { %2921 = vst.msk [vmem:[%s4392_s30 + $0x20] sm:$0xff] %vm452_vm0, %v2913_v40  ;;  %v2916_v17 = vadd.f32 %v2908_v9, %v4093_v19  ;;  %v2906_v0 = vadd.f32 %v3067_v11, %v2891_v13 }
 0xbb6   : > { %2924 = vst.msk [vmem:[%s4392_s30 + $0x38] sm:$0xff] %vm452_vm0, %v2916_v17  ;;  %v2914_v7 = vadd.f32 %v2906_v0, %v4082_v33 }
 0xbb8   : > { %2922 = vst.msk [vmem:[%s4392_s30 + $0x28] sm:$0xff] %vm452_vm0, %v2914_v7 }
 0xbb9 PF: > { %s23_s25 = sadd.s32 1, %s3569_s25  }
 0xbba   : > { %p20_p4 = scmp.ge.s32.totalorder %s23_s25, 4  }
 0xbbc   :  { %22 = sbr.rel (!%p20_p4) target bundleno = 1 (0x1), region = 108 }

</bundles_post_ra>
